<compile_context>
chip_gen: v5e
topology: v5e:2x2
jax: 0.10.0
libtpu: 0.0.40
codegen_flags: <defaults>
</compile_context>

<pallas_src>
import jax
import jax.numpy as jnp
import numpy as np
from jax.experimental import pallas as pl
from jax.experimental.pallas import tpu as pltpu


def _make_kernel(num_blocks, cin_pad, ch, H, W, nb_per_step):
    HW = H * W
    L = nb_per_step * HW

    def kernel(x_ref, w1_ref, wcc_ref, bias_ref, o_ref):
        def mm(a, b):
            return jnp.dot(a, b, preferred_element_type=jnp.float32)

        c = x_ref[0]                                               # (cin_pad, L)

        # Per-pixel masks, hoisted out of the unrolled block loop.  Float
        # multiplicands; they cancel roll wrap-around at w-edges and at the
        # first row of every sample (incl. sample boundaries when Nb > 1).
        lane = jax.lax.broadcasted_iota(jnp.int32, (ch, L), 1)
        wcol = lane % W
        not_edge = ((wcol != 0) & (wcol != W - 1)).astype(jnp.float32)   # (ch, L)
        not_top = ((lane % HW) >= W).astype(jnp.float32)                 # (ch, L)

        for blk in range(num_blocks):
            b1f = bias_ref[blk, 0:ch]                      # (ch, L) pre-broadcast
            c23c = bias_ref[blk, ch:2 * ch]                # fused pad/bias const
            b3f = bias_ref[blk, 2 * ch:3 * ch]
            b4f = bias_ref[blk, 3 * ch:3 * ch + cin_pad]   # (cin_pad, L)

            # c1: 1x1 conv + ReLU.
            h1 = jnp.maximum(mm(w1_ref[blk], c) + b1f, 0.0)              # (ch, L)

            # Fused c2 (1,3 valid conv) + ConstantPad (row of ones on top of H)
            # + c3 (2,1 conv, W zero-padded): one matmul, taps as lane rolls.
            # Row blocks of g: (tap t, c3-tap k) at rows (2t+k)*ch.
            g = mm(wcc_ref[blk, 0:6 * ch], h1)                           # (6ch, L)
            low = pltpu.roll(g[0:2 * ch], 1, axis=1)                     # w-1 taps (k=0,1)
            high = pltpu.roll(g[4 * ch:6 * ch], L - 1, axis=1)           # w+1 taps (k=0,1)
            t0 = low[0:ch] + g[2 * ch:3 * ch] + high[0:ch]               # h-1 row (k=0)
            t1 = low[ch:2 * ch] + g[3 * ch:4 * ch] + high[ch:2 * ch]     # same row (k=1)
            inner = t1 + pltpu.roll(t0, W, axis=1) * not_top + c23c
            h4 = inner * not_edge + b3f                                  # (ch, L)

            # ReLU + c4: 1x1 conv back to input channels, residual add.
            h5 = jnp.maximum(h4, 0.0)
            c = c + mm(wcc_ref[blk, 6 * ch:6 * ch + cin_pad], h5) + b4f  # (cin_pad, L)

        o_ref[0] = jnp.maximum(c, 0.0)                                   # final ReLU

    return kernel


def pixelcnn_forward(x_nchw, params, H, W, lane_groups=None):
    """x_nchw: (N, Cin, H, W) float32; params as built in __main__."""
    w1, b1, w2, b2, w3, b3, w4, b4 = params
    N, Cin = x_nchw.shape[0], x_nchw.shape[1]
    nb, _, Ch = w1.shape
    HW = H * W

    # Split batch into `lane_groups` grid steps; each step lane-concatenates
    # Nb = N // lane_groups samples.  Default 2 steps -> both v7x TCs used.
    if lane_groups is None:
        lane_groups = 2 if (N % 2 == 0 and N >= 2) else 1
    lane_groups = max(1, min(lane_groups, N))
    assert N % lane_groups == 0, "batch must be divisible by lane_groups"
    Nb = N // lane_groups
    L = Nb * HW
    assert L % 128 == 0, "lane extent must be a multiple of 128 (roll/mask layout)"

    cin_pad = max(8, ((Cin + 7) // 8) * 8)

    f32 = jnp.float32
    w1_, w2_, w3_, w4_ = (a.astype(f32) for a in (w1, w2, w3, w4))
    b1_, b2_, b3_, b4_ = (a.astype(f32) for a in (b1, b2, b3, b4))

    # NCHW -> (lane_groups, cin_pad, Nb*HW): channels on sublanes, pixels
    # (h-major / w-minor, Nb samples concatenated) on lanes.
    x = x_nchw.astype(f32).reshape(N, Cin, HW)
    x = jnp.pad(x, ((0, 0), (0, cin_pad - Cin), (0, 0)))
    x = x.reshape(lane_groups, Nb, cin_pad, HW).transpose(0, 2, 1, 3)
    x = x.reshape(lane_groups, cin_pad, L)

    # --- weight slabs -------------------------------------------------------
    # c1: (Cout, Cin) orientation, Cin zero-padded to cin_pad.
    w1t = jnp.transpose(w1_, (0, 2, 1))                        # (nb, Ch, Cin)
    w1t = jnp.pad(w1t, ((0, 0), (0, 0), (0, cin_pad - Cin)))   # (nb, Ch, cin_pad)

    # Fused c2*c3 weight: W23[(t,k)] = w3[k].T @ w2[t].T, rows at (2t+k)*Ch.
    w2t = jnp.transpose(w2_, (0, 1, 3, 2))                     # (nb, 3, Ch, Ch) out,in
    w3t = jnp.transpose(w3_, (0, 1, 3, 2))                     # (nb, 2, Ch, Ch) out,in
    w23 = jnp.einsum('nkab,ntbc->ntkac', w3t, w2t).reshape(nb, 6 * Ch, Ch)

    # c4: (Cout, Cin) orientation, output rows zero-padded to cin_pad.
    w4t = jnp.transpose(w4_, (0, 2, 1))                        # (nb, Cin, Ch)
    w4t = jnp.pad(w4t, ((0, 0), (0, cin_pad - Cin), (0, 0)))   # (nb, cin_pad, Ch)

    wcc = jnp.concatenate([w23, w4t], axis=1)                  # (nb, 6Ch+cin_pad, Ch)

    # --- bias / pad-constant slab, pre-broadcast to full lane width ----------
    lane = jnp.arange(L, dtype=jnp.int32)
    h_top = ((lane % HW) < W)[None, :]                         # (1, L)

    b1c = b1_[:, 0, :]                                         # (nb, Ch)
    b2c = b2_[:, 0, :]
    b3c = b3_[:, 0, :]
    b4c = jnp.pad(b4_[:, 0, :], ((0, 0), (0, cin_pad - Cin)))  # (nb, cin_pad)

    # Fold the c2 bias through the c3 taps, and the "row of ones" pad through
    # the h-1 tap of c3:  non-top rows get c3b0+c3b1, top rows get onesc+c3b1.
    c3b0 = jnp.einsum('ncd,nc->nd', w3_[:, 0], b2c)            # W3[0] @ b2
    c3b1 = jnp.einsum('ncd,nc->nd', w3_[:, 1], b2c)            # W3[1] @ b2
    onesc = jnp.sum(w3_[:, 0], axis=1)                         # W3[0] @ ones

    def lane_bcast(v):                                         # (nb, R) -> (nb, R, L)
        return jnp.broadcast_to(v[:, :, None], v.shape + (L,))

    c23c = jnp.where(h_top[None], (onesc + c3b1)[:, :, None],
                     (c3b0 + c3b1)[:, :, None])                # (nb, Ch, L)
    bias_slab = jnp.concatenate(
        [lane_bcast(b1c), c23c, lane_bcast(b3c), lane_bcast(b4c)], axis=1)
    # (nb, 3*Ch + cin_pad, L)

    kernel = _make_kernel(nb, cin_pad, Ch, H, W, Nb)

    def const_spec(a):
        nd = a.ndim
        return pl.BlockSpec(a.shape, lambda n, _nd=nd: (0,) * _nd)

    out = pl.pallas_call(
        kernel,
        out_shape=jax.ShapeDtypeStruct((lane_groups, cin_pad, L), jnp.float32),
        grid=(lane_groups,),
        in_specs=[pl.BlockSpec((1, cin_pad, L), lambda n: (n, 0, 0)),
                  const_spec(w1t), const_spec(wcc), const_spec(bias_slab)],
        out_specs=pl.BlockSpec((1, cin_pad, L), lambda n: (n, 0, 0)),
        compiler_params=pltpu.CompilerParams(
            dimension_semantics=("parallel",)),
    )(x, w1t, wcc, bias_slab)

    out = out.reshape(lane_groups, cin_pad, Nb, HW).transpose(0, 2, 1, 3)
    out = out.reshape(N, cin_pad, H, W)[:, :Cin]
    return out


def ref_forward(x, params):
    """Pure-JAX reference of the PyTorch forward (NCHW), same weight convention."""
    w1, b1, w2, b2, w3, b3, w4, b4 = params
    N, Cin, H, W = x.shape
    B = w1.shape[0]
    Ch = w1.shape[-1]
    prec = jax.lax.Precision.HIGHEST
    c = x
    for blk in range(B):
        h1 = jax.nn.relu(jnp.einsum('nchw,cd->ndhw', c, w1[blk], precision=prec)
                         + b1[blk, 0][None, :, None, None])
        h2 = sum(jnp.einsum('nchw,cd->ndhw', h1[:, :, :, t:W - 2 + t], w2[blk, t],
                            precision=prec) for t in range(3)) \
            + b2[blk, 0][None, :, None, None]                       # (N, Ch, H, W-2)
        h3 = jnp.concatenate([jnp.ones((N, Ch, 1, W - 2), x.dtype), h2], axis=2)
        h3p = jnp.pad(h3, ((0, 0), (0, 0), (0, 0), (1, 1)))         # (N, Ch, H+1, W)
        h4 = sum(jnp.einsum('nchw,cd->ndhw', h3p[:, :, t:t + H, :], w3[blk, t],
                            precision=prec) for t in range(2)) \
            + b3[blk, 0][None, :, None, None]                       # (N, Ch, H, W)
        h5 = jax.nn.relu(h4)
        out = jnp.einsum('nchw,cd->ndhw', h5, w4[blk], precision=prec) \
            + b4[blk, 0][None, :, None, None]
        c = c + out
    return jax.nn.relu(c)


if __name__ == "__main__":
    # Small shapes consistent with the module (PixelCNN(input_channels=4, hidden=32, 5 blocks))
    N, Cin, H, W = 2, 4, 16, 16
    Ch, num_blocks = 32, 5

    key = jax.random.PRNGKey(0)
    ks = jax.random.split(key, 9)
    s = 0.1
    # Weight layout: (block, [tap,] in_channels, out_channels); PyTorch Conv2d
    # weights (out, in, kh, kw) map to this via W[tap][c, d] = W_pt[d, c, kh, kw].
    w1 = (jax.random.normal(ks[0], (num_blocks, Cin, Ch)) * s).astype(jnp.float32)
    b1 = (jax.random.normal(ks[1], (num_blocks, 1, Ch)) * s).astype(jnp.float32)
    w2 = (jax.random.normal(ks[2], (num_blocks, 3, Ch, Ch)) * s).astype(jnp.float32)
    b2 = (jax.random.normal(ks[3], (num_blocks, 1, Ch)) * s).astype(jnp.float32)
    w3 = (jax.random.normal(ks[4], (num_blocks, 2, Ch, Ch)) * s).astype(jnp.float32)
    b3 = (jax.random.normal(ks[5], (num_blocks, 1, Ch)) * s).astype(jnp.float32)
    w4 = (jax.random.normal(ks[6], (num_blocks, Ch, Cin)) * s).astype(jnp.float32)
    b4 = (jax.random.normal(ks[7], (num_blocks, 1, Cin)) * s).astype(jnp.float32)
    params = (w1, b1, w2, b2, w3, b3, w4, b4)

    x = jax.random.uniform(ks[8], (N, Cin, H, W), dtype=jnp.float32)

    y_ref = np.asarray(ref_forward(x, params))

    # Default config: 2 grid steps (one lane group per v7x TensorCore).
    y = jax.block_until_ready(pixelcnn_forward(x, params, H, W))
    assert y.shape == x.shape
    np.testing.assert_allclose(np.asarray(y), y_ref, rtol=3e-2, atol=3e-2)

    # Batch-folded-into-lanes config (Nb=2 samples concatenated on the lane
    # axis in a single grid step) — exercises the lane-%HW / lane-%W masks.
    y2 = jax.block_until_ready(pixelcnn_forward(x, params, H, W, lane_groups=1))
    np.testing.assert_allclose(np.asarray(y2), y_ref, rtol=3e-2, atol=3e-2)

    print("KERNEL_OK")
</pallas_src>

<mosaic_0001>
module attributes {stable_mosaic.version = 11 : i64} {
  func.func @kernel(%arg0: i32, %arg1: memref<1x8x256xf32, #tpu.memory_space<vmem>>, %arg2: memref<5x32x8xf32, #tpu.memory_space<vmem>>, %arg3: memref<5x200x32xf32, #tpu.memory_space<vmem>>, %arg4: memref<5x104x256xf32, #tpu.memory_space<vmem>>, %arg5: memref<1x8x256xf32, #tpu.memory_space<vmem>>) attributes {dimension_semantics = [#tpu.dimension_semantics<parallel>], iteration_bounds = array<i64: 2>, scalar_prefetch = 0 : i64, scratch_operands = 0 : i64, tpu.core_type = #tpu.core_type<tc>, window_params = [{transform_indices = @transform_0, window_bounds = array<i64: 1, 8, 256>}, {pipeline_mode = #tpu.pipeline_mode<synchronous>, transform_indices = @transform_1, window_bounds = array<i64: 5, 32, 8>}, {pipeline_mode = #tpu.pipeline_mode<synchronous>, transform_indices = @transform_2, window_bounds = array<i64: 5, 200, 32>}, {pipeline_mode = #tpu.pipeline_mode<synchronous>, transform_indices = @transform_3, window_bounds = array<i64: 5, 104, 256>}, {transform_indices = @transform_4, window_bounds = array<i64: 1, 8, 256>}]} {
    %c0 = arith.constant 0 : index
    %c0_0 = arith.constant 0 : index
    %c0_1 = arith.constant 0 : index
    %0 = vector.load %arg1[%c0, %c0_0, %c0_1] : memref<1x8x256xf32, #tpu.memory_space<vmem>>, vector<1x8x256xf32>
    %1 = vector.shape_cast %0 : vector<1x8x256xf32> to vector<8x256xf32>
    %2 = tpu.iota {dimensions = array<i32: 1>} : vector<32x256xi32>
    %c16_i32 = arith.constant 16 : i32
    %c0_i32 = arith.constant 0 : i32
    %3 = arith.cmpi eq, %c16_i32, %c0_i32 : i32
    %c1_i32 = arith.constant 1 : i32
    %4 = arith.select %3, %c1_i32, %c16_i32 : i32
    %5 = vector.broadcast %4 : i32 to vector<32x256xi32>
    %6 = arith.remsi %2, %5 : vector<32x256xi32>
    %c0_i32_2 = arith.constant 0 : i32
    %7 = vector.broadcast %c0_i32_2 : i32 to vector<32x256xi32>
    %8 = arith.cmpi ne, %6, %7 : vector<32x256xi32>
    %c0_i32_3 = arith.constant 0 : i32
    %9 = vector.broadcast %c0_i32_3 : i32 to vector<32x256xi32>
    %10 = arith.cmpi slt, %6, %9 : vector<32x256xi32>
    %c0_i32_4 = arith.constant 0 : i32
    %11 = arith.cmpi slt, %4, %c0_i32_4 : i32
    %12 = vector.broadcast %11 : i1 to vector<32x256xi1>
    %13 = vector.broadcast %12 : vector<32x256xi1> to vector<32x256xi1>
    %14 = arith.xori %10, %13 : vector<32x256xi1>
    %15 = arith.andi %14, %8 : vector<32x256xi1>
    %16 = vector.broadcast %4 : i32 to vector<32x256xi32>
    %17 = arith.addi %6, %16 : vector<32x256xi32>
    %18 = arith.select %15, %17, %6 : vector<32x256xi1>, vector<32x256xi32>
    %c0_i32_5 = arith.constant 0 : i32
    %19 = vector.broadcast %c0_i32_5 : i32 to vector<32x256xi32>
    %20 = arith.cmpi ne, %18, %19 : vector<32x256xi32>
    %c15_i32 = arith.constant 15 : i32
    %21 = vector.broadcast %c15_i32 : i32 to vector<32x256xi32>
    %22 = arith.cmpi ne, %18, %21 : vector<32x256xi32>
    %23 = arith.andi %20, %22 : vector<32x256xi1>
    %24 = arith.extui %23 : vector<32x256xi1> to vector<32x256xi32>
    %25 = arith.sitofp %24 : vector<32x256xi32> to vector<32x256xf32>
    %c256_i32 = arith.constant 256 : i32
    %c0_i32_6 = arith.constant 0 : i32
    %26 = arith.cmpi eq, %c256_i32, %c0_i32_6 : i32
    %c1_i32_7 = arith.constant 1 : i32
    %27 = arith.select %26, %c1_i32_7, %c256_i32 : i32
    %28 = vector.broadcast %27 : i32 to vector<32x256xi32>
    %29 = arith.remsi %2, %28 : vector<32x256xi32>
    %c0_i32_8 = arith.constant 0 : i32
    %30 = vector.broadcast %c0_i32_8 : i32 to vector<32x256xi32>
    %31 = arith.cmpi ne, %29, %30 : vector<32x256xi32>
    %c0_i32_9 = arith.constant 0 : i32
    %32 = vector.broadcast %c0_i32_9 : i32 to vector<32x256xi32>
    %33 = arith.cmpi slt, %29, %32 : vector<32x256xi32>
    %c0_i32_10 = arith.constant 0 : i32
    %34 = arith.cmpi slt, %27, %c0_i32_10 : i32
    %35 = vector.broadcast %34 : i1 to vector<32x256xi1>
    %36 = vector.broadcast %35 : vector<32x256xi1> to vector<32x256xi1>
    %37 = arith.xori %33, %36 : vector<32x256xi1>
    %38 = arith.andi %37, %31 : vector<32x256xi1>
    %39 = vector.broadcast %27 : i32 to vector<32x256xi32>
    %40 = arith.addi %29, %39 : vector<32x256xi32>
    %41 = arith.select %38, %40, %29 : vector<32x256xi1>, vector<32x256xi32>
    %c16_i32_11 = arith.constant 16 : i32
    %42 = vector.broadcast %c16_i32_11 : i32 to vector<32x256xi32>
    %43 = arith.cmpi sge, %41, %42 : vector<32x256xi32>
    %44 = arith.extui %43 : vector<32x256xi1> to vector<32x256xi32>
    %45 = arith.sitofp %44 : vector<32x256xi32> to vector<32x256xf32>
    %c0_12 = arith.constant 0 : index
    %c0_13 = arith.constant 0 : index
    %c0_14 = arith.constant 0 : index
    %46 = vector.load %arg4[%c0_12, %c0_13, %c0_14] : memref<5x104x256xf32, #tpu.memory_space<vmem>>, vector<1x32x256xf32>
    %47 = vector.shape_cast %46 : vector<1x32x256xf32> to vector<32x256xf32>
    %c0_15 = arith.constant 0 : index
    %c32 = arith.constant 32 : index
    %c0_16 = arith.constant 0 : index
    %48 = vector.load %arg4[%c0_15, %c32, %c0_16] : memref<5x104x256xf32, #tpu.memory_space<vmem>>, vector<1x32x256xf32>
    %49 = vector.shape_cast %48 : vector<1x32x256xf32> to vector<32x256xf32>
    %c0_17 = arith.constant 0 : index
    %c64 = arith.constant 64 : index
    %c0_18 = arith.constant 0 : index
    %50 = vector.load %arg4[%c0_17, %c64, %c0_18] : memref<5x104x256xf32, #tpu.memory_space<vmem>>, vector<1x32x256xf32>
    %51 = vector.shape_cast %50 : vector<1x32x256xf32> to vector<32x256xf32>
    %c0_19 = arith.constant 0 : index
    %c96 = arith.constant 96 : index
    %c0_20 = arith.constant 0 : index
    %52 = vector.load %arg4[%c0_19, %c96, %c0_20] : memref<5x104x256xf32, #tpu.memory_space<vmem>>, vector<1x8x256xf32>
    %53 = vector.shape_cast %52 : vector<1x8x256xf32> to vector<8x256xf32>
    %c0_21 = arith.constant 0 : index
    %c0_22 = arith.constant 0 : index
    %c0_23 = arith.constant 0 : index
    %54 = vector.load %arg2[%c0_21, %c0_22, %c0_23] : memref<5x32x8xf32, #tpu.memory_space<vmem>>, vector<1x32x8xf32>
    %55 = vector.shape_cast %54 : vector<1x32x8xf32> to vector<32x8xf32>
    %cst = arith.constant dense<0.000000e+00> : vector<32x256xf32>
    %56 = tpu.matmul %55, %1, %cst {dimension_numbers = #tpu.dot_dimension_numbers<[1], [0], [0], [1], [0, 0, 1, 1], [], []>} : vector<32x8xf32>, vector<8x256xf32>, vector<32x256xf32> -> vector<32x256xf32>
    %57 = arith.addf %56, %47 : vector<32x256xf32>
    %cst_24 = arith.constant 0.000000e+00 : f32
    %58 = vector.broadcast %cst_24 : f32 to vector<32x256xf32>
    %59 = arith.maximumf %57, %58 : vector<32x256xf32>
    %c0_25 = arith.constant 0 : index
    %c0_26 = arith.constant 0 : index
    %c0_27 = arith.constant 0 : index
    %60 = vector.load %arg3[%c0_25, %c0_26, %c0_27] : memref<5x200x32xf32, #tpu.memory_space<vmem>>, vector<1x192x32xf32>
    %61 = vector.shape_cast %60 : vector<1x192x32xf32> to vector<192x32xf32>
    %cst_28 = arith.constant dense<0.000000e+00> : vector<192x256xf32>
    %62 = tpu.matmul %61, %59, %cst_28 {dimension_numbers = #tpu.dot_dimension_numbers<[1], [0], [0], [1], [0, 0, 1, 1], [], []>} : vector<192x32xf32>, vector<32x256xf32>, vector<192x256xf32> -> vector<192x256xf32>
    %63 = vector.extract_strided_slice %62 {offsets = [0, 0], sizes = [64, 256], strides = [1, 1]} : vector<192x256xf32> to vector<64x256xf32>
    %c1_i32_29 = arith.constant 1 : i32
    %64 = tpu.dynamic_rotate %63 by %c1_i32_29 dim 1 : vector<64x256xf32>, i32 -> vector<64x256xf32>
    %65 = vector.extract_strided_slice %62 {offsets = [128, 0], sizes = [64, 256], strides = [1, 1]} : vector<192x256xf32> to vector<64x256xf32>
    %c255_i32 = arith.constant 255 : i32
    %66 = tpu.dynamic_rotate %65 by %c255_i32 dim 1 : vector<64x256xf32>, i32 -> vector<64x256xf32>
    %67 = vector.extract_strided_slice %64 {offsets = [0, 0], sizes = [32, 256], strides = [1, 1]} : vector<64x256xf32> to vector<32x256xf32>
    %68 = vector.extract_strided_slice %62 {offsets = [64, 0], sizes = [32, 256], strides = [1, 1]} : vector<192x256xf32> to vector<32x256xf32>
    %69 = arith.addf %67, %68 : vector<32x256xf32>
    %70 = vector.extract_strided_slice %66 {offsets = [0, 0], sizes = [32, 256], strides = [1, 1]} : vector<64x256xf32> to vector<32x256xf32>
    %71 = arith.addf %69, %70 : vector<32x256xf32>
    %72 = vector.extract_strided_slice %64 {offsets = [32, 0], sizes = [32, 256], strides = [1, 1]} : vector<64x256xf32> to vector<32x256xf32>
    %73 = vector.extract_strided_slice %62 {offsets = [96, 0], sizes = [32, 256], strides = [1, 1]} : vector<192x256xf32> to vector<32x256xf32>
    %74 = arith.addf %72, %73 : vector<32x256xf32>
    %75 = vector.extract_strided_slice %66 {offsets = [32, 0], sizes = [32, 256], strides = [1, 1]} : vector<64x256xf32> to vector<32x256xf32>
    %76 = arith.addf %74, %75 : vector<32x256xf32>
    %c16_i32_30 = arith.constant 16 : i32
    %77 = tpu.dynamic_rotate %71 by %c16_i32_30 dim 1 : vector<32x256xf32>, i32 -> vector<32x256xf32>
    %78 = arith.mulf %77, %45 : vector<32x256xf32>
    %79 = arith.addf %76, %78 : vector<32x256xf32>
    %80 = arith.addf %79, %49 : vector<32x256xf32>
    %81 = arith.mulf %80, %25 : vector<32x256xf32>
    %82 = arith.addf %81, %51 : vector<32x256xf32>
    %cst_31 = arith.constant 0.000000e+00 : f32
    %83 = vector.broadcast %cst_31 : f32 to vector<32x256xf32>
    %84 = arith.maximumf %82, %83 : vector<32x256xf32>
    %c0_32 = arith.constant 0 : index
    %c192 = arith.constant 192 : index
    %c0_33 = arith.constant 0 : index
    %85 = vector.load %arg3[%c0_32, %c192, %c0_33] : memref<5x200x32xf32, #tpu.memory_space<vmem>>, vector<1x8x32xf32>
    %86 = vector.shape_cast %85 : vector<1x8x32xf32> to vector<8x32xf32>
    %cst_34 = arith.constant dense<0.000000e+00> : vector<8x256xf32>
    %87 = tpu.matmul %86, %84, %cst_34 {dimension_numbers = #tpu.dot_dimension_numbers<[1], [0], [0], [1], [0, 0, 1, 1], [], []>} : vector<8x32xf32>, vector<32x256xf32>, vector<8x256xf32> -> vector<8x256xf32>
    %88 = arith.addf %1, %87 : vector<8x256xf32>
    %89 = arith.addf %88, %53 : vector<8x256xf32>
    %c1 = arith.constant 1 : index
    %c0_35 = arith.constant 0 : index
    %c0_36 = arith.constant 0 : index
    %90 = vector.load %arg4[%c1, %c0_35, %c0_36] : memref<5x104x256xf32, #tpu.memory_space<vmem>>, vector<1x32x256xf32>
    %91 = vector.shape_cast %90 : vector<1x32x256xf32> to vector<32x256xf32>
    %c1_37 = arith.constant 1 : index
    %c32_38 = arith.constant 32 : index
    %c0_39 = arith.constant 0 : index
    %92 = vector.load %arg4[%c1_37, %c32_38, %c0_39] : memref<5x104x256xf32, #tpu.memory_space<vmem>>, vector<1x32x256xf32>
    %93 = vector.shape_cast %92 : vector<1x32x256xf32> to vector<32x256xf32>
    %c1_40 = arith.constant 1 : index
    %c64_41 = arith.constant 64 : index
    %c0_42 = arith.constant 0 : index
    %94 = vector.load %arg4[%c1_40, %c64_41, %c0_42] : memref<5x104x256xf32, #tpu.memory_space<vmem>>, vector<1x32x256xf32>
    %95 = vector.shape_cast %94 : vector<1x32x256xf32> to vector<32x256xf32>
    %c1_43 = arith.constant 1 : index
    %c96_44 = arith.constant 96 : index
    %c0_45 = arith.constant 0 : index
    %96 = vector.load %arg4[%c1_43, %c96_44, %c0_45] : memref<5x104x256xf32, #tpu.memory_space<vmem>>, vector<1x8x256xf32>
    %97 = vector.shape_cast %96 : vector<1x8x256xf32> to vector<8x256xf32>
    %c1_46 = arith.constant 1 : index
    %c0_47 = arith.constant 0 : index
    %c0_48 = arith.constant 0 : index
    %98 = vector.load %arg2[%c1_46, %c0_47, %c0_48] : memref<5x32x8xf32, #tpu.memory_space<vmem>>, vector<1x32x8xf32>
    %99 = vector.shape_cast %98 : vector<1x32x8xf32> to vector<32x8xf32>
    %cst_49 = arith.constant dense<0.000000e+00> : vector<32x256xf32>
    %100 = tpu.matmul %99, %89, %cst_49 {dimension_numbers = #tpu.dot_dimension_numbers<[1], [0], [0], [1], [0, 0, 1, 1], [], []>} : vector<32x8xf32>, vector<8x256xf32>, vector<32x256xf32> -> vector<32x256xf32>
    %101 = arith.addf %100, %91 : vector<32x256xf32>
    %cst_50 = arith.constant 0.000000e+00 : f32
    %102 = vector.broadcast %cst_50 : f32 to vector<32x256xf32>
    %103 = arith.maximumf %101, %102 : vector<32x256xf32>
    %c1_51 = arith.constant 1 : index
    %c0_52 = arith.constant 0 : index
    %c0_53 = arith.constant 0 : index
    %104 = vector.load %arg3[%c1_51, %c0_52, %c0_53] : memref<5x200x32xf32, #tpu.memory_space<vmem>>, vector<1x192x32xf32>
    %105 = vector.shape_cast %104 : vector<1x192x32xf32> to vector<192x32xf32>
    %cst_54 = arith.constant dense<0.000000e+00> : vector<192x256xf32>
    %106 = tpu.matmul %105, %103, %cst_54 {dimension_numbers = #tpu.dot_dimension_numbers<[1], [0], [0], [1], [0, 0, 1, 1], [], []>} : vector<192x32xf32>, vector<32x256xf32>, vector<192x256xf32> -> vector<192x256xf32>
    %107 = vector.extract_strided_slice %106 {offsets = [0, 0], sizes = [64, 256], strides = [1, 1]} : vector<192x256xf32> to vector<64x256xf32>
    %c1_i32_55 = arith.constant 1 : i32
    %108 = tpu.dynamic_rotate %107 by %c1_i32_55 dim 1 : vector<64x256xf32>, i32 -> vector<64x256xf32>
    %109 = vector.extract_strided_slice %106 {offsets = [128, 0], sizes = [64, 256], strides = [1, 1]} : vector<192x256xf32> to vector<64x256xf32>
    %c255_i32_56 = arith.constant 255 : i32
    %110 = tpu.dynamic_rotate %109 by %c255_i32_56 dim 1 : vector<64x256xf32>, i32 -> vector<64x256xf32>
    %111 = vector.extract_strided_slice %108 {offsets = [0, 0], sizes = [32, 256], strides = [1, 1]} : vector<64x256xf32> to vector<32x256xf32>
    %112 = vector.extract_strided_slice %106 {offsets = [64, 0], sizes = [32, 256], strides = [1, 1]} : vector<192x256xf32> to vector<32x256xf32>
    %113 = arith.addf %111, %112 : vector<32x256xf32>
    %114 = vector.extract_strided_slice %110 {offsets = [0, 0], sizes = [32, 256], strides = [1, 1]} : vector<64x256xf32> to vector<32x256xf32>
    %115 = arith.addf %113, %114 : vector<32x256xf32>
    %116 = vector.extract_strided_slice %108 {offsets = [32, 0], sizes = [32, 256], strides = [1, 1]} : vector<64x256xf32> to vector<32x256xf32>
    %117 = vector.extract_strided_slice %106 {offsets = [96, 0], sizes = [32, 256], strides = [1, 1]} : vector<192x256xf32> to vector<32x256xf32>
    %118 = arith.addf %116, %117 : vector<32x256xf32>
    %119 = vector.extract_strided_slice %110 {offsets = [32, 0], sizes = [32, 256], strides = [1, 1]} : vector<64x256xf32> to vector<32x256xf32>
    %120 = arith.addf %118, %119 : vector<32x256xf32>
    %c16_i32_57 = arith.constant 16 : i32
    %121 = tpu.dynamic_rotate %115 by %c16_i32_57 dim 1 : vector<32x256xf32>, i32 -> vector<32x256xf32>
    %122 = arith.mulf %121, %45 : vector<32x256xf32>
    %123 = arith.addf %120, %122 : vector<32x256xf32>
    %124 = arith.addf %123, %93 : vector<32x256xf32>
    %125 = arith.mulf %124, %25 : vector<32x256xf32>
    %126 = arith.addf %125, %95 : vector<32x256xf32>
    %cst_58 = arith.constant 0.000000e+00 : f32
    %127 = vector.broadcast %cst_58 : f32 to vector<32x256xf32>
    %128 = arith.maximumf %126, %127 : vector<32x256xf32>
    %c1_59 = arith.constant 1 : index
    %c192_60 = arith.constant 192 : index
    %c0_61 = arith.constant 0 : index
    %129 = vector.load %arg3[%c1_59, %c192_60, %c0_61] : memref<5x200x32xf32, #tpu.memory_space<vmem>>, vector<1x8x32xf32>
    %130 = vector.shape_cast %129 : vector<1x8x32xf32> to vector<8x32xf32>
    %cst_62 = arith.constant dense<0.000000e+00> : vector<8x256xf32>
    %131 = tpu.matmul %130, %128, %cst_62 {dimension_numbers = #tpu.dot_dimension_numbers<[1], [0], [0], [1], [0, 0, 1, 1], [], []>} : vector<8x32xf32>, vector<32x256xf32>, vector<8x256xf32> -> vector<8x256xf32>
    %132 = arith.addf %89, %131 : vector<8x256xf32>
    %133 = arith.addf %132, %97 : vector<8x256xf32>
    %c2 = arith.constant 2 : index
    %c0_63 = arith.constant 0 : index
    %c0_64 = arith.constant 0 : index
    %134 = vector.load %arg4[%c2, %c0_63, %c0_64] : memref<5x104x256xf32, #tpu.memory_space<vmem>>, vector<1x32x256xf32>
    %135 = vector.shape_cast %134 : vector<1x32x256xf32> to vector<32x256xf32>
    %c2_65 = arith.constant 2 : index
    %c32_66 = arith.constant 32 : index
    %c0_67 = arith.constant 0 : index
    %136 = vector.load %arg4[%c2_65, %c32_66, %c0_67] : memref<5x104x256xf32, #tpu.memory_space<vmem>>, vector<1x32x256xf32>
    %137 = vector.shape_cast %136 : vector<1x32x256xf32> to vector<32x256xf32>
    %c2_68 = arith.constant 2 : index
    %c64_69 = arith.constant 64 : index
    %c0_70 = arith.constant 0 : index
    %138 = vector.load %arg4[%c2_68, %c64_69, %c0_70] : memref<5x104x256xf32, #tpu.memory_space<vmem>>, vector<1x32x256xf32>
    %139 = vector.shape_cast %138 : vector<1x32x256xf32> to vector<32x256xf32>
    %c2_71 = arith.constant 2 : index
    %c96_72 = arith.constant 96 : index
    %c0_73 = arith.constant 0 : index
    %140 = vector.load %arg4[%c2_71, %c96_72, %c0_73] : memref<5x104x256xf32, #tpu.memory_space<vmem>>, vector<1x8x256xf32>
    %141 = vector.shape_cast %140 : vector<1x8x256xf32> to vector<8x256xf32>
    %c2_74 = arith.constant 2 : index
    %c0_75 = arith.constant 0 : index
    %c0_76 = arith.constant 0 : index
    %142 = vector.load %arg2[%c2_74, %c0_75, %c0_76] : memref<5x32x8xf32, #tpu.memory_space<vmem>>, vector<1x32x8xf32>
    %143 = vector.shape_cast %142 : vector<1x32x8xf32> to vector<32x8xf32>
    %cst_77 = arith.constant dense<0.000000e+00> : vector<32x256xf32>
    %144 = tpu.matmul %143, %133, %cst_77 {dimension_numbers = #tpu.dot_dimension_numbers<[1], [0], [0], [1], [0, 0, 1, 1], [], []>} : vector<32x8xf32>, vector<8x256xf32>, vector<32x256xf32> -> vector<32x256xf32>
    %145 = arith.addf %144, %135 : vector<32x256xf32>
    %cst_78 = arith.constant 0.000000e+00 : f32
    %146 = vector.broadcast %cst_78 : f32 to vector<32x256xf32>
    %147 = arith.maximumf %145, %146 : vector<32x256xf32>
    %c2_79 = arith.constant 2 : index
    %c0_80 = arith.constant 0 : index
    %c0_81 = arith.constant 0 : index
    %148 = vector.load %arg3[%c2_79, %c0_80, %c0_81] : memref<5x200x32xf32, #tpu.memory_space<vmem>>, vector<1x192x32xf32>
    %149 = vector.shape_cast %148 : vector<1x192x32xf32> to vector<192x32xf32>
    %cst_82 = arith.constant dense<0.000000e+00> : vector<192x256xf32>
    %150 = tpu.matmul %149, %147, %cst_82 {dimension_numbers = #tpu.dot_dimension_numbers<[1], [0], [0], [1], [0, 0, 1, 1], [], []>} : vector<192x32xf32>, vector<32x256xf32>, vector<192x256xf32> -> vector<192x256xf32>
    %151 = vector.extract_strided_slice %150 {offsets = [0, 0], sizes = [64, 256], strides = [1, 1]} : vector<192x256xf32> to vector<64x256xf32>
    %c1_i32_83 = arith.constant 1 : i32
    %152 = tpu.dynamic_rotate %151 by %c1_i32_83 dim 1 : vector<64x256xf32>, i32 -> vector<64x256xf32>
    %153 = vector.extract_strided_slice %150 {offsets = [128, 0], sizes = [64, 256], strides = [1, 1]} : vector<192x256xf32> to vector<64x256xf32>
    %c255_i32_84 = arith.constant 255 : i32
    %154 = tpu.dynamic_rotate %153 by %c255_i32_84 dim 1 : vector<64x256xf32>, i32 -> vector<64x256xf32>
    %155 = vector.extract_strided_slice %152 {offsets = [0, 0], sizes = [32, 256], strides = [1, 1]} : vector<64x256xf32> to vector<32x256xf32>
    %156 = vector.extract_strided_slice %150 {offsets = [64, 0], sizes = [32, 256], strides = [1, 1]} : vector<192x256xf32> to vector<32x256xf32>
    %157 = arith.addf %155, %156 : vector<32x256xf32>
    %158 = vector.extract_strided_slice %154 {offsets = [0, 0], sizes = [32, 256], strides = [1, 1]} : vector<64x256xf32> to vector<32x256xf32>
    %159 = arith.addf %157, %158 : vector<32x256xf32>
    %160 = vector.extract_strided_slice %152 {offsets = [32, 0], sizes = [32, 256], strides = [1, 1]} : vector<64x256xf32> to vector<32x256xf32>
    %161 = vector.extract_strided_slice %150 {offsets = [96, 0], sizes = [32, 256], strides = [1, 1]} : vector<192x256xf32> to vector<32x256xf32>
    %162 = arith.addf %160, %161 : vector<32x256xf32>
    %163 = vector.extract_strided_slice %154 {offsets = [32, 0], sizes = [32, 256], strides = [1, 1]} : vector<64x256xf32> to vector<32x256xf32>
    %164 = arith.addf %162, %163 : vector<32x256xf32>
    %c16_i32_85 = arith.constant 16 : i32
    %165 = tpu.dynamic_rotate %159 by %c16_i32_85 dim 1 : vector<32x256xf32>, i32 -> vector<32x256xf32>
    %166 = arith.mulf %165, %45 : vector<32x256xf32>
    %167 = arith.addf %164, %166 : vector<32x256xf32>
    %168 = arith.addf %167, %137 : vector<32x256xf32>
    %169 = arith.mulf %168, %25 : vector<32x256xf32>
    %170 = arith.addf %169, %139 : vector<32x256xf32>
    %cst_86 = arith.constant 0.000000e+00 : f32
    %171 = vector.broadcast %cst_86 : f32 to vector<32x256xf32>
    %172 = arith.maximumf %170, %171 : vector<32x256xf32>
    %c2_87 = arith.constant 2 : index
    %c192_88 = arith.constant 192 : index
    %c0_89 = arith.constant 0 : index
    %173 = vector.load %arg3[%c2_87, %c192_88, %c0_89] : memref<5x200x32xf32, #tpu.memory_space<vmem>>, vector<1x8x32xf32>
    %174 = vector.shape_cast %173 : vector<1x8x32xf32> to vector<8x32xf32>
    %cst_90 = arith.constant dense<0.000000e+00> : vector<8x256xf32>
    %175 = tpu.matmul %174, %172, %cst_90 {dimension_numbers = #tpu.dot_dimension_numbers<[1], [0], [0], [1], [0, 0, 1, 1], [], []>} : vector<8x32xf32>, vector<32x256xf32>, vector<8x256xf32> -> vector<8x256xf32>
    %176 = arith.addf %133, %175 : vector<8x256xf32>
    %177 = arith.addf %176, %141 : vector<8x256xf32>
    %c3 = arith.constant 3 : index
    %c0_91 = arith.constant 0 : index
    %c0_92 = arith.constant 0 : index
    %178 = vector.load %arg4[%c3, %c0_91, %c0_92] : memref<5x104x256xf32, #tpu.memory_space<vmem>>, vector<1x32x256xf32>
    %179 = vector.shape_cast %178 : vector<1x32x256xf32> to vector<32x256xf32>
    %c3_93 = arith.constant 3 : index
    %c32_94 = arith.constant 32 : index
    %c0_95 = arith.constant 0 : index
    %180 = vector.load %arg4[%c3_93, %c32_94, %c0_95] : memref<5x104x256xf32, #tpu.memory_space<vmem>>, vector<1x32x256xf32>
    %181 = vector.shape_cast %180 : vector<1x32x256xf32> to vector<32x256xf32>
    %c3_96 = arith.constant 3 : index
    %c64_97 = arith.constant 64 : index
    %c0_98 = arith.constant 0 : index
    %182 = vector.load %arg4[%c3_96, %c64_97, %c0_98] : memref<5x104x256xf32, #tpu.memory_space<vmem>>, vector<1x32x256xf32>
    %183 = vector.shape_cast %182 : vector<1x32x256xf32> to vector<32x256xf32>
    %c3_99 = arith.constant 3 : index
    %c96_100 = arith.constant 96 : index
    %c0_101 = arith.constant 0 : index
    %184 = vector.load %arg4[%c3_99, %c96_100, %c0_101] : memref<5x104x256xf32, #tpu.memory_space<vmem>>, vector<1x8x256xf32>
    %185 = vector.shape_cast %184 : vector<1x8x256xf32> to vector<8x256xf32>
    %c3_102 = arith.constant 3 : index
    %c0_103 = arith.constant 0 : index
    %c0_104 = arith.constant 0 : index
    %186 = vector.load %arg2[%c3_102, %c0_103, %c0_104] : memref<5x32x8xf32, #tpu.memory_space<vmem>>, vector<1x32x8xf32>
    %187 = vector.shape_cast %186 : vector<1x32x8xf32> to vector<32x8xf32>
    %cst_105 = arith.constant dense<0.000000e+00> : vector<32x256xf32>
    %188 = tpu.matmul %187, %177, %cst_105 {dimension_numbers = #tpu.dot_dimension_numbers<[1], [0], [0], [1], [0, 0, 1, 1], [], []>} : vector<32x8xf32>, vector<8x256xf32>, vector<32x256xf32> -> vector<32x256xf32>
    %189 = arith.addf %188, %179 : vector<32x256xf32>
    %cst_106 = arith.constant 0.000000e+00 : f32
    %190 = vector.broadcast %cst_106 : f32 to vector<32x256xf32>
    %191 = arith.maximumf %189, %190 : vector<32x256xf32>
    %c3_107 = arith.constant 3 : index
    %c0_108 = arith.constant 0 : index
    %c0_109 = arith.constant 0 : index
    %192 = vector.load %arg3[%c3_107, %c0_108, %c0_109] : memref<5x200x32xf32, #tpu.memory_space<vmem>>, vector<1x192x32xf32>
    %193 = vector.shape_cast %192 : vector<1x192x32xf32> to vector<192x32xf32>
    %cst_110 = arith.constant dense<0.000000e+00> : vector<192x256xf32>
    %194 = tpu.matmul %193, %191, %cst_110 {dimension_numbers = #tpu.dot_dimension_numbers<[1], [0], [0], [1], [0, 0, 1, 1], [], []>} : vector<192x32xf32>, vector<32x256xf32>, vector<192x256xf32> -> vector<192x256xf32>
    %195 = vector.extract_strided_slice %194 {offsets = [0, 0], sizes = [64, 256], strides = [1, 1]} : vector<192x256xf32> to vector<64x256xf32>
    %c1_i32_111 = arith.constant 1 : i32
    %196 = tpu.dynamic_rotate %195 by %c1_i32_111 dim 1 : vector<64x256xf32>, i32 -> vector<64x256xf32>
    %197 = vector.extract_strided_slice %194 {offsets = [128, 0], sizes = [64, 256], strides = [1, 1]} : vector<192x256xf32> to vector<64x256xf32>
    %c255_i32_112 = arith.constant 255 : i32
    %198 = tpu.dynamic_rotate %197 by %c255_i32_112 dim 1 : vector<64x256xf32>, i32 -> vector<64x256xf32>
    %199 = vector.extract_strided_slice %196 {offsets = [0, 0], sizes = [32, 256], strides = [1, 1]} : vector<64x256xf32> to vector<32x256xf32>
    %200 = vector.extract_strided_slice %194 {offsets = [64, 0], sizes = [32, 256], strides = [1, 1]} : vector<192x256xf32> to vector<32x256xf32>
    %201 = arith.addf %199, %200 : vector<32x256xf32>
    %202 = vector.extract_strided_slice %198 {offsets = [0, 0], sizes = [32, 256], strides = [1, 1]} : vector<64x256xf32> to vector<32x256xf32>
    %203 = arith.addf %201, %202 : vector<32x256xf32>
    %204 = vector.extract_strided_slice %196 {offsets = [32, 0], sizes = [32, 256], strides = [1, 1]} : vector<64x256xf32> to vector<32x256xf32>
    %205 = vector.extract_strided_slice %194 {offsets = [96, 0], sizes = [32, 256], strides = [1, 1]} : vector<192x256xf32> to vector<32x256xf32>
    %206 = arith.addf %204, %205 : vector<32x256xf32>
    %207 = vector.extract_strided_slice %198 {offsets = [32, 0], sizes = [32, 256], strides = [1, 1]} : vector<64x256xf32> to vector<32x256xf32>
    %208 = arith.addf %206, %207 : vector<32x256xf32>
    %c16_i32_113 = arith.constant 16 : i32
    %209 = tpu.dynamic_rotate %203 by %c16_i32_113 dim 1 : vector<32x256xf32>, i32 -> vector<32x256xf32>
    %210 = arith.mulf %209, %45 : vector<32x256xf32>
    %211 = arith.addf %208, %210 : vector<32x256xf32>
    %212 = arith.addf %211, %181 : vector<32x256xf32>
    %213 = arith.mulf %212, %25 : vector<32x256xf32>
    %214 = arith.addf %213, %183 : vector<32x256xf32>
    %cst_114 = arith.constant 0.000000e+00 : f32
    %215 = vector.broadcast %cst_114 : f32 to vector<32x256xf32>
    %216 = arith.maximumf %214, %215 : vector<32x256xf32>
    %c3_115 = arith.constant 3 : index
    %c192_116 = arith.constant 192 : index
    %c0_117 = arith.constant 0 : index
    %217 = vector.load %arg3[%c3_115, %c192_116, %c0_117] : memref<5x200x32xf32, #tpu.memory_space<vmem>>, vector<1x8x32xf32>
    %218 = vector.shape_cast %217 : vector<1x8x32xf32> to vector<8x32xf32>
    %cst_118 = arith.constant dense<0.000000e+00> : vector<8x256xf32>
    %219 = tpu.matmul %218, %216, %cst_118 {dimension_numbers = #tpu.dot_dimension_numbers<[1], [0], [0], [1], [0, 0, 1, 1], [], []>} : vector<8x32xf32>, vector<32x256xf32>, vector<8x256xf32> -> vector<8x256xf32>
    %220 = arith.addf %177, %219 : vector<8x256xf32>
    %221 = arith.addf %220, %185 : vector<8x256xf32>
    %c4 = arith.constant 4 : index
    %c0_119 = arith.constant 0 : index
    %c0_120 = arith.constant 0 : index
    %222 = vector.load %arg4[%c4, %c0_119, %c0_120] : memref<5x104x256xf32, #tpu.memory_space<vmem>>, vector<1x32x256xf32>
    %223 = vector.shape_cast %222 : vector<1x32x256xf32> to vector<32x256xf32>
    %c4_121 = arith.constant 4 : index
    %c32_122 = arith.constant 32 : index
    %c0_123 = arith.constant 0 : index
    %224 = vector.load %arg4[%c4_121, %c32_122, %c0_123] : memref<5x104x256xf32, #tpu.memory_space<vmem>>, vector<1x32x256xf32>
    %225 = vector.shape_cast %224 : vector<1x32x256xf32> to vector<32x256xf32>
    %c4_124 = arith.constant 4 : index
    %c64_125 = arith.constant 64 : index
    %c0_126 = arith.constant 0 : index
    %226 = vector.load %arg4[%c4_124, %c64_125, %c0_126] : memref<5x104x256xf32, #tpu.memory_space<vmem>>, vector<1x32x256xf32>
    %227 = vector.shape_cast %226 : vector<1x32x256xf32> to vector<32x256xf32>
    %c4_127 = arith.constant 4 : index
    %c96_128 = arith.constant 96 : index
    %c0_129 = arith.constant 0 : index
    %228 = vector.load %arg4[%c4_127, %c96_128, %c0_129] : memref<5x104x256xf32, #tpu.memory_space<vmem>>, vector<1x8x256xf32>
    %229 = vector.shape_cast %228 : vector<1x8x256xf32> to vector<8x256xf32>
    %c4_130 = arith.constant 4 : index
    %c0_131 = arith.constant 0 : index
    %c0_132 = arith.constant 0 : index
    %230 = vector.load %arg2[%c4_130, %c0_131, %c0_132] : memref<5x32x8xf32, #tpu.memory_space<vmem>>, vector<1x32x8xf32>
    %231 = vector.shape_cast %230 : vector<1x32x8xf32> to vector<32x8xf32>
    %cst_133 = arith.constant dense<0.000000e+00> : vector<32x256xf32>
    %232 = tpu.matmul %231, %221, %cst_133 {dimension_numbers = #tpu.dot_dimension_numbers<[1], [0], [0], [1], [0, 0, 1, 1], [], []>} : vector<32x8xf32>, vector<8x256xf32>, vector<32x256xf32> -> vector<32x256xf32>
    %233 = arith.addf %232, %223 : vector<32x256xf32>
    %cst_134 = arith.constant 0.000000e+00 : f32
    %234 = vector.broadcast %cst_134 : f32 to vector<32x256xf32>
    %235 = arith.maximumf %233, %234 : vector<32x256xf32>
    %c4_135 = arith.constant 4 : index
    %c0_136 = arith.constant 0 : index
    %c0_137 = arith.constant 0 : index
    %236 = vector.load %arg3[%c4_135, %c0_136, %c0_137] : memref<5x200x32xf32, #tpu.memory_space<vmem>>, vector<1x192x32xf32>
    %237 = vector.shape_cast %236 : vector<1x192x32xf32> to vector<192x32xf32>
    %cst_138 = arith.constant dense<0.000000e+00> : vector<192x256xf32>
    %238 = tpu.matmul %237, %235, %cst_138 {dimension_numbers = #tpu.dot_dimension_numbers<[1], [0], [0], [1], [0, 0, 1, 1], [], []>} : vector<192x32xf32>, vector<32x256xf32>, vector<192x256xf32> -> vector<192x256xf32>
    %239 = vector.extract_strided_slice %238 {offsets = [0, 0], sizes = [64, 256], strides = [1, 1]} : vector<192x256xf32> to vector<64x256xf32>
    %c1_i32_139 = arith.constant 1 : i32
    %240 = tpu.dynamic_rotate %239 by %c1_i32_139 dim 1 : vector<64x256xf32>, i32 -> vector<64x256xf32>
    %241 = vector.extract_strided_slice %238 {offsets = [128, 0], sizes = [64, 256], strides = [1, 1]} : vector<192x256xf32> to vector<64x256xf32>
    %c255_i32_140 = arith.constant 255 : i32
    %242 = tpu.dynamic_rotate %241 by %c255_i32_140 dim 1 : vector<64x256xf32>, i32 -> vector<64x256xf32>
    %243 = vector.extract_strided_slice %240 {offsets = [0, 0], sizes = [32, 256], strides = [1, 1]} : vector<64x256xf32> to vector<32x256xf32>
    %244 = vector.extract_strided_slice %238 {offsets = [64, 0], sizes = [32, 256], strides = [1, 1]} : vector<192x256xf32> to vector<32x256xf32>
    %245 = arith.addf %243, %244 : vector<32x256xf32>
    %246 = vector.extract_strided_slice %242 {offsets = [0, 0], sizes = [32, 256], strides = [1, 1]} : vector<64x256xf32> to vector<32x256xf32>
    %247 = arith.addf %245, %246 : vector<32x256xf32>
    %248 = vector.extract_strided_slice %240 {offsets = [32, 0], sizes = [32, 256], strides = [1, 1]} : vector<64x256xf32> to vector<32x256xf32>
    %249 = vector.extract_strided_slice %238 {offsets = [96, 0], sizes = [32, 256], strides = [1, 1]} : vector<192x256xf32> to vector<32x256xf32>
    %250 = arith.addf %248, %249 : vector<32x256xf32>
    %251 = vector.extract_strided_slice %242 {offsets = [32, 0], sizes = [32, 256], strides = [1, 1]} : vector<64x256xf32> to vector<32x256xf32>
    %252 = arith.addf %250, %251 : vector<32x256xf32>
    %c16_i32_141 = arith.constant 16 : i32
    %253 = tpu.dynamic_rotate %247 by %c16_i32_141 dim 1 : vector<32x256xf32>, i32 -> vector<32x256xf32>
    %254 = arith.mulf %253, %45 : vector<32x256xf32>
    %255 = arith.addf %252, %254 : vector<32x256xf32>
    %256 = arith.addf %255, %225 : vector<32x256xf32>
    %257 = arith.mulf %256, %25 : vector<32x256xf32>
    %258 = arith.addf %257, %227 : vector<32x256xf32>
    %cst_142 = arith.constant 0.000000e+00 : f32
    %259 = vector.broadcast %cst_142 : f32 to vector<32x256xf32>
    %260 = arith.maximumf %258, %259 : vector<32x256xf32>
    %c4_143 = arith.constant 4 : index
    %c192_144 = arith.constant 192 : index
    %c0_145 = arith.constant 0 : index
    %261 = vector.load %arg3[%c4_143, %c192_144, %c0_145] : memref<5x200x32xf32, #tpu.memory_space<vmem>>, vector<1x8x32xf32>
    %262 = vector.shape_cast %261 : vector<1x8x32xf32> to vector<8x32xf32>
    %cst_146 = arith.constant dense<0.000000e+00> : vector<8x256xf32>
    %263 = tpu.matmul %262, %260, %cst_146 {dimension_numbers = #tpu.dot_dimension_numbers<[1], [0], [0], [1], [0, 0, 1, 1], [], []>} : vector<8x32xf32>, vector<32x256xf32>, vector<8x256xf32> -> vector<8x256xf32>
    %264 = arith.addf %221, %263 : vector<8x256xf32>
    %265 = arith.addf %264, %229 : vector<8x256xf32>
    %cst_147 = arith.constant 0.000000e+00 : f32
    %266 = vector.broadcast %cst_147 : f32 to vector<8x256xf32>
    %267 = arith.maximumf %265, %266 : vector<8x256xf32>
    %c0_148 = arith.constant 0 : index
    %c0_149 = arith.constant 0 : index
    %c0_150 = arith.constant 0 : index
    %268 = vector.load %arg5[%c0_148, %c0_149, %c0_150] : memref<1x8x256xf32, #tpu.memory_space<vmem>>, vector<1x8x256xf32>
    %269 = vector.shape_cast %268 : vector<1x8x256xf32> to vector<8x256xf32>
    %270 = vector.shape_cast %267 : vector<8x256xf32> to vector<1x8x256xf32>
    tpu.vector_store %arg5[%c0_148, %c0_149, %c0_150], %270 {strides = array<i32>} : memref<1x8x256xf32, #tpu.memory_space<vmem>>, vector<1x8x256xf32>,
    return
  }
  func.func @transform_0(%arg0: i32) -> (i32, i32, i32) {
    %c0_i32 = arith.constant 0 : i32
    %c0_i32_0 = arith.constant 0 : i32
    %c0_i32_1 = arith.constant 0 : i32
    return %arg0, %c0_i32, %c0_i32_0 : i32, i32, i32
  }
  func.func @transform_1(%arg0: i32) -> (i32, i32, i32) {
    %c0_i32 = arith.constant 0 : i32
    %c0_i32_0 = arith.constant 0 : i32
    %c0_i32_1 = arith.constant 0 : i32
    %c0_i32_2 = arith.constant 0 : i32
    return %c0_i32, %c0_i32_0, %c0_i32_1 : i32, i32, i32
  }
  func.func @transform_2(%arg0: i32) -> (i32, i32, i32) {
    %c0_i32 = arith.constant 0 : i32
    %c0_i32_0 = arith.constant 0 : i32
    %c0_i32_1 = arith.constant 0 : i32
    %c0_i32_2 = arith.constant 0 : i32
    return %c0_i32, %c0_i32_0, %c0_i32_1 : i32, i32, i32
  }
  func.func @transform_3(%arg0: i32) -> (i32, i32, i32) {
    %c0_i32 = arith.constant 0 : i32
    %c0_i32_0 = arith.constant 0 : i32
    %c0_i32_1 = arith.constant 0 : i32
    %c0_i32_2 = arith.constant 0 : i32
    return %c0_i32, %c0_i32_0, %c0_i32_1 : i32, i32, i32
  }
  func.func @transform_4(%arg0: i32) -> (i32, i32, i32) {
    %c0_i32 = arith.constant 0 : i32
    %c0_i32_0 = arith.constant 0 : i32
    %c0_i32_1 = arith.constant 0 : i32
    return %arg0, %c0_i32, %c0_i32_0 : i32, i32, i32
  }
}

</mosaic_0001>

<bundles_post_ra>
// kernel: tpu_custom_call.1
= control target key start
LH: loop header
LB: loop body
LE: loop exit
PB: predicated region body
PF: predicated region fallthrough
CT: control target
= control target key end

     0   :  { %9 = vsyncpa [#allocation3], 0  ;;  %s6537_s0 = inlined_call_operand.vmem [shape: f32[2,8,256], index: 0, kind: input, shape index: {}]   ;;  %s6538_s1 = inlined_call_operand.vmem [shape: f32[5,32,8], index: 1, kind: input, shape index: {}]   ;;  %s6539_s2 = inlined_call_operand.vmem [shape: f32[5,200,32], index: 2, kind: input, shape index: {}]   ;;  %s6540_s3 = inlined_call_operand.vmem [shape: f32[5,104,256], index: 3, kind: input, shape index: {}]   ;;  %s6541_s4 = inlined_call_operand.hbm [shape: f32[2,8,256], index: 4, kind: output, shape index: {}]  }
   0x1   :  { %11 = vsyncpa [#allocation3 + $0x1], 0  ;;  %s4183_s15 = smov 0   ;;  %s4185_s16 = smov 0  }
   0x2   :  { %s4187_s17 = smov 0   ;;  %s4189_s18 = smov 0  }
   0x3 LB: > { %s4204_s19 = sadd.s32 4294967295, %s4152_s18   ;;  %s3512_s20 = sadd.s32 4294967294, %s4152_s18   ;;  %s4152_s18 = sphi %s4189_s18, %s6555_s18   ;;  %s4148_s17 = sphi %s4187_s17, %s6554_s17   ;;  %s4144_s16 = sphi %s4185_s16, %s6553_s16   ;;  %s4140_s15 = sphi %s4183_s15, %s6552_s15  }
   0x4   : > { %s4208_s21 = sadd.s32 1, %s4152_s18   ;;  %s113_s22 = sadd.s32 1, %s4148_s17 }
   0x5   : > { %s110_s23 = ssub.s32 %s4152_s18, %s4208_s21  ;;  %p123_p0 = scmp.ne.s32.totalorder %s4148_s17, %s4144_s16 }
   0x6   : > { %p111_p1 = scmp.eq.s32.totalorder %s110_s23, 0  ;;  %p124_p2 = scmp.eq.s32.totalorder %s4204_s19, 1 }
   0x7   : > { %p129_p3 = scmp.ne.s32.totalorder %s4144_s16, %s4140_s15  ;;  %p130_p4 = scmp.eq.s32.totalorder %s3512_s20, 1 }
   0x8   : > { %s4219_s24 = scalar_select %p111_p1, %s4148_s17, %s113_s22  }
   0x9   : > { %p4221_p5 = por %p124_p2, %p123_p0  ;;  %p4225_p6 = por %p130_p4, %p129_p3 }
   0xa   : > { %p3515_p7 = scmp.ge.s32.totalorder %s4152_s18, 1  ;;  %p165_p8 = scmp.lt.s32.totalorder %s4152_s18, 3 }
   0xc   : > { %p166_p9 = pnand %p3515_p7, %p165_p8 }
   0xd   : > { %p191_p10 = scmp.lt.s32.totalorder (!%p166_p9), %s4204_s19, 1  ;;  %s4154_s10 = smov (!%p166_p9), 1  }
   0xe   : > { %169 = sbr.rel (%p166_p9) target bundleno = 4123 (0x101b), region = 36  ;;  %s4155_s11 = smov (!%p166_p9), 127  }
   0xf   : > { %s4156_s12 = smov (!%p166_p9), 16  }
  0x13   : > { %s192_s27 = scalar_select %p191_p10, %s4204_s19, 1  ;;  %v291_v0 = vld [vmem:[%s6538_s1] sm:$0xff]  ;;  %vm295_vm0 = vcmask 64512   ;;  %v292_v3 = vld [vmem:[%s6538_s1 + $0x8] sm:$0xff]  ;;  %v293_v4 = vld [vmem:[%s6538_s1 + $0x10] sm:$0xff]  ;;  %vm398_vm1 = vcmask 261120  }
  0x14   : > { %v294_v5 = vld [vmem:[%s6538_s1 + $0x18] sm:$0xff]  ;;  %v269_v12 = vld [vmem:[%s6540_s3 + $0x20] sm:$0xff]  ;;  %v271_v13 = vld [vmem:[%s6540_s3 + $0x30] sm:$0xff] }
  0x15   : > { %s4037_s28 = sshll.u32 %s192_s27, 4  ;;  %v272_v14 = vld [vmem:[%s6540_s3 + $0x38] sm:$0xff]  ;;  %v270_v15 = vld [vmem:[%s6540_s3 + $0x28] sm:$0xff]  ;;  %v267_v16 = vld [vmem:[%s6540_s3 + $0x10] sm:$0xff] }
  0x16   : > { %s195_s5 = scalar_lea.vmem %s6537_s0, %s4037_s28  ;;  %v268_v19 = vld [vmem:[%s6540_s3 + $0x18] sm:$0xff]  ;;  %v265_v23 = vld [vmem:[%s6540_s3] sm:$0xff]  ;;  %v266_v25 = vld [vmem:[%s6540_s3 + $0x8] sm:$0xff] }
  0x17   : > { %v4239_v1 = vld [vmem:[%s195_s5] sm:$0xff]  ;;  %v4241_v2 = vld [vmem:[%s195_s5 + $0x8] sm:$0xff]  ;;  %v384_v41 = vld [vmem:[%s6539_s2 + $0x50] sm:$0xff] }
  0x18   : > { %323 = vmatpush.msra.mxu0 %v4239_v1  ;;  %352 = vmatpush.msra.mxu1 %v4241_v2  ;;  %v374_v38 = vld [vmem:[%s6539_s2] sm:$0xff]  ;;  %v383_v39 = vld [vmem:[%s6539_s2 + $0x48] sm:$0xff]  ;;  %v376_v42 = vld [vmem:[%s6539_s2 + $0x10] sm:$0xff] }
  0x19   : > { %3522 = vmatmul.msk.f32.vlgmr.msra.gmra.mxu0 %vm295_vm0, %v291_v0  ;;  %3526 = vmatmul.msk.f32.vlgmr.msra.gmra.mxu1 %vm295_vm0, %v291_v0  ;;  %v375_v40 = vld [vmem:[%s6539_s2 + $0x8] sm:$0xff]  ;;  %v385_v43 = vld [vmem:[%s6539_s2 + $0x58] sm:$0xff]  ;;  %v386_v45 = vld [vmem:[%s6539_s2 + $0x60] sm:$0xff] }
  0x1a   : > { %v377_v44 = vld [vmem:[%s6539_s2 + $0x18] sm:$0xff]  ;;  %v378_v46 = vld [vmem:[%s6539_s2 + $0x20] sm:$0xff]  ;;  %v387_v47 = vld [vmem:[%s6539_s2 + $0x68] sm:$0xff] }
  0x1b   : > { %v379_v48 = vld [vmem:[%s6539_s2 + $0x28] sm:$0xff]  ;;  %v388_v49 = vld [vmem:[%s6539_s2 + $0x70] sm:$0xff]  ;;  %v389_v51 = vld [vmem:[%s6539_s2 + $0x78] sm:$0xff] }
  0x1c   : > { %v380_v50 = vld [vmem:[%s6539_s2 + $0x30] sm:$0xff]  ;;  %v381_v52 = vld [vmem:[%s6539_s2 + $0x38] sm:$0xff]  ;;  %v390_v53 = vld [vmem:[%s6539_s2 + $0x80] sm:$0xff] }
  0x1d   : > { %v391_v54 = vld [vmem:[%s6539_s2 + $0x88] sm:$0xff]  ;;  %v392_v55 = vld [vmem:[%s6539_s2 + $0x90] sm:$0xff]  ;;  %v393_v56 = vld [vmem:[%s6539_s2 + $0x98] sm:$0xff] }
  0x1e   : > { %v382_v57 = vld [vmem:[%s6539_s2 + $0x40] sm:$0xff]  ;;  %v395_v59 = vld [vmem:[%s6539_s2 + $0xa8] sm:$0xff]  ;;  %v396_v60 = vld [vmem:[%s6539_s2 + $0xb0] sm:$0xff] }
  0x1f   : > { %v394_v58 = vld [vmem:[%s6539_s2 + $0xa0] sm:$0xff]  ;;  %v397_v61 = vld [vmem:[%s6539_s2 + $0xb8] sm:$0xff] }
  0x21   : > { %3523 = vmatmul.msk.f32.gmra.mxu0 %vm295_vm0, %v292_v3  ;;  %3527 = vmatmul.msk.f32.gmra.mxu1 %vm295_vm0, %v292_v3 }
  0x29   : > { %3524 = vmatmul.msk.f32.gmra.mxu0 %vm295_vm0, %v293_v4  ;;  %3528 = vmatmul.msk.f32.gmra.mxu1 %vm295_vm0, %v293_v4 }
  0x31   : > { %3525 = vmatmul.msk.f32.gmra.mxu0 %vm295_vm0, %v294_v5  ;;  %3529 = vmatmul.msk.f32.gmra.mxu1 %vm295_vm0, %v294_v5 }
  0x96   : > { %v325_v6 = vpop.f32.mrf.mxu0  ;;  %v354_v7 = vpop.f32.mrf.mxu1 }
  0x97   : > { %v326_v30 = vadd.f32 %v325_v6, %v265_v23  ;;  %v355_v32 = vadd.f32 %v354_v7, %v266_v25 }
  0x99   : > { %v366_v36 = vmax.f32 %v326_v30, 0.0  ;;  %v367_v37 = vmax.f32 %v355_v32, 0.0 }
  0x9e   : > { %v328_v8 = vpop.f32.mrf.mxu0  ;;  %v357_v9 = vpop.f32.mrf.mxu1 }
  0x9f   : > { %v329_v26 = vadd.f32 %v328_v8, %v267_v16  ;;  %v358_v29 = vadd.f32 %v357_v9, %v268_v19 }
  0xa1   : > { %v368_v34 = vmax.f32 %v329_v26, 0.0  ;;  %v369_v35 = vmax.f32 %v358_v29, 0.0 }
  0xa6   : > { %v331_v10 = vpop.f32.mrf.mxu0  ;;  %v360_v11 = vpop.f32.mrf.mxu1 }
  0xa7   : > { %v332_v20 = vadd.f32 %v331_v10, %v269_v12  ;;  %v361_v24 = vadd.f32 %v360_v11, %v270_v15 }
  0xa9   : > { %v370_v31 = vmax.f32 %v332_v20, 0.0  ;;  %v371_v33 = vmax.f32 %v361_v24, 0.0 }
  0xae   : > { %v334_v17 = vpop.f32.mrf.mxu0  ;;  %v363_v18 = vpop.f32.mrf.mxu1 }
  0xaf   : > { %v335_v21 = vadd.f32 %v334_v17, %v271_v13  ;;  %v364_v22 = vadd.f32 %v363_v18, %v272_v14 }
  0xb1   : > { %v372_v27 = vmax.f32 %v335_v21, 0.0  ;;  %v373_v28 = vmax.f32 %v364_v22, 0.0 }
  0xb3   : > { %483 = vmatpush.msrb.mxu0 %v372_v27  ;;  %4039 = vmatpush.msra.mxu2 %v372_v27 }
  0xb4   : > { %572 = vmatpush.msrb.mxu1 %v373_v28  ;;  %4043 = vmatpush.msra.mxu3 %v373_v28 }
  0xb5   : > { %484 = vmatpush.msrb.mxu0 %v370_v31  ;;  %4040 = vmatpush.msra.mxu2 %v370_v31 }
  0xb6   : > { %573 = vmatpush.msrb.mxu1 %v371_v33  ;;  %4044 = vmatpush.msra.mxu3 %v371_v33 }
  0xb7   : > { %485 = vmatpush.msrb.mxu0 %v368_v34  ;;  %4041 = vmatpush.msra.mxu2 %v368_v34 }
  0xb8   : > { %574 = vmatpush.msrb.mxu1 %v369_v35  ;;  %4045 = vmatpush.msra.mxu3 %v369_v35 }
  0xb9   : > { %486 = vmatpush.msrb.mxu0 %v366_v36  ;;  %4042 = vmatpush.msra.mxu2 %v366_v36 }
  0xba   : > { %575 = vmatpush.msrb.mxu1 %v367_v37  ;;  %4046 = vmatpush.msra.mxu3 %v367_v37 }
  0xbb   : > { %3530 = vmatmul.msk.f32.vlgmr.msrb.gmra.mxu0 %vm398_vm1, %v374_v38  ;;  %3539 = vmatmul.msk.f32.vlgmr.msra.gmra.mxu2 %vm398_vm1, %v383_v39 }
  0xbc   : > { %3554 = vmatmul.msk.f32.vlgmr.msrb.gmra.mxu1 %vm398_vm1, %v374_v38  ;;  %3563 = vmatmul.msk.f32.vlgmr.msra.gmra.mxu3 %vm398_vm1, %v383_v39 }
  0xc3   : > { %3531 = vmatmul.msk.f32.gmra.mxu0 %vm398_vm1, %v375_v40  ;;  %3540 = vmatmul.msk.f32.gmra.mxu2 %vm398_vm1, %v384_v41 }
  0xc4   : > { %3555 = vmatmul.msk.f32.gmra.mxu1 %vm398_vm1, %v375_v40  ;;  %3564 = vmatmul.msk.f32.gmra.mxu3 %vm398_vm1, %v384_v41 }
  0xcb   : > { %3532 = vmatmul.msk.f32.gmra.mxu0 %vm398_vm1, %v376_v42  ;;  %3541 = vmatmul.msk.f32.gmra.mxu2 %vm398_vm1, %v385_v43 }
  0xcc   : > { %3556 = vmatmul.msk.f32.gmra.mxu1 %vm398_vm1, %v376_v42  ;;  %3565 = vmatmul.msk.f32.gmra.mxu3 %vm398_vm1, %v385_v43 }
  0xd3   : > { %3533 = vmatmul.msk.f32.gmra.mxu0 %vm398_vm1, %v377_v44  ;;  %3542 = vmatmul.msk.f32.gmra.mxu2 %vm398_vm1, %v386_v45 }
  0xd4   : > { %3557 = vmatmul.msk.f32.gmra.mxu1 %vm398_vm1, %v377_v44  ;;  %3566 = vmatmul.msk.f32.gmra.mxu3 %vm398_vm1, %v386_v45 }
  0xdb   : > { %3534 = vmatmul.msk.f32.gmra.mxu0 %vm398_vm1, %v378_v46  ;;  %3543 = vmatmul.msk.f32.gmra.mxu2 %vm398_vm1, %v387_v47 }
  0xdc   : > { %3558 = vmatmul.msk.f32.gmra.mxu1 %vm398_vm1, %v378_v46  ;;  %3567 = vmatmul.msk.f32.gmra.mxu3 %vm398_vm1, %v387_v47 }
  0xe3   : > { %3535 = vmatmul.msk.f32.gmra.mxu0 %vm398_vm1, %v379_v48  ;;  %3544 = vmatmul.msk.f32.gmra.mxu2 %vm398_vm1, %v388_v49 }
  0xe4   : > { %3559 = vmatmul.msk.f32.gmra.mxu1 %vm398_vm1, %v379_v48  ;;  %3568 = vmatmul.msk.f32.gmra.mxu3 %vm398_vm1, %v388_v49 }
  0xeb   : > { %3536 = vmatmul.msk.f32.gmra.mxu0 %vm398_vm1, %v380_v50  ;;  %3545 = vmatmul.msk.f32.gmra.mxu2 %vm398_vm1, %v389_v51 }
  0xec   : > { %3560 = vmatmul.msk.f32.gmra.mxu1 %vm398_vm1, %v380_v50  ;;  %3569 = vmatmul.msk.f32.gmra.mxu3 %vm398_vm1, %v389_v51 }
  0xf3   : > { %3537 = vmatmul.msk.f32.gmra.mxu0 %vm398_vm1, %v381_v52  ;;  %3546 = vmatmul.msk.f32.gmra.mxu2 %vm398_vm1, %v390_v53 }
  0xf4   : > { %3561 = vmatmul.msk.f32.gmra.mxu1 %vm398_vm1, %v381_v52  ;;  %3570 = vmatmul.msk.f32.gmra.mxu3 %vm398_vm1, %v390_v53 }
  0xfb   : > { %3547 = vmatmul.msk.f32.gmra.mxu2 %vm398_vm1, %v391_v54  ;;  %3538 = vmatmul.msk.f32.gmra.mxu0 %vm398_vm1, %v382_v57 }
  0xfc   : > { %3571 = vmatmul.msk.f32.gmra.mxu3 %vm398_vm1, %v391_v54  ;;  %3562 = vmatmul.msk.f32.gmra.mxu1 %vm398_vm1, %v382_v57 }
 0x103   : > { %3548 = vmatmul.msk.f32.gmra.mxu2 %vm398_vm1, %v392_v55 }
 0x104   : > { %3572 = vmatmul.msk.f32.gmra.mxu3 %vm398_vm1, %v392_v55 }
 0x10b   : > { %3549 = vmatmul.msk.f32.gmra.mxu2 %vm398_vm1, %v393_v56 }
 0x10c   : > { %3573 = vmatmul.msk.f32.gmra.mxu3 %vm398_vm1, %v393_v56  ;;  %v198_v56 = vlaneseq }
 0x10e   : > { %v4473_v57 = vand.u32 127, %v198_v56 }
 0x110   : > { %vm681_vm2 = vcmp.lt.s32.totalorder %v4473_v57, 1  ;;  %vm730_vm3 = vcmp.lt.s32.totalorder %v4473_v57, 127  ;;  %vm795_vm5 = vcmp.lt.s32.totalorder %v4473_v57, 16 }
 0x113   : > { %3550 = vmatmul.msk.f32.gmra.mxu2 %vm398_vm1, %v394_v58 }
 0x114   : > { %3574 = vmatmul.msk.f32.gmra.mxu3 %vm398_vm1, %v394_v58 }
 0x11b   : > { %3551 = vmatmul.msk.f32.gmra.mxu2 %vm398_vm1, %v395_v59 }
 0x11c   : > { %3575 = vmatmul.msk.f32.gmra.mxu3 %vm398_vm1, %v395_v59 }
 0x123   : > { %3552 = vmatmul.msk.f32.gmra.mxu2 %vm398_vm1, %v396_v60 }
 0x124   : > { %3576 = vmatmul.msk.f32.gmra.mxu3 %vm398_vm1, %v396_v60 }
 0x12b   : > { %3553 = vmatmul.msk.f32.gmra.mxu2 %vm398_vm1, %v397_v61 }
 0x12c   : > { %3577 = vmatmul.msk.f32.gmra.mxu3 %vm398_vm1, %v397_v61 }
 0x138   : > { %v488_v62 = vpop.f32.mrf.mxu0 }
 0x139   : > { %v577_v63 = vpop.f32.mrf.mxu1  ;;  %649 = vrot.lane.b32.xlu1 %v488_v62, %s4154_s10 }
 0x13a   : > { %665 = vrot.lane.b32.xlu2 %v577_v63, %s4154_s10 }
 0x13e   : > { %v4408_v0 = vpop.f32.mrf.mxu2 }
 0x13f   : > { %v4410_v3 = vpop.f32.mrf.mxu3 }
 0x140   : > { %v491_v4 = vpop.f32.mrf.mxu0 }
 0x141   : > { %v580_v5 = vpop.f32.mrf.mxu1  ;;  %651 = vrot.lane.b32.xlu0 %v491_v4, %s4154_s10 }
 0x142   : > { %667 = vrot.lane.b32.xlu1 %v580_v5, %s4154_s10 }
 0x146   : > { %v4414_v6 = vpop.f32.mrf.mxu2 }
 0x147   : > { %v4416_v7 = vpop.f32.mrf.mxu3 }
 0x148   : > { %v494_v8 = vpop.f32.mrf.mxu0 }
 0x149   : > { %v583_v9 = vpop.f32.mrf.mxu1 }
 0x14a   : > { %653 = vrot.lane.b32.xlu1 %v494_v8, %s4154_s10 }
 0x14e   : > { %v4419_v10 = vpop.f32.mrf.mxu2 }
 0x14f   : > { %v4421_v11 = vpop.f32.mrf.mxu3 }
 0x150   : > { %v497_v12 = vpop.f32.mrf.mxu0 }
 0x151   : > { %v586_v13 = vpop.f32.mrf.mxu1  ;;  %655 = vrot.lane.b32.xlu0 %v497_v12, %s4154_s10 }
 0x152   : > { %669 = vrot.lane.b32.xlu1 %v583_v9, %s4154_s10 }
 0x156   : > { %v4425_v14 = vpop.f32.mrf.mxu2 }
 0x157   : > { %v4427_v15 = vpop.f32.mrf.mxu3 }
 0x158   : > { %v500_v16 = vpop.f32.mrf.mxu0 }
 0x159   : > { %v589_v17 = vpop.f32.mrf.mxu1  ;;  %671 = vrot.lane.b32.xlu0 %v586_v13, %s4154_s10 }
 0x15e   : > { %v4430_v18 = vpop.f32.mrf.mxu2 }
 0x15f   : > { %v4432_v19 = vpop.f32.mrf.mxu3 }
 0x160   : > { %v503_v20 = vpop.f32.mrf.mxu0 }
 0x161   : > { %v592_v21 = vpop.f32.mrf.mxu1  ;;  %659 = vrot.lane.b32.xlu0 %v503_v20, %s4154_s10 }
 0x166   : > { %v4435_v22 = vpop.f32.mrf.mxu2 }
 0x167   : > { %v4437_v23 = vpop.f32.mrf.mxu3 }
 0x168   : > { %v506_v24 = vpop.f32.mrf.mxu0 }
 0x169   : > { %v595_v25 = vpop.f32.mrf.mxu1  ;;  %661 = vrot.lane.b32.xlu0 %v506_v24, %s4154_s10 }
 0x16a   : > { %677 = vrot.lane.b32.xlu1 %v595_v25, %s4154_s10 }
 0x16e   : > { %v4441_v26 = vpop.f32.mrf.mxu2 }
 0x16f   : > { %v4443_v27 = vpop.f32.mrf.mxu3 }
 0x170   : > { %v509_v28 = vpop.f32.mrf.mxu0 }
 0x171   : > { %v598_v29 = vpop.f32.mrf.mxu1 }
 0x172   : > { %679 = vrot.lane.b32.xlu2 %v598_v29, %s4154_s10  ;;  %663 = vrot.lane.b32.xlu1 %v509_v28, %s4154_s10 }
 0x176   : > { %v536_v30 = vpop.f32.mrf.mxu2 }
 0x177   : > { %v625_v31 = vpop.f32.mrf.mxu3 }
 0x178   : > { %714 = vrot.lane.b32.xlu0 %v625_v31, %s4155_s11 }
 0x179   : > { %v601_v61 = vpop.f32.mrf.mxu1 }
 0x17a   : > { %698 = vrot.lane.b32.xlu2 %v536_v30, %s4155_s11 }
 0x17e   : > { %v539_v32 = vpop.f32.mrf.mxu2 }
 0x17f   : > { %v628_v33 = vpop.f32.mrf.mxu3 }
 0x180   : > { %700 = vrot.lane.b32.xlu0 %v539_v32, %s4155_s11  ;;  %716 = vrot.lane.b32.xlu1 %v628_v33, %s4155_s11 }
 0x186   : > { %v542_v34 = vpop.f32.mrf.mxu2 }
 0x187   : > { %v631_v35 = vpop.f32.mrf.mxu3  ;;  %702 = vrot.lane.b32.xlu2 %v542_v34, %s4155_s11 }
 0x188   : > { %718 = vrot.lane.b32.xlu0 %v631_v35, %s4155_s11  ;;  %675 = vrot.lane.b32.xlu1 %v592_v21, %s4154_s10 }
 0x18e   : > { %v545_v36 = vpop.f32.mrf.mxu2 }
 0x18f   : > { %v634_v37 = vpop.f32.mrf.mxu3  ;;  %704 = vrot.lane.b32.xlu2 %v545_v36, %s4155_s11 }
 0x190   : > { %657 = vrot.lane.b32.xlu0 %v500_v16, %s4154_s10  ;;  %673 = vrot.lane.b32.xlu1 %v589_v17, %s4154_s10 }
 0x194   : > { %v666_v52 = vpop.permute.xlu2 %665 }
 0x196   : > { %v548_v38 = vpop.f32.mrf.mxu2 }
 0x197   : > { %v4457_v39 = vpop.f32.mrf.mxu3  ;;  %720 = vrot.lane.b32.xlu2 %v634_v37, %s4155_s11 }
 0x198   : > { %706 = vrot.lane.b32.xlu0 %v548_v38, %s4155_s11 }
 0x19e   : > { %v551_v40 = vpop.f32.mrf.mxu2 }
 0x19f   : > { %v640_v41 = vpop.f32.mrf.mxu3  ;;  %708 = vrot.lane.b32.xlu2 %v551_v40, %s4155_s11 }
 0x1a0   : > { %724 = vrot.lane.b32.xlu0 %v640_v41, %s4155_s11 }
 0x1a6   : > { %v554_v42 = vpop.f32.mrf.mxu2 }
 0x1a7   : > { %v643_v43 = vpop.f32.mrf.mxu3  ;;  %710 = vrot.lane.b32.xlu2 %v554_v42, %s4155_s11 }
 0x1a8   : > { %726 = vrot.lane.b32.xlu0 %v643_v43, %s4155_s11 }
 0x1ab   : > { %v4467_v46 = vpop.permute.xlu1 %649 }
 0x1ac   : > { %v682_v62 = vsel %vm681_vm2, %v4467_v46, %v666_v52 }
 0x1ad   : > { %v748_v4 = vadd.f32 %v682_v62, %v601_v61 }
 0x1ae   : > { %v557_v44 = vpop.f32.mrf.mxu2 }
 0x1af   : > { %v646_v45 = vpop.f32.mrf.mxu3  ;;  %712 = vrot.lane.b32.xlu2 %v557_v44, %s4155_s11 }
 0x1b0   : > { %728 = vrot.lane.b32.xlu0 %v646_v45, %s4155_s11 }
 0x1b3   : > { %v652_v47 = vpop.permute.xlu0 %651 }
 0x1b4   : > { %v668_v48 = vpop.permute.xlu1 %667 }
 0x1b5   : > { %v683_v13 = vsel %vm681_vm2, %v652_v47, %v668_v48  ;;  %v691_v16 = vsel %vm681_vm2, %v668_v48, %v652_v47  ;;  %v512_v48 = vpop.f32.mrf.mxu0 }
 0x1b6   : > { %v749_v17 = vadd.f32 %v691_v16, %v4408_v0  ;;  %v750_v20 = vadd.f32 %v683_v13, %v4410_v3  ;;  %v200_v16 = vadd.s32 128, %v4473_v57 }
 0x1bc   : > { %v654_v50 = vpop.permute.xlu1 %653 }
 0x1c3   : > { %v656_v49 = vpop.permute.xlu0 %655 }
 0x1c4   : > { %v670_v54 = vpop.permute.xlu1 %669 }
 0x1c5   : > { %v684_v0 = vsel %vm681_vm2, %v654_v50, %v670_v54  ;;  %v692_v3 = vsel %vm681_vm2, %v670_v54, %v654_v50 }
 0x1c6   : > { %v751_v32 = vadd.f32 %v692_v3, %v4414_v6  ;;  %v752_v33 = vadd.f32 %v684_v0, %v4416_v7  ;;  %v212_v0 = vand.u32 15, %v200_v16 }
 0x1c8   : > { %vm4589_vm6 = vcmp.ne.s32.totalorder %v212_v0, 0  ;;  %vm4593_vm7 = vcmp.ne.s32.totalorder %v212_v0, 15 }
 0x1c9   : > { %vm230_vm10 = vmand %vm4589_vm6, %vm4593_vm7 }
 0x1cb   : > { %v672_v51 = vpop.permute.xlu0 %671 }
 0x1cc   : > { %v4469_v53 = vpop.permute.xlu2 %679  ;;  %v685_v41 = vsel %vm681_vm2, %v656_v49, %v672_v51  ;;  %v693_v6 = vsel %vm681_vm2, %v672_v51, %v656_v49  ;;  %v690_v49 = vsel %vm681_vm2, %v666_v52, %v4467_v46 }
 0x1cd   : > { %v753_v43 = vadd.f32 %v693_v6, %v4419_v10  ;;  %v754_v44 = vadd.f32 %v685_v41, %v4421_v11  ;;  %v747_v51 = vadd.f32 %v690_v49, %v512_v48  ;;  %v278_v48 = vld [vmem:[%s6540_s3 + $0x68] sm:$0xff] }
 0x1d3   : > { %v4471_v55 = vpop.permute.xlu0 %659 }
 0x1d4   : > { %v699_v59 = vpop.permute.xlu2 %698 }
 0x1db   : > { %v4477_v60 = vpop.permute.xlu0 %661 }
 0x1dc   : > { %v4475_v58 = vpop.permute.xlu1 %677 }
 0x1dd   : > { %v696_v13 = vsel %vm681_vm2, %v4475_v58, %v4477_v60 }
 0x1e1   : > { %v703_v63 = vpop.permute.xlu2 %702 }
 0x1e4   : > { %v4484_v5 = vpop.permute.xlu1 %663 }
 0x1e9   : > { %v705_v29 = vpop.permute.xlu2 %704 }
 0x1ea   : > { %v715_v8 = vpop.permute.xlu0 %714 }
 0x1eb   : > { %v739_v9 = vsel %vm730_vm3, %v715_v8, %v699_v59  ;;  %v731_v50 = vsel %vm730_vm3, %v699_v59, %v715_v8 }
 0x1ec   : > { %v756_v12 = vadd.f32 %v748_v4, %v739_v9  ;;  %v755_v54 = vadd.f32 %v747_v51, %v731_v50  ;;  %v274_v50 = vld [vmem:[%s6540_s3 + $0x48] sm:$0xff] }
 0x1ee   : > { %787 = vrot.lane.b32.xlu0 %v756_v12, %s4156_s12  ;;  %v239_v12 = vand.u32 255, %v4473_v57 }
 0x1f0   : > { %vm259_vm4 = vcmp.ge.s32.totalorder %v239_v12, 16 }
 0x1f1   : > { %v721_v40 = vpop.permute.xlu2 %720 }
 0x1f2   : > { %v701_v21 = vpop.permute.xlu0 %700  ;;  %v717_v24 = vpop.permute.xlu1 %716  ;;  %v734_v7 = vsel %vm730_vm3, %v705_v29, %v721_v40  ;;  %v742_v42 = vsel %vm730_vm3, %v721_v40, %v705_v29 }
 0x1f3   : > { %v732_v25 = vsel %vm730_vm3, %v701_v21, %v717_v24  ;;  %v740_v28 = vsel %vm730_vm3, %v717_v24, %v701_v21  ;;  %v762_v45 = vadd.f32 %v754_v44, %v742_v42  ;;  %v761_v47 = vadd.f32 %v753_v43, %v734_v7 }
 0x1f4   : > { %v758_v30 = vadd.f32 %v750_v20, %v740_v28  ;;  %v757_v31 = vadd.f32 %v749_v17, %v732_v25  ;;  %v767_v17 = vadd.f32 %v696_v13, %v4435_v22  ;;  %v689_v24 = vsel %vm681_vm2, %v4484_v5, %v4469_v53 }
 0x1f5   : > { %v4157_v28 = vmov 0.0   ;;  %v697_v7 = vsel %vm681_vm2, %v4469_v53, %v4484_v5  ;;  %v770_v53 = vadd.f32 %v689_v24, %v4443_v27  ;;  %v276_v5 = vld [vmem:[%s6540_s3 + $0x58] sm:$0xff] }
 0x1f6   : > { %789 = vrot.lane.b32.xlu2 %v758_v30, %s4156_s12  ;;  %781 = vrot.lane.b32.xlu1 %v757_v31, %s4156_s12  ;;  %v4568_v29 = vsel %vm259_vm4, 1.0, %v4157_v28  ;;  %v4638_v16 = vsel %vm230_vm10, 1.0, %v4157_v28 }
 0x1f9   : > { %v709_v10 = vpop.permute.xlu2 %708 }
 0x1fa   : > { %v719_v34 = vpop.permute.xlu0 %718 }
 0x1fb   : > { %v733_v35 = vsel %vm730_vm3, %v703_v63, %v719_v34  ;;  %v741_v36 = vsel %vm730_vm3, %v719_v34, %v703_v63  ;;  %v676_v63 = vpop.permute.xlu1 %675 }
 0x1fc   : > { %v760_v37 = vadd.f32 %v752_v33, %v741_v36  ;;  %v759_v38 = vadd.f32 %v751_v32, %v733_v35  ;;  %v687_v21 = vsel %vm681_vm2, %v4471_v55, %v676_v63 }
 0x1fe   : > { %791 = vrot.lane.b32.xlu2 %v760_v37, %s4156_s12  ;;  %783 = vrot.lane.b32.xlu1 %v759_v38, %s4156_s12  ;;  %v205_v38 = vand.u32 15, %v4473_v57  ;;  %v3936_v57 = vld [vmem:[%s6540_s3 + $0x3c8] sm:$0xff] }
 0x200   : > { %vm4606_vm8 = vcmp.ne.s32.totalorder %v205_v38, 0  ;;  %vm4610_vm9 = vcmp.ne.s32.totalorder %v205_v38, 15 }
 0x201   : > { %v711_v56 = vpop.permute.xlu2 %710  ;;  %vm229_vm11 = vmand %vm4606_vm8, %vm4610_vm9 }
 0x202   : > { %v4533_v11 = vpop.permute.xlu0 %657 }
 0x203   : > { %v4537_v52 = vpop.permute.xlu1 %673 }
 0x204   : > { %v694_v24 = vsel %vm681_vm2, %v4537_v52, %v4533_v11 }
 0x206   : > { %793 = vrot.lane.b32.xlu2 %v762_v45, %s4156_s12  ;;  %785 = vrot.lane.b32.xlu1 %v761_v47, %s4156_s12 }
 0x209   : > { %v713_v62 = vpop.permute.xlu2 %712 }
 0x20a   : > { %v4535_v61 = vpop.permute.xlu0 %706 }
 0x20e   : > { %722 = vrot.lane.b32.xlu1 %v4457_v39, %s4155_s11  ;;  %779 = vrot.lane.b32.xlu2 %v755_v54, %s4156_s12  ;;  %v688_v39 = vsel %vm681_vm2, %v4477_v60, %v4475_v58  ;;  %v695_v58 = vsel %vm681_vm2, %v676_v63, %v4471_v55  ;;  %v766_v55 = vadd.f32 %v687_v21, %v4432_v19  ;;  %v277_v54 = vld [vmem:[%s6540_s3 + $0x60] sm:$0xff] }
 0x20f   : > { %v768_v20 = vadd.f32 %v688_v39, %v4437_v23  ;;  %v765_v19 = vadd.f32 %v695_v58, %v4430_v18  ;;  %v686_v21 = vsel %vm681_vm2, %v4533_v11, %v4537_v52  ;;  %v279_v58 = vld [vmem:[%s6540_s3 + $0x70] sm:$0xff]  ;;  %v286_v11 = vld [vmem:[%s6540_s3 + $0xa8] sm:$0xff] }
 0x212   : > { %v725_v46 = vpop.permute.xlu0 %724 }
 0x213   : > { %v744_v60 = vsel %vm730_vm3, %v725_v46, %v709_v10  ;;  %v736_v3 = vsel %vm730_vm3, %v709_v10, %v725_v46 }
 0x214   : > { %v774_v40 = vadd.f32 %v766_v55, %v744_v60  ;;  %v773_v45 = vadd.f32 %v765_v19, %v736_v3  ;;  %v288_v55 = vld [vmem:[%s6540_s3 + $0xb8] sm:$0xff] }
 0x21a   : > { %v727_v8 = vpop.permute.xlu0 %726 }
 0x21b   : > { %v745_v22 = vsel %vm730_vm3, %v727_v8, %v711_v56  ;;  %v737_v23 = vsel %vm730_vm3, %v711_v56, %v727_v8  ;;  %v769_v56 = vadd.f32 %v697_v7, %v4441_v26 }
 0x21c   : > { %v776_v34 = vadd.f32 %v768_v20, %v745_v22  ;;  %v775_v41 = vadd.f32 %v767_v17, %v737_v23 }
 0x222   : > { %v729_v35 = vpop.permute.xlu0 %728 }
 0x223   : > { %v746_v18 = vsel %vm730_vm3, %v729_v35, %v713_v62  ;;  %v738_v10 = vsel %vm730_vm3, %v713_v62, %v729_v35  ;;  %v280_v62 = vld [vmem:[%s6540_s3 + $0x78] sm:$0xff]  ;;  %v763_v35 = vadd.f32 %v694_v24, %v4425_v14  ;;  %v290_v24 = vld [vmem:[%s6540_s3 + $0xc8] sm:$0xff] }
 0x224   : > { %v778_v63 = vadd.f32 %v770_v53, %v746_v18  ;;  %v777_v39 = vadd.f32 %v769_v56, %v738_v10 }
 0x250   : > { %v790_v4 = vpop.permute.xlu2 %789 }
 0x258   : > { %v792_v59 = vpop.permute.xlu2 %791 }
 0x260   : > { %v794_v25 = vpop.permute.xlu2 %793  ;;  %v788_v22 = vpop.permute.xlu0 %787 }
 0x268   : > { %v782_v9 = vpop.permute.xlu1 %781  ;;  %v780_v13 = vpop.permute.xlu2 %779 }
 0x269   : > { %v801_v30 = vsel %vm795_vm5, %v790_v4, %v782_v9  ;;  %v797_v36 = vsel %vm795_vm5, %v782_v9, %v790_v4  ;;  %v800_v0 = vsel %vm795_vm5, %v788_v22, %v780_v13 }
 0x26a   : > { %v806_v6 = vmul.f32 %v4568_v29, %v801_v30  ;;  %v815_v47 = vadd.f32 %v797_v36, %v774_v40  ;;  %v4652_v30 = vsel %vm229_vm11, 1.0, %v4157_v28  ;;  %v764_v36 = vadd.f32 %v686_v21, %v4427_v15 }
 0x26b   : > { %v804_v19 = vmul.f32 %v4568_v29, %v800_v0  ;;  %v3609_v0 = vld [vmem:[%s6538_s1 + $0x38] sm:$0xff] }
 0x26c   : > { %v814_v27 = vadd.f32 %v806_v6, %v773_v45  ;;  %v823_v8 = vadd.f32 %v815_v47, %v276_v5  ;;  %v273_v5 = vld [vmem:[%s6540_s3 + $0x40] sm:$0xff] }
 0x26e   : > { %v831_v3 = vmul.f32 %v4638_v16, %v823_v8 }
 0x270   : > { %v784_v31 = vpop.permute.xlu1 %783 }
 0x271   : > { %v798_v32 = vsel %vm795_vm5, %v784_v31, %v792_v59  ;;  %v802_v33 = vsel %vm795_vm5, %v792_v59, %v784_v31  ;;  %v275_v59 = vld [vmem:[%s6540_s3 + $0x50] sm:$0xff] }
 0x272   : > { %v808_v37 = vmul.f32 %v4568_v29, %v802_v33  ;;  %v817_v42 = vadd.f32 %v798_v32, %v776_v34  ;;  %v822_v60 = vadd.f32 %v814_v27, %v275_v59  ;;  %v285_v33 = vld [vmem:[%s6540_s3 + $0xa0] sm:$0xff]  ;;  %v284_v34 = vld [vmem:[%s6540_s3 + $0x98] sm:$0xff]  ;;  %v282_v59 = vld [vmem:[%s6540_s3 + $0x88] sm:$0xff] }
 0x273   : > { %v839_v44 = vadd.f32 %v831_v3, %v284_v34  ;;  %v3585_v34 = vld [vmem:[%s6540_s3 + $0xf8] sm:$0xff] }
 0x274   : > { %v816_v49 = vadd.f32 %v808_v37, %v775_v41  ;;  %v825_v4 = vadd.f32 %v817_v42, %v278_v48  ;;  %v287_v37 = vld [vmem:[%s6540_s3 + $0xb0] sm:$0xff]  ;;  %v830_v38 = vmul.f32 %v4652_v30, %v822_v60 }
 0x275   : > { %v283_v42 = vld [vmem:[%s6540_s3 + $0x90] sm:$0xff]  ;;  %v847_v56 = vmax.f32 %v839_v44, 0.0 }
 0x276   : > { %v824_v26 = vadd.f32 %v816_v49, %v277_v54  ;;  %v833_v31 = vmul.f32 %v4638_v16, %v825_v4  ;;  %v796_v49 = vsel %vm795_vm5, %v780_v13, %v788_v22  ;;  %v838_v53 = vadd.f32 %v830_v38, %v283_v42  ;;  %v3583_v38 = vld [vmem:[%s6540_s3 + $0xe8] sm:$0xff] }
 0x278   : > { %v786_v46 = vpop.permute.xlu1 %785  ;;  %v832_v52 = vmul.f32 %v4652_v30, %v824_v26  ;;  %v841_v7 = vadd.f32 %v833_v31, %v286_v11  ;;  %v846_v8 = vmax.f32 %v838_v53, 0.0  ;;  %v3606_v31 = vld [vmem:[%s6538_s1 + $0x20] sm:$0xff] }
 0x279   : > { %v799_v9 = vsel %vm795_vm5, %v786_v46, %v794_v25  ;;  %v803_v12 = vsel %vm795_vm5, %v794_v25, %v786_v46  ;;  %v281_v46 = vld [vmem:[%s6540_s3 + $0x80] sm:$0xff] }
 0x27a   : > { %v810_v17 = vmul.f32 %v4568_v29, %v803_v12  ;;  %v819_v20 = vadd.f32 %v799_v9, %v778_v63  ;;  %v840_v43 = vadd.f32 %v832_v52, %v285_v33  ;;  %v849_v10 = vmax.f32 %v841_v7, 0.0  ;;  %v3584_v33 = vld [vmem:[%s6540_s3 + $0xf0] sm:$0xff] }
 0x27c   : > { %v818_v23 = vadd.f32 %v810_v17, %v777_v39  ;;  %v827_v25 = vadd.f32 %v819_v20, %v280_v62  ;;  %v848_v27 = vmax.f32 %v840_v43, 0.0  ;;  %v852_v17 = vld [vmem:[%s6539_s2 + $0xc0] sm:$0xff] }
 0x27d   : > { %v289_v20 = vld [vmem:[%s6540_s3 + $0xc0] sm:$0xff] }
 0x27e   : > { %v826_v32 = vadd.f32 %v818_v23, %v279_v58  ;;  %v835_v28 = vmul.f32 %v4638_v16, %v827_v25 }
 0x280   : > { %v723_v40 = vpop.permute.xlu1 %722  ;;  %v843_v41 = vadd.f32 %v835_v28, %v288_v55  ;;  %v834_v6 = vmul.f32 %v4652_v30, %v826_v32 }
 0x281   : > { %v735_v14 = vsel %vm730_vm3, %v4535_v61, %v723_v40  ;;  %v743_v15 = vsel %vm730_vm3, %v723_v40, %v4535_v61 }
 0x282   : > { %v771_v45 = vadd.f32 %v763_v35, %v735_v14  ;;  %v772_v18 = vadd.f32 %v764_v36, %v743_v15  ;;  %v851_v47 = vmax.f32 %v843_v41, 0.0  ;;  %v842_v48 = vadd.f32 %v834_v6, %v287_v37  ;;  %v3586_v35 = vld [vmem:[%s6540_s3 + $0x100] sm:$0xff]  ;;  %v3587_v36 = vld [vmem:[%s6540_s3 + $0x108] sm:$0xff]  ;;  %v3580_v14 = vld [vmem:[%s6540_s3 + $0xd0] sm:$0xff] }
 0x283   : > { %v3582_v37 = vld [vmem:[%s6540_s3 + $0xe0] sm:$0xff]  ;;  %v3581_v15 = vld [vmem:[%s6540_s3 + $0xd8] sm:$0xff] }
 0x284   : > { %v812_v51 = vadd.f32 %v804_v19, %v771_v45  ;;  %v813_v61 = vadd.f32 %v796_v49, %v772_v18  ;;  %888 = vmatpush.msra.mxu1 %v851_v47  ;;  %v850_v54 = vmax.f32 %v842_v48, 0.0 }
 0x286   : > { %868 = vmatpush.msra.mxu0 %v850_v54  ;;  %889 = vmatpush.msra.mxu1 %v849_v10  ;;  %v820_v63 = vadd.f32 %v812_v51, %v273_v5  ;;  %v821_v4 = vadd.f32 %v813_v61, %v274_v50  ;;  %v3618_v54 = vld [vmem:[%s6539_s2 + $0xc8] sm:$0xff]  ;;  %v3619_v10 = vld [vmem:[%s6539_s2 + $0xd0] sm:$0xff] }
 0x288   : > { %869 = vmatpush.msra.mxu0 %v848_v27  ;;  %890 = vmatpush.msra.mxu1 %v847_v56  ;;  %v828_v62 = vmul.f32 %v4652_v30, %v820_v63  ;;  %v829_v9 = vmul.f32 %v4638_v16, %v821_v4  ;;  %v3620_v27 = vld [vmem:[%s6539_s2 + $0xd8] sm:$0xff]  ;;  %v3621_v56 = vld [vmem:[%s6539_s2 + $0xe0] sm:$0xff]  ;;  %v3622_v63 = vld [vmem:[%s6539_s2 + $0xe8] sm:$0xff] }
 0x289   : > { %v3623_v4 = vld [vmem:[%s6539_s2 + $0xf0] sm:$0xff] }
 0x28a   : > { %870 = vmatpush.msra.mxu0 %v846_v8  ;;  %v836_v12 = vadd.f32 %v828_v62, %v281_v46  ;;  %v837_v26 = vadd.f32 %v829_v9, %v282_v59  ;;  %v3624_v46 = vld [vmem:[%s6539_s2 + $0xf8] sm:$0xff]  ;;  %v3625_v59 = vld [vmem:[%s6539_s2 + $0x100] sm:$0xff]  ;;  %v3626_v8 = vld [vmem:[%s6539_s2 + $0x108] sm:$0xff] }
 0x28b   : > { %v3627_v62 = vld [vmem:[%s6539_s2 + $0x110] sm:$0xff]  ;;  %v3628_v9 = vld [vmem:[%s6539_s2 + $0x118] sm:$0xff] }
 0x28c   : > { %v844_v39 = vmax.f32 %v836_v12, 0.0  ;;  %v845_v13 = vmax.f32 %v837_v26, 0.0  ;;  %v3629_v12 = vld [vmem:[%s6539_s2 + $0x120] sm:$0xff]  ;;  %v3630_v26 = vld [vmem:[%s6539_s2 + $0x128] sm:$0xff] }
 0x28e   : > { %871 = vmatpush.msra.mxu0 %v844_v39  ;;  %891 = vmatpush.msra.mxu1 %v845_v13  ;;  %v3631_v39 = vld [vmem:[%s6539_s2 + $0x130] sm:$0xff]  ;;  %v3632_v13 = vld [vmem:[%s6539_s2 + $0x138] sm:$0xff] }
 0x28f   : > { %3578 = vmatmul.msk.f32.vlgmr.msra.gmra.mxu0 %vm398_vm1, %v852_v17  ;;  %3579 = vmatmul.msk.f32.vlgmr.msra.gmra.mxu1 %vm398_vm1, %v852_v17  ;;  %v3633_v17 = vld [vmem:[%s6539_s2 + $0x140] sm:$0xff] }
 0x30c   : > { %v873_v21 = vpop.f32.mrf.mxu0  ;;  %v893_v58 = vpop.f32.mrf.mxu1 }
 0x30d   : > { %v896_v60 = vadd.f32 %v873_v21, %v4239_v1  ;;  %v897_v22 = vadd.f32 %v893_v58, %v4241_v2  ;;  %v3607_v1 = vld [vmem:[%s6538_s1 + $0x28] sm:$0xff]  ;;  %v3608_v2 = vld [vmem:[%s6538_s1 + $0x30] sm:$0xff] }
 0x30f   : > { %v4718_v23 = vadd.f32 %v896_v60, %v289_v20  ;;  %v4720_v25 = vadd.f32 %v897_v22, %v290_v24  ;;  %v3634_v24 = vld [vmem:[%s6539_s2 + $0x148] sm:$0xff]  ;;  %v3635_v22 = vld [vmem:[%s6539_s2 + $0x150] sm:$0xff] }
 0x311   : > { %959 = vmatpush.msrb.mxu0 %v4718_v23  ;;  %988 = vmatpush.msrb.mxu1 %v4720_v25 }
 0x312   : > { %3610 = vmatmul.msk.f32.vlgmr.msrb.gmra.mxu0 %vm295_vm0, %v3606_v31  ;;  %3614 = vmatmul.msk.f32.vlgmr.msrb.gmra.mxu1 %vm295_vm0, %v3606_v31 }
 0x31a   : > { %3611 = vmatmul.msk.f32.gmra.mxu0 %vm295_vm0, %v3607_v1  ;;  %3615 = vmatmul.msk.f32.gmra.mxu1 %vm295_vm0, %v3607_v1 }
 0x322   : > { %3612 = vmatmul.msk.f32.gmra.mxu0 %vm295_vm0, %v3608_v2  ;;  %3616 = vmatmul.msk.f32.gmra.mxu1 %vm295_vm0, %v3608_v2  ;;  %v3636_v2 = vld [vmem:[%s6539_s2 + $0x158] sm:$0xff] }
 0x32a   : > { %3613 = vmatmul.msk.f32.gmra.mxu0 %vm295_vm0, %v3609_v0  ;;  %3617 = vmatmul.msk.f32.gmra.mxu1 %vm295_vm0, %v3609_v0 }
 0x38f   : > { %v961_v55 = vpop.f32.mrf.mxu0  ;;  %v990_v11 = vpop.f32.mrf.mxu1 }
 0x390   : > { %v962_v47 = vadd.f32 %v3580_v14, %v961_v55  ;;  %v991_v48 = vadd.f32 %v3581_v15, %v990_v11  ;;  %v3637_v11 = vld [vmem:[%s6539_s2 + $0x160] sm:$0xff] }
 0x392   : > { %v1002_v51 = vmax.f32 %v962_v47, 0.0  ;;  %v1003_v61 = vmax.f32 %v991_v48, 0.0 }
 0x397   : > { %v964_v52 = vpop.f32.mrf.mxu0  ;;  %v993_v3 = vpop.f32.mrf.mxu1 }
 0x398   : > { %v965_v43 = vadd.f32 %v3582_v37, %v964_v52  ;;  %v994_v44 = vadd.f32 %v3583_v38, %v993_v3  ;;  %v3640_v37 = vld [vmem:[%s6539_s2 + $0x178] sm:$0xff] }
 0x39a   : > { %v1004_v5 = vmax.f32 %v965_v43, 0.0  ;;  %v1005_v50 = vmax.f32 %v994_v44, 0.0 }
 0x39f   : > { %v967_v32 = vpop.f32.mrf.mxu0  ;;  %v996_v28 = vpop.f32.mrf.mxu1 }
 0x3a0   : > { %v968_v41 = vadd.f32 %v3584_v33, %v967_v32  ;;  %v997_v6 = vadd.f32 %v3585_v34, %v996_v28  ;;  %v3638_v32 = vld [vmem:[%s6539_s2 + $0x168] sm:$0xff]  ;;  %v3639_v34 = vld [vmem:[%s6539_s2 + $0x170] sm:$0xff] }
 0x3a2   : > { %v1006_v49 = vmax.f32 %v968_v41, 0.0  ;;  %v1007_v53 = vmax.f32 %v997_v6, 0.0 }
 0x3a7   : > { %v970_v19 = vpop.f32.mrf.mxu0  ;;  %v999_v40 = vpop.f32.mrf.mxu1 }
 0x3a8   : > { %v971_v7 = vadd.f32 %v3586_v35, %v970_v19  ;;  %v1000_v42 = vadd.f32 %v3587_v36, %v999_v40  ;;  %v3641_v40 = vld [vmem:[%s6539_s2 + $0x180] sm:$0xff] }
 0x3aa   : > { %v1008_v45 = vmax.f32 %v971_v7, 0.0  ;;  %v1009_v18 = vmax.f32 %v1000_v42, 0.0 }
 0x3ac   : > { %1119 = vmatpush.msra.mxu0 %v1008_v45  ;;  %1208 = vmatpush.msra.mxu1 %v1009_v18 }
 0x3ae   : > { %1120 = vmatpush.msra.mxu0 %v1006_v49  ;;  %1209 = vmatpush.msra.mxu1 %v1007_v53 }
 0x3b0   : > { %1121 = vmatpush.msra.mxu0 %v1004_v5  ;;  %1210 = vmatpush.msra.mxu1 %v1005_v50 }
 0x3b2   : > { %1122 = vmatpush.msra.mxu0 %v1002_v51  ;;  %1211 = vmatpush.msra.mxu1 %v1003_v61 }
 0x3b3   : > { %3642 = vmatmul.msk.f32.vlgmr.msra.gmra.mxu0 %vm398_vm1, %v3618_v54  ;;  %3666 = vmatmul.msk.f32.vlgmr.msra.gmra.mxu1 %vm398_vm1, %v3618_v54 }
 0x3bb   : > { %3643 = vmatmul.msk.f32.gmra.mxu0 %vm398_vm1, %v3619_v10  ;;  %3667 = vmatmul.msk.f32.gmra.mxu1 %vm398_vm1, %v3619_v10 }
 0x3c3   : > { %3644 = vmatmul.msk.f32.gmra.mxu0 %vm398_vm1, %v3620_v27  ;;  %3668 = vmatmul.msk.f32.gmra.mxu1 %vm398_vm1, %v3620_v27 }
 0x3cb   : > { %3645 = vmatmul.msk.f32.gmra.mxu0 %vm398_vm1, %v3621_v56  ;;  %3669 = vmatmul.msk.f32.gmra.mxu1 %vm398_vm1, %v3621_v56 }
 0x3d3   : > { %3646 = vmatmul.msk.f32.gmra.mxu0 %vm398_vm1, %v3622_v63  ;;  %3670 = vmatmul.msk.f32.gmra.mxu1 %vm398_vm1, %v3622_v63 }
 0x3db   : > { %3647 = vmatmul.msk.f32.gmra.mxu0 %vm398_vm1, %v3623_v4  ;;  %3671 = vmatmul.msk.f32.gmra.mxu1 %vm398_vm1, %v3623_v4 }
 0x3e3   : > { %3648 = vmatmul.msk.f32.gmra.mxu0 %vm398_vm1, %v3624_v46  ;;  %3672 = vmatmul.msk.f32.gmra.mxu1 %vm398_vm1, %v3624_v46 }
 0x3eb   : > { %3649 = vmatmul.msk.f32.gmra.mxu0 %vm398_vm1, %v3625_v59  ;;  %3673 = vmatmul.msk.f32.gmra.mxu1 %vm398_vm1, %v3625_v59 }
 0x3f3   : > { %3650 = vmatmul.msk.f32.gmra.mxu0 %vm398_vm1, %v3626_v8  ;;  %3674 = vmatmul.msk.f32.gmra.mxu1 %vm398_vm1, %v3626_v8 }
 0x3fb   : > { %3651 = vmatmul.msk.f32.gmra.mxu0 %vm398_vm1, %v3627_v62  ;;  %3675 = vmatmul.msk.f32.gmra.mxu1 %vm398_vm1, %v3627_v62 }
 0x403   : > { %3652 = vmatmul.msk.f32.gmra.mxu0 %vm398_vm1, %v3628_v9  ;;  %3676 = vmatmul.msk.f32.gmra.mxu1 %vm398_vm1, %v3628_v9 }
 0x40b   : > { %3653 = vmatmul.msk.f32.gmra.mxu0 %vm398_vm1, %v3629_v12  ;;  %3677 = vmatmul.msk.f32.gmra.mxu1 %vm398_vm1, %v3629_v12 }
 0x413   : > { %3654 = vmatmul.msk.f32.gmra.mxu0 %vm398_vm1, %v3630_v26  ;;  %3678 = vmatmul.msk.f32.gmra.mxu1 %vm398_vm1, %v3630_v26 }
 0x41b   : > { %3655 = vmatmul.msk.f32.gmra.mxu0 %vm398_vm1, %v3631_v39  ;;  %3679 = vmatmul.msk.f32.gmra.mxu1 %vm398_vm1, %v3631_v39 }
 0x423   : > { %3656 = vmatmul.msk.f32.gmra.mxu0 %vm398_vm1, %v3632_v13  ;;  %3680 = vmatmul.msk.f32.gmra.mxu1 %vm398_vm1, %v3632_v13 }
 0x42b   : > { %3657 = vmatmul.msk.f32.gmra.mxu0 %vm398_vm1, %v3633_v17  ;;  %3681 = vmatmul.msk.f32.gmra.mxu1 %vm398_vm1, %v3633_v17 }
 0x430   : > { %v1124_v20 = vpop.f32.mrf.mxu0  ;;  %v1213_v21 = vpop.f32.mrf.mxu1 }
 0x431   : > { %1285 = vrot.lane.b32.xlu2 %v1124_v20, %s4154_s10  ;;  %1301 = vrot.lane.b32.xlu0 %v1213_v21, %s4154_s10 }
 0x433   : > { %3658 = vmatmul.msk.f32.gmra.mxu0 %vm398_vm1, %v3634_v24  ;;  %3682 = vmatmul.msk.f32.gmra.mxu1 %vm398_vm1, %v3634_v24 }
 0x438   : > { %v1127_v58 = vpop.f32.mrf.mxu0  ;;  %v1216_v60 = vpop.f32.mrf.mxu1 }
 0x439   : > { %1287 = vrot.lane.b32.xlu1 %v1127_v58, %s4154_s10  ;;  %1303 = vrot.lane.b32.xlu2 %v1216_v60, %s4154_s10 }
 0x43b   : > { %3659 = vmatmul.msk.f32.gmra.mxu0 %vm398_vm1, %v3635_v22  ;;  %3683 = vmatmul.msk.f32.gmra.mxu1 %vm398_vm1, %v3635_v22 }
 0x440   : > { %v1130_v31 = vpop.f32.mrf.mxu0  ;;  %v1219_v1 = vpop.f32.mrf.mxu1 }
 0x441   : > { %1289 = vrot.lane.b32.xlu0 %v1130_v31, %s4154_s10  ;;  %1305 = vrot.lane.b32.xlu1 %v1219_v1, %s4154_s10 }
 0x443   : > { %3660 = vmatmul.msk.f32.gmra.mxu0 %vm398_vm1, %v3636_v2  ;;  %3684 = vmatmul.msk.f32.gmra.mxu1 %vm398_vm1, %v3636_v2 }
 0x448   : > { %v1133_v0 = vpop.f32.mrf.mxu0  ;;  %v1222_v55 = vpop.f32.mrf.mxu1 }
 0x449   : > { %1291 = vrot.lane.b32.xlu1 %v1133_v0, %s4154_s10  ;;  %1307 = vrot.lane.b32.xlu2 %v1222_v55, %s4154_s10 }
 0x44b   : > { %3661 = vmatmul.msk.f32.gmra.mxu0 %vm398_vm1, %v3637_v11  ;;  %3685 = vmatmul.msk.f32.gmra.mxu1 %vm398_vm1, %v3637_v11 }
 0x450   : > { %v1136_v52 = vpop.f32.mrf.mxu0  ;;  %v1225_v3 = vpop.f32.mrf.mxu1 }
 0x453   : > { %3662 = vmatmul.msk.f32.gmra.mxu0 %vm398_vm1, %v3638_v32  ;;  %3686 = vmatmul.msk.f32.gmra.mxu1 %vm398_vm1, %v3638_v32 }
 0x458   : > { %v1139_v28 = vpop.f32.mrf.mxu0  ;;  %v1228_v33 = vpop.f32.mrf.mxu1 }
 0x459   : > { %1295 = vrot.lane.b32.xlu1 %v1139_v28, %s4154_s10 }
 0x45b   : > { %3663 = vmatmul.msk.f32.gmra.mxu0 %vm398_vm1, %v3639_v34  ;;  %3687 = vmatmul.msk.f32.gmra.mxu1 %vm398_vm1, %v3639_v34 }
 0x460   : > { %v1142_v35 = vpop.f32.mrf.mxu0  ;;  %v1231_v36 = vpop.f32.mrf.mxu1 }
 0x461   : > { %1297 = vrot.lane.b32.xlu1 %v1142_v35, %s4154_s10  ;;  %1313 = vrot.lane.b32.xlu2 %v1231_v36, %s4154_s10 }
 0x463   : > { %3664 = vmatmul.msk.f32.gmra.mxu0 %vm398_vm1, %v3640_v37  ;;  %3688 = vmatmul.msk.f32.gmra.mxu1 %vm398_vm1, %v3640_v37 }
 0x468   : > { %v1145_v38 = vpop.f32.mrf.mxu0  ;;  %v1234_v19 = vpop.f32.mrf.mxu1 }
 0x469   : > { %1299 = vrot.lane.b32.xlu2 %v1145_v38, %s4154_s10  ;;  %1315 = vrot.lane.b32.xlu0 %v1234_v19, %s4154_s10 }
 0x46b   : > { %3665 = vmatmul.msk.f32.gmra.mxu0 %vm398_vm1, %v3641_v40  ;;  %3689 = vmatmul.msk.f32.gmra.mxu1 %vm398_vm1, %v3641_v40 }
 0x470   : > { %v4901_v41 = vpop.f32.mrf.mxu0  ;;  %v4903_v6 = vpop.f32.mrf.mxu1 }
 0x478   : > { %v4905_v7 = vpop.f32.mrf.mxu0  ;;  %v4907_v42 = vpop.f32.mrf.mxu1 }
 0x480   : > { %v4909_v14 = vpop.f32.mrf.mxu0  ;;  %v4911_v15 = vpop.f32.mrf.mxu1 }
 0x488   : > { %v4913_v43 = vpop.f32.mrf.mxu0  ;;  %v4915_v44 = vpop.f32.mrf.mxu1 }
 0x48b   : > { %v1286_v17 = vpop.permute.xlu2 %1285 }
 0x490   : > { %v4917_v45 = vpop.f32.mrf.mxu0  ;;  %v4919_v18 = vpop.f32.mrf.mxu1 }
 0x493   : > { %v1304_v21 = vpop.permute.xlu2 %1303 }
 0x498   : > { %v4921_v47 = vpop.f32.mrf.mxu0  ;;  %v4923_v48 = vpop.f32.mrf.mxu1 }
 0x4a0   : > { %v4925_v49 = vpop.f32.mrf.mxu0  ;;  %v4927_v53 = vpop.f32.mrf.mxu1 }
 0x4a3   : > { %v1302_v58 = vpop.permute.xlu0 %1301  ;;  %v1308_v60 = vpop.permute.xlu2 %1307 }
 0x4a4   : > { %v1317_v55 = vsel %vm681_vm2, %v1286_v17, %v1302_v58 }
 0x4a8   : > { %v4929_v5 = vpop.f32.mrf.mxu0  ;;  %v4931_v50 = vpop.f32.mrf.mxu1 }
 0x4ab   : > { %v1288_v13 = vpop.permute.xlu1 %1287 }
 0x4ac   : > { %v1318_v34 = vsel %vm681_vm2, %v1288_v13, %v1304_v21  ;;  %v1326_v35 = vsel %vm681_vm2, %v1304_v21, %v1288_v13 }
 0x4ad   : > { %v1383_v36 = vadd.f32 %v1326_v35, %v4905_v7  ;;  %v1384_v37 = vadd.f32 %v1318_v34, %v4907_v42 }
 0x4b0   : > { %v1172_v51 = vpop.f32.mrf.mxu0  ;;  %v1261_v61 = vpop.f32.mrf.mxu1 }
 0x4b1   : > { %1333 = vrot.lane.b32.xlu0 %v1172_v51, %s4155_s11  ;;  %1349 = vrot.lane.b32.xlu1 %v1261_v61, %s4155_s11 }
 0x4b3   : > { %v1306_v20 = vpop.permute.xlu1 %1305  ;;  %v1290_v31 = vpop.permute.xlu0 %1289 }
 0x4b4   : > { %v1327_v7 = vsel %vm681_vm2, %v1306_v20, %v1290_v31 }
 0x4b5   : > { %v1385_v42 = vadd.f32 %v1327_v7, %v4909_v14 }
 0x4b8   : > { %v1175_v54 = vpop.f32.mrf.mxu0  ;;  %v1264_v10 = vpop.f32.mrf.mxu1 }
 0x4b9   : > { %1335 = vrot.lane.b32.xlu1 %v1175_v54, %s4155_s11  ;;  %1351 = vrot.lane.b32.xlu2 %v1264_v10, %s4155_s11  ;;  %v1319_v54 = vsel %vm681_vm2, %v1290_v31, %v1306_v20 }
 0x4ba   : > { %v1386_v10 = vadd.f32 %v1319_v54, %v4911_v15 }
 0x4bb   : > { %v1292_v24 = vpop.permute.xlu1 %1291  ;;  %v4955_v1 = vpop.permute.xlu2 %1313 }
 0x4bc   : > { %v1328_v14 = vsel %vm681_vm2, %v1308_v60, %v1292_v24 }
 0x4bd   : > { %v1387_v15 = vadd.f32 %v1328_v14, %v4913_v43 }
 0x4c0   : > { %v1178_v27 = vpop.f32.mrf.mxu0  ;;  %v1267_v56 = vpop.f32.mrf.mxu1 }
 0x4c1   : > { %1337 = vrot.lane.b32.xlu0 %v1178_v27, %s4155_s11  ;;  %1353 = vrot.lane.b32.xlu1 %v1267_v56, %s4155_s11 }
 0x4c3   : > { %v4963_v11 = vpop.permute.xlu2 %1299 }
 0x4c8   : > { %v1181_v63 = vpop.f32.mrf.mxu0  ;;  %v1270_v4 = vpop.f32.mrf.mxu1 }
 0x4c9   : > { %1339 = vrot.lane.b32.xlu2 %v1181_v63, %s4155_s11  ;;  %1293 = vrot.lane.b32.xlu1 %v1136_v52, %s4154_s10  ;;  %v1382_v52 = vadd.f32 %v1317_v55, %v4903_v6 }
 0x4ca   : > { %1355 = vrot.lane.b32.xlu0 %v1270_v4, %s4155_s11 }
 0x4cb   : > { %v4953_v22 = vpop.permute.xlu1 %1295 }
 0x4d0   : > { %v1184_v46 = vpop.f32.mrf.mxu0  ;;  %v4942_v59 = vpop.f32.mrf.mxu1 }
 0x4d1   : > { %1311 = vrot.lane.b32.xlu2 %v1228_v33, %s4154_s10  ;;  %1341 = vrot.lane.b32.xlu1 %v1184_v46, %s4155_s11 }
 0x4d3   : > { %v4957_v2 = vpop.permute.xlu1 %1297 }
 0x4d8   : > { %v1187_v8 = vpop.f32.mrf.mxu0  ;;  %v1276_v62 = vpop.f32.mrf.mxu1 }
 0x4d9   : > { %1309 = vrot.lane.b32.xlu2 %v1225_v3, %s4154_s10  ;;  %1343 = vrot.lane.b32.xlu0 %v1187_v8, %s4155_s11 }
 0x4da   : > { %1359 = vrot.lane.b32.xlu1 %v1276_v62, %s4155_s11  ;;  %v1320_v62 = vsel %vm681_vm2, %v1292_v24, %v1308_v60  ;;  %v1325_v24 = vsel %vm681_vm2, %v1302_v58, %v1286_v17 }
 0x4db   : > { %v4959_v0 = vpop.permute.xlu0 %1315 }
 0x4e0   : > { %v1190_v9 = vpop.f32.mrf.mxu0  ;;  %v1279_v12 = vpop.f32.mrf.mxu1 }
 0x4e1   : > { %1345 = vrot.lane.b32.xlu0 %v1190_v9, %s4155_s11  ;;  %v1388_v9 = vadd.f32 %v1320_v62, %v4915_v44  ;;  %v1381_v44 = vadd.f32 %v1325_v24, %v4901_v41  ;;  %v1332_v62 = vsel %vm681_vm2, %v4959_v0, %v4963_v11 }
 0x4e2   : > { %1361 = vrot.lane.b32.xlu1 %v1279_v12, %s4155_s11 }
 0x4e8   : > { %v1193_v26 = vpop.f32.mrf.mxu0  ;;  %v1282_v39 = vpop.f32.mrf.mxu1 }
 0x4e9   : > { %1347 = vrot.lane.b32.xlu0 %v1193_v26, %s4155_s11 }
 0x4ea   : > { %1363 = vrot.lane.b32.xlu1 %v1282_v39, %s4155_s11 }
 0x513   : > { %v1352_v38 = vpop.permute.xlu2 %1351 }
 0x523   : > { %v1334_v3 = vpop.permute.xlu0 %1333  ;;  %v1350_v32 = vpop.permute.xlu1 %1349 }
 0x524   : > { %v1373_v28 = vsel %vm730_vm3, %v1350_v32, %v1334_v3  ;;  %v1340_v12 = vpop.permute.xlu2 %1339  ;;  %v1365_v43 = vsel %vm730_vm3, %v1334_v3, %v1350_v32 }
 0x525   : > { %v1390_v33 = vadd.f32 %v1382_v52, %v1373_v28  ;;  %v1389_v60 = vadd.f32 %v1381_v44, %v1365_v43  ;;  %v3590_v43 = vld [vmem:[%s6540_s3 + $0x120] sm:$0xff] }
 0x527   : > { %1421 = vrot.lane.b32.xlu1 %v1390_v33, %s4156_s12 }
 0x52b   : > { %v1336_v19 = vpop.permute.xlu1 %1335 }
 0x52c   : > { %v1366_v40 = vsel %vm730_vm3, %v1336_v19, %v1352_v38  ;;  %v1374_v6 = vsel %vm730_vm3, %v1352_v38, %v1336_v19  ;;  %v1312_v31 = vpop.permute.xlu2 %1311 }
 0x52d   : > { %v1391_v51 = vadd.f32 %v1383_v36, %v1366_v40  ;;  %v1392_v61 = vadd.f32 %v1384_v37, %v1374_v6  ;;  %v1323_v36 = vsel %vm681_vm2, %v4957_v2, %v4955_v1  ;;  %v1322_v37 = vsel %vm681_vm2, %v4953_v22, %v1312_v31 }
 0x52e   : > { %v1402_v38 = vadd.f32 %v1323_v36, %v4927_v53  ;;  %v1330_v19 = vsel %vm681_vm2, %v1312_v31, %v4953_v22  ;;  %v1400_v22 = vadd.f32 %v1322_v37, %v4923_v48 }
 0x52f   : > { %1415 = vrot.lane.b32.xlu2 %v1391_v51, %s4156_s12  ;;  %1423 = vrot.lane.b32.xlu0 %v1392_v61, %s4156_s12  ;;  %v1399_v48 = vadd.f32 %v1330_v19, %v4921_v47 }
 0x533   : > { %v1338_v27 = vpop.permute.xlu0 %1337  ;;  %v1354_v56 = vpop.permute.xlu1 %1353 }
 0x534   : > { %v1367_v63 = vsel %vm730_vm3, %v1338_v27, %v1354_v56  ;;  %v1375_v4 = vsel %vm730_vm3, %v1354_v56, %v1338_v27  ;;  %v1310_v28 = vpop.permute.xlu2 %1309 }
 0x535   : > { %v1393_v46 = vadd.f32 %v1385_v42, %v1367_v63  ;;  %v1394_v8 = vadd.f32 %v1386_v10, %v1375_v4  ;;  %v1324_v10 = vsel %vm681_vm2, %v4963_v11, %v4959_v0  ;;  %v3592_v0 = vld [vmem:[%s6540_s3 + $0x130] sm:$0xff] }
 0x537   : > { %1417 = vrot.lane.b32.xlu2 %v1393_v46, %s4156_s12  ;;  %1425 = vrot.lane.b32.xlu0 %v1394_v8, %s4156_s12 }
 0x53b   : > { %v5013_v55 = vpop.permute.xlu1 %1293 }
 0x53c   : > { %v1356_v26 = vpop.permute.xlu0 %1355 }
 0x53d   : > { %v1368_v39 = vsel %vm730_vm3, %v1340_v12, %v1356_v26  ;;  %v1376_v13 = vsel %vm730_vm3, %v1356_v26, %v1340_v12  ;;  %v3593_v26 = vld [vmem:[%s6540_s3 + $0x138] sm:$0xff] }
 0x53e   : > { %v1395_v20 = vadd.f32 %v1387_v15, %v1368_v39  ;;  %v1396_v21 = vadd.f32 %v1388_v9, %v1376_v13  ;;  %v1404_v39 = vadd.f32 %v1324_v10, %v4931_v50  ;;  %v3591_v13 = vld [vmem:[%s6540_s3 + $0x128] sm:$0xff] }
 0x540   : > { %1427 = vrot.lane.b32.xlu0 %v1396_v21, %s4156_s12  ;;  %1419 = vrot.lane.b32.xlu2 %v1395_v20, %s4156_s12  ;;  %v1403_v21 = vadd.f32 %v1332_v62, %v4929_v5 }
 0x543   : > { %v5015_v33 = vpop.permute.xlu1 %1341 }
 0x548   : > { %1413 = vrot.lane.b32.xlu0 %v1389_v60, %s4156_s12  ;;  %1357 = vrot.lane.b32.xlu2 %v4942_v59, %s4155_s11  ;;  %v1331_v59 = vsel %vm681_vm2, %v4955_v1, %v4957_v2 }
 0x549   : > { %v1401_v54 = vadd.f32 %v1331_v59, %v4925_v49  ;;  %v3594_v59 = vld [vmem:[%s6540_s3 + $0x140] sm:$0xff] }
 0x54b   : > { %v1344_v52 = vpop.permute.xlu0 %1343 }
 0x54c   : > { %v1360_v58 = vpop.permute.xlu1 %1359 }
 0x54d   : > { %v1378_v61 = vsel %vm730_vm3, %v1360_v58, %v1344_v52  ;;  %v1370_v27 = vsel %vm730_vm3, %v1344_v52, %v1360_v58  ;;  %v1329_v58 = vsel %vm681_vm2, %v1310_v28, %v5013_v55 }
 0x54e   : > { %v1408_v4 = vadd.f32 %v1400_v22, %v1378_v61  ;;  %v1407_v15 = vadd.f32 %v1399_v48, %v1370_v27  ;;  %v3598_v48 = vld [vmem:[%s6540_s3 + $0x160] sm:$0xff] }
 0x553   : > { %v1346_v34 = vpop.permute.xlu0 %1345 }
 0x554   : > { %v1362_v41 = vpop.permute.xlu1 %1361 }
 0x555   : > { %v1379_v40 = vsel %vm730_vm3, %v1362_v41, %v1346_v34  ;;  %v1371_v1 = vsel %vm730_vm3, %v1346_v34, %v1362_v41  ;;  %v3595_v34 = vld [vmem:[%s6540_s3 + $0x148] sm:$0xff]  ;;  %v1321_v41 = vsel %vm681_vm2, %v5013_v55, %v1310_v28  ;;  %v3601_v28 = vld [vmem:[%s6540_s3 + $0x178] sm:$0xff] }
 0x556   : > { %v1410_v56 = vadd.f32 %v1402_v38, %v1379_v40  ;;  %v1409_v46 = vadd.f32 %v1401_v54, %v1371_v1  ;;  %v3603_v55 = vld [vmem:[%s6540_s3 + $0x188] sm:$0xff] }
 0x557   : > { %v3599_v54 = vld [vmem:[%s6540_s3 + $0x168] sm:$0xff] }
 0x55b   : > { %v1348_v35 = vpop.permute.xlu0 %1347 }
 0x55c   : > { %v1364_v63 = vpop.permute.xlu1 %1363 }
 0x55d   : > { %v1380_v9 = vsel %vm730_vm3, %v1364_v63, %v1348_v35  ;;  %v1372_v11 = vsel %vm730_vm3, %v1348_v35, %v1364_v63 }
 0x55e   : > { %v1412_v24 = vadd.f32 %v1404_v39, %v1380_v9  ;;  %v1411_v35 = vadd.f32 %v1403_v21, %v1372_v11  ;;  %v3597_v21 = vld [vmem:[%s6540_s3 + $0x158] sm:$0xff] }
 0x589   : > { %v1416_v17 = vpop.permute.xlu2 %1415 }
 0x591   : > { %v1418_v3 = vpop.permute.xlu2 %1417 }
 0x599   : > { %v1422_v10 = vpop.permute.xlu1 %1421 }
 0x59a   : > { %v1420_v6 = vpop.permute.xlu2 %1419 }
 0x5a1   : > { %v1424_v32 = vpop.permute.xlu0 %1423 }
 0x5a2   : > { %v1434_v2 = vsel %vm795_vm5, %v1424_v32, %v1416_v17  ;;  %v1430_v49 = vsel %vm795_vm5, %v1416_v17, %v1424_v32  ;;  %v1358_v31 = vpop.permute.xlu2 %1357 }
 0x5a3   : > { %v1439_v8 = vmul.f32 %v4568_v29, %v1434_v2  ;;  %v1448_v12 = vadd.f32 %v1430_v49, %v1408_v4  ;;  %v1369_v37 = vsel %vm730_vm3, %v5015_v33, %v1358_v31  ;;  %v1398_v2 = vadd.f32 %v1321_v41, %v4919_v18  ;;  %v3589_v4 = vld [vmem:[%s6540_s3 + $0x118] sm:$0xff] }
 0x5a5   : > { %v1447_v20 = vadd.f32 %v1439_v8, %v1407_v15  ;;  %v1456_v60 = vadd.f32 %v3591_v13, %v1448_v12 }
 0x5a7   : > { %v1455_v36 = vadd.f32 %v3590_v43, %v1447_v20  ;;  %v1464_v1 = vmul.f32 %v4638_v16, %v1456_v60  ;;  %v3596_v60 = vld [vmem:[%s6540_s3 + $0x150] sm:$0xff] }
 0x5a9   : > { %v1426_v51 = vpop.permute.xlu0 %1425 }
 0x5aa   : > { %v1435_v53 = vsel %vm795_vm5, %v1426_v51, %v1418_v3  ;;  %v1431_v7 = vsel %vm795_vm5, %v1418_v3, %v1426_v51  ;;  %v1377_v51 = vsel %vm730_vm3, %v1358_v31, %v5015_v33  ;;  %v3600_v33 = vld [vmem:[%s6540_s3 + $0x170] sm:$0xff] }
 0x5ab   : > { %v1441_v42 = vmul.f32 %v4568_v29, %v1435_v53  ;;  %v1450_v14 = vadd.f32 %v1431_v7, %v1410_v56  ;;  %v3602_v7 = vld [vmem:[%s6540_s3 + $0x180] sm:$0xff]  ;;  %v1406_v18 = vadd.f32 %v1398_v2, %v1377_v51 }
 0x5ad   : > { %v1449_v47 = vadd.f32 %v1441_v42, %v1409_v46  ;;  %v1458_v50 = vadd.f32 %v3593_v26, %v1450_v14  ;;  %v1463_v42 = vmul.f32 %v4652_v30, %v1455_v36  ;;  %v1472_v14 = vadd.f32 %v3599_v54, %v1464_v1  ;;  %v3697_v54 = vld [vmem:[%s6540_s3 + $0x1c0] sm:$0xff] }
 0x5af   : > { %v1457_v52 = vadd.f32 %v3592_v0, %v1449_v47  ;;  %v1466_v40 = vmul.f32 %v4638_v16, %v1458_v50  ;;  %v3588_v47 = vld [vmem:[%s6540_s3 + $0x110] sm:$0xff]  ;;  %v1471_v39 = vadd.f32 %v3598_v48, %v1463_v42  ;;  %v1480_v50 = vmax.f32 %v1472_v14, 0.0 }
 0x5b1   : > { %v1465_v61 = vmul.f32 %v4652_v30, %v1457_v52  ;;  %v1474_v49 = vadd.f32 %v3601_v28, %v1466_v40  ;;  %v1479_v31 = vmax.f32 %v1471_v39, 0.0 }
 0x5b2   : > { %v1428_v44 = vpop.permute.xlu0 %1427 }
 0x5b3   : > { %v1432_v17 = vsel %vm795_vm5, %v1420_v6, %v1428_v44  ;;  %v1436_v5 = vsel %vm795_vm5, %v1428_v44, %v1420_v6  ;;  %v1397_v6 = vadd.f32 %v1329_v58, %v4917_v45  ;;  %v1473_v62 = vadd.f32 %v3600_v33, %v1465_v61  ;;  %v3696_v33 = vld [vmem:[%s6540_s3 + $0x1b8] sm:$0xff] }
 0x5b4   : > { %v1443_v3 = vmul.f32 %v4568_v29, %v1436_v5  ;;  %v1452_v32 = vadd.f32 %v1432_v17, %v1412_v24  ;;  %v1482_v20 = vmax.f32 %v1474_v49, 0.0  ;;  %v3690_v5 = vld [vmem:[%s6539_s2 + $0x188] sm:$0xff] }
 0x5b5   : > { %v1405_v22 = vadd.f32 %v1397_v6, %v1369_v37  ;;  %v1481_v43 = vmax.f32 %v1473_v62, 0.0  ;;  %v3722_v6 = vld [vmem:[%s6538_s1 + $0x58] sm:$0xff] }
 0x5b6   : > { %v1451_v38 = vadd.f32 %v1443_v3, %v1411_v35  ;;  %v1460_v19 = vadd.f32 %v3595_v34, %v1452_v32  ;;  %v3605_v32 = vld [vmem:[%s6540_s3 + $0x198] sm:$0xff] }
 0x5b8   : > { %v1459_v53 = vadd.f32 %v3594_v59, %v1451_v38  ;;  %v1468_v45 = vmul.f32 %v4638_v16, %v1460_v19  ;;  %v3604_v59 = vld [vmem:[%s6540_s3 + $0x190] sm:$0xff]  ;;  %v3719_v19 = vld [vmem:[%s6538_s1 + $0x40] sm:$0xff] }
 0x5ba   : > { %v1467_v27 = vmul.f32 %v4652_v30, %v1459_v53  ;;  %v1414_v56 = vpop.permute.xlu0 %1413  ;;  %v1476_v63 = vadd.f32 %v3603_v55, %v1468_v45  ;;  %v3698_v53 = vld [vmem:[%s6540_s3 + $0x1c8] sm:$0xff]  ;;  %v3700_v45 = vld [vmem:[%s6540_s3 + $0x1d8] sm:$0xff] }
 0x5bb   : > { %v1429_v46 = vsel %vm795_vm5, %v1414_v56, %v1422_v10  ;;  %v1433_v8 = vsel %vm795_vm5, %v1422_v10, %v1414_v56 }
 0x5bc   : > { %v1437_v15 = vmul.f32 %v4568_v29, %v1433_v8  ;;  %v1446_v9 = vadd.f32 %v1429_v46, %v1406_v18  ;;  %v1484_v12 = vmax.f32 %v1476_v63, 0.0  ;;  %v1475_v26 = vadd.f32 %v3602_v7, %v1467_v27  ;;  %v3699_v7 = vld [vmem:[%s6540_s3 + $0x1d0] sm:$0xff]  ;;  %v3694_v18 = vld [vmem:[%s6540_s3 + $0x1a8] sm:$0xff]  ;;  %v3693_v46 = vld [vmem:[%s6540_s3 + $0x1a0] sm:$0xff] }
 0x5bd   : > { %v3695_v27 = vld [vmem:[%s6540_s3 + $0x1b0] sm:$0xff] }
 0x5be   : > { %v1445_v13 = vadd.f32 %v1437_v15, %v1405_v22  ;;  %v1454_v0 = vadd.f32 %v3589_v4, %v1446_v9  ;;  %1521 = vmatpush.msrb.mxu1 %v1484_v12  ;;  %v1483_v11 = vmax.f32 %v1475_v26, 0.0 }
 0x5c0   : > { %v1453_v24 = vadd.f32 %v3588_v47, %v1445_v13  ;;  %1501 = vmatpush.msrb.mxu0 %v1483_v11  ;;  %1522 = vmatpush.msrb.mxu1 %v1482_v20  ;;  %v1462_v44 = vmul.f32 %v4638_v16, %v1454_v0  ;;  %v3731_v13 = vld [vmem:[%s6539_s2 + $0x190] sm:$0xff]  ;;  %v3732_v11 = vld [vmem:[%s6539_s2 + $0x198] sm:$0xff]  ;;  %v3733_v20 = vld [vmem:[%s6539_s2 + $0x1a0] sm:$0xff] }
 0x5c2   : > { %1502 = vmatpush.msrb.mxu0 %v1481_v43  ;;  %1523 = vmatpush.msrb.mxu1 %v1480_v50  ;;  %v1470_v52 = vadd.f32 %v3597_v21, %v1462_v44  ;;  %v1461_v34 = vmul.f32 %v4652_v30, %v1453_v24  ;;  %v3734_v21 = vld [vmem:[%s6539_s2 + $0x1a8] sm:$0xff]  ;;  %v3735_v24 = vld [vmem:[%s6539_s2 + $0x1b0] sm:$0xff]  ;;  %v3736_v43 = vld [vmem:[%s6539_s2 + $0x1b8] sm:$0xff] }
 0x5c3   : > { %v3737_v50 = vld [vmem:[%s6539_s2 + $0x1c0] sm:$0xff]  ;;  %v3738_v44 = vld [vmem:[%s6539_s2 + $0x1c8] sm:$0xff] }
 0x5c4   : > { %1503 = vmatpush.msrb.mxu0 %v1479_v31  ;;  %v1478_v17 = vmax.f32 %v1470_v52, 0.0  ;;  %v1469_v58 = vadd.f32 %v3596_v60, %v1461_v34  ;;  %v3739_v60 = vld [vmem:[%s6539_s2 + $0x1d0] sm:$0xff]  ;;  %v3740_v31 = vld [vmem:[%s6539_s2 + $0x1d8] sm:$0xff]  ;;  %v3741_v52 = vld [vmem:[%s6539_s2 + $0x1e0] sm:$0xff] }
 0x5c5   : > { %v3742_v34 = vld [vmem:[%s6539_s2 + $0x1e8] sm:$0xff] }
 0x5c6   : > { %1524 = vmatpush.msrb.mxu1 %v1478_v17  ;;  %v1477_v35 = vmax.f32 %v1469_v58, 0.0  ;;  %v3743_v17 = vld [vmem:[%s6539_s2 + $0x1f0] sm:$0xff]  ;;  %v3745_v58 = vld [vmem:[%s6539_s2 + $0x200] sm:$0xff] }
 0x5c7   : > { %3692 = vmatmul.msk.f32.vlgmr.msrb.gmra.mxu1 %vm398_vm1, %v3690_v5 }
 0x5c8   : > { %1504 = vmatpush.msrb.mxu0 %v1477_v35  ;;  %v3746_v35 = vld [vmem:[%s6539_s2 + $0x208] sm:$0xff] }
 0x5c9   : > { %3691 = vmatmul.msk.f32.vlgmr.msrb.gmra.mxu0 %vm398_vm1, %v3690_v5  ;;  %v3744_v5 = vld [vmem:[%s6539_s2 + $0x1f8] sm:$0xff] }
 0x644   : > { %v1526_v3 = vpop.f32.mrf.mxu1 }
 0x645   : > { %v1530_v41 = vadd.f32 %v1526_v3, %v4720_v25  ;;  %v3721_v25 = vld [vmem:[%s6538_s1 + $0x50] sm:$0xff] }
 0x646   : > { %v1506_v36 = vpop.f32.mrf.mxu0  ;;  %v3747_v3 = vld [vmem:[%s6539_s2 + $0x210] sm:$0xff] }
 0x647   : > { %v1529_v37 = vadd.f32 %v1506_v36, %v4718_v23  ;;  %v5160_v38 = vadd.f32 %v3605_v32, %v1530_v41  ;;  %v3720_v23 = vld [vmem:[%s6538_s1 + $0x48] sm:$0xff]  ;;  %v3748_v36 = vld [vmem:[%s6539_s2 + $0x218] sm:$0xff] }
 0x649   : > { %1621 = vmatpush.msrb.mxu3 %v5160_v38  ;;  %v5166_v40 = vadd.f32 %v3604_v59, %v1529_v37 }
 0x64a   : > { %3727 = vmatmul.msk.f32.vlgmr.msrb.gmra.mxu3 %vm295_vm0, %v3719_v19 }
 0x64b   : > { %1592 = vmatpush.msrb.mxu2 %v5166_v40 }
 0x64c   : > { %3723 = vmatmul.msk.f32.vlgmr.msrb.gmra.mxu2 %vm295_vm0, %v3719_v19  ;;  %v3749_v19 = vld [vmem:[%s6539_s2 + $0x220] sm:$0xff] }
 0x652   : > { %3728 = vmatmul.msk.f32.gmra.mxu3 %vm295_vm0, %v3720_v23 }
 0x654   : > { %3724 = vmatmul.msk.f32.gmra.mxu2 %vm295_vm0, %v3720_v23 }
 0x65a   : > { %3729 = vmatmul.msk.f32.gmra.mxu3 %vm295_vm0, %v3721_v25 }
 0x65c   : > { %3725 = vmatmul.msk.f32.gmra.mxu2 %vm295_vm0, %v3721_v25 }
 0x662   : > { %3730 = vmatmul.msk.f32.gmra.mxu3 %vm295_vm0, %v3722_v6 }
 0x664   : > { %3726 = vmatmul.msk.f32.gmra.mxu2 %vm295_vm0, %v3722_v6  ;;  %v3750_v6 = vld [vmem:[%s6539_s2 + $0x228] sm:$0xff] }
 0x6cd   : > { %v1623_v51 = vpop.f32.mrf.mxu3 }
 0x6ce   : > { %v1624_v8 = vadd.f32 %v3694_v18, %v1623_v51 }
 0x6cf   : > { %v1594_v55 = vpop.f32.mrf.mxu2 }
 0x6d0   : > { %v1595_v9 = vadd.f32 %v3693_v46, %v1594_v55  ;;  %v1636_v47 = vmax.f32 %v1624_v8, 0.0 }
 0x6d2   : > { %v1635_v0 = vmax.f32 %v1595_v9, 0.0 }
 0x6d5   : > { %v1626_v28 = vpop.f32.mrf.mxu3 }
 0x6d6   : > { %v1627_v63 = vadd.f32 %v3696_v33, %v1626_v28  ;;  %v3751_v28 = vld [vmem:[%s6539_s2 + $0x230] sm:$0xff]  ;;  %v3753_v33 = vld [vmem:[%s6539_s2 + $0x240] sm:$0xff] }
 0x6d7   : > { %v1597_v61 = vpop.f32.mrf.mxu2 }
 0x6d8   : > { %v1598_v62 = vadd.f32 %v3695_v27, %v1597_v61  ;;  %v1638_v12 = vmax.f32 %v1627_v63, 0.0 }
 0x6da   : > { %v1637_v39 = vmax.f32 %v1598_v62, 0.0 }
 0x6dd   : > { %v1629_v1 = vpop.f32.mrf.mxu3 }
 0x6de   : > { %v1630_v42 = vadd.f32 %v3698_v53, %v1629_v1 }
 0x6df   : > { %v1600_v2 = vpop.f32.mrf.mxu2 }
 0x6e0   : > { %v1601_v49 = vadd.f32 %v3697_v54, %v1600_v2  ;;  %v1640_v14 = vmax.f32 %v1630_v42, 0.0  ;;  %v3752_v2 = vld [vmem:[%s6539_s2 + $0x238] sm:$0xff] }
 0x6e2   : > { %v1639_v26 = vmax.f32 %v1601_v49, 0.0 }
 0x6e5   : > { %v1632_v22 = vpop.f32.mrf.mxu3 }
 0x6e6   : > { %v1633_v10 = vadd.f32 %v3700_v45, %v1632_v22 }
 0x6e7   : > { %v1603_v56 = vpop.f32.mrf.mxu2 }
 0x6e8   : > { %v1642_v48 = vmax.f32 %v1633_v10, 0.0  ;;  %v1604_v4 = vadd.f32 %v3699_v7, %v1603_v56  ;;  %v3754_v7 = vld [vmem:[%s6539_s2 + $0x248] sm:$0xff] }
 0x6ea   : > { %v1641_v15 = vmax.f32 %v1604_v4, 0.0  ;;  %1841 = vmatpush.msra.mxu3 %v1642_v48 }
 0x6ec   : > { %1752 = vmatpush.msra.mxu2 %v1641_v15  ;;  %1842 = vmatpush.msra.mxu3 %v1640_v14 }
 0x6ee   : > { %1753 = vmatpush.msra.mxu2 %v1639_v26  ;;  %1843 = vmatpush.msra.mxu3 %v1638_v12 }
 0x6f0   : > { %1754 = vmatpush.msra.mxu2 %v1637_v39  ;;  %1844 = vmatpush.msra.mxu3 %v1636_v47 }
 0x6f1   : > { %3779 = vmatmul.msk.f32.vlgmr.msra.gmra.mxu3 %vm398_vm1, %v3731_v13 }
 0x6f2   : > { %1755 = vmatpush.msra.mxu2 %v1635_v0 }
 0x6f3   : > { %3755 = vmatmul.msk.f32.vlgmr.msra.gmra.mxu2 %vm398_vm1, %v3731_v13 }
 0x6f9   : > { %3780 = vmatmul.msk.f32.gmra.mxu3 %vm398_vm1, %v3732_v11 }
 0x6fb   : > { %3756 = vmatmul.msk.f32.gmra.mxu2 %vm398_vm1, %v3732_v11 }
 0x701   : > { %3781 = vmatmul.msk.f32.gmra.mxu3 %vm398_vm1, %v3733_v20 }
 0x703   : > { %3757 = vmatmul.msk.f32.gmra.mxu2 %vm398_vm1, %v3733_v20 }
 0x709   : > { %3782 = vmatmul.msk.f32.gmra.mxu3 %vm398_vm1, %v3734_v21 }
 0x70b   : > { %3758 = vmatmul.msk.f32.gmra.mxu2 %vm398_vm1, %v3734_v21 }
 0x711   : > { %3783 = vmatmul.msk.f32.gmra.mxu3 %vm398_vm1, %v3735_v24 }
 0x713   : > { %3759 = vmatmul.msk.f32.gmra.mxu2 %vm398_vm1, %v3735_v24 }
 0x719   : > { %3784 = vmatmul.msk.f32.gmra.mxu3 %vm398_vm1, %v3736_v43 }
 0x71b   : > { %3760 = vmatmul.msk.f32.gmra.mxu2 %vm398_vm1, %v3736_v43 }
 0x721   : > { %3785 = vmatmul.msk.f32.gmra.mxu3 %vm398_vm1, %v3737_v50 }
 0x723   : > { %3761 = vmatmul.msk.f32.gmra.mxu2 %vm398_vm1, %v3737_v50 }
 0x729   : > { %3786 = vmatmul.msk.f32.gmra.mxu3 %vm398_vm1, %v3738_v44 }
 0x72b   : > { %3762 = vmatmul.msk.f32.gmra.mxu2 %vm398_vm1, %v3738_v44 }
 0x731   : > { %3787 = vmatmul.msk.f32.gmra.mxu3 %vm398_vm1, %v3739_v60 }
 0x733   : > { %3763 = vmatmul.msk.f32.gmra.mxu2 %vm398_vm1, %v3739_v60 }
 0x739   : > { %3788 = vmatmul.msk.f32.gmra.mxu3 %vm398_vm1, %v3740_v31 }
 0x73b   : > { %3764 = vmatmul.msk.f32.gmra.mxu2 %vm398_vm1, %v3740_v31 }
 0x741   : > { %3789 = vmatmul.msk.f32.gmra.mxu3 %vm398_vm1, %v3741_v52 }
 0x743   : > { %3765 = vmatmul.msk.f32.gmra.mxu2 %vm398_vm1, %v3741_v52 }
 0x749   : > { %3790 = vmatmul.msk.f32.gmra.mxu3 %vm398_vm1, %v3742_v34 }
 0x74b   : > { %3766 = vmatmul.msk.f32.gmra.mxu2 %vm398_vm1, %v3742_v34 }
 0x751   : > { %3791 = vmatmul.msk.f32.gmra.mxu3 %vm398_vm1, %v3743_v17 }
 0x753   : > { %3767 = vmatmul.msk.f32.gmra.mxu2 %vm398_vm1, %v3743_v17 }
 0x759   : > { %3792 = vmatmul.msk.f32.gmra.mxu3 %vm398_vm1, %v3744_v5 }
 0x75b   : > { %3768 = vmatmul.msk.f32.gmra.mxu2 %vm398_vm1, %v3744_v5 }
 0x761   : > { %3793 = vmatmul.msk.f32.gmra.mxu3 %vm398_vm1, %v3745_v58 }
 0x763   : > { %3769 = vmatmul.msk.f32.gmra.mxu2 %vm398_vm1, %v3745_v58 }
 0x769   : > { %3794 = vmatmul.msk.f32.gmra.mxu3 %vm398_vm1, %v3746_v35 }
 0x76b   : > { %3770 = vmatmul.msk.f32.gmra.mxu2 %vm398_vm1, %v3746_v35 }
 0x771   : > { %3795 = vmatmul.msk.f32.gmra.mxu3 %vm398_vm1, %v3747_v3 }
 0x773   : > { %3771 = vmatmul.msk.f32.gmra.mxu2 %vm398_vm1, %v3747_v3 }
 0x774   : > { %v1846_v32 = vpop.f32.mrf.mxu3 }
 0x775   : > { %1934 = vrot.lane.b32.xlu1 %v1846_v32, %s4154_s10 }
 0x776   : > { %v1757_v41 = vpop.f32.mrf.mxu2 }
 0x777   : > { %1918 = vrot.lane.b32.xlu0 %v1757_v41, %s4154_s10 }
 0x779   : > { %3796 = vmatmul.msk.f32.gmra.mxu3 %vm398_vm1, %v3748_v36 }
 0x77b   : > { %3772 = vmatmul.msk.f32.gmra.mxu2 %vm398_vm1, %v3748_v36 }
 0x77c   : > { %v1849_v59 = vpop.f32.mrf.mxu3 }
 0x77e   : > { %v1760_v37 = vpop.f32.mrf.mxu2 }
 0x77f   : > { %1920 = vrot.lane.b32.xlu2 %v1760_v37, %s4154_s10  ;;  %1936 = vrot.lane.b32.xlu0 %v1849_v59, %s4154_s10 }
 0x781   : > { %3797 = vmatmul.msk.f32.gmra.mxu3 %vm398_vm1, %v3749_v19 }
 0x783   : > { %3773 = vmatmul.msk.f32.gmra.mxu2 %vm398_vm1, %v3749_v19 }
 0x784   : > { %v1852_v23 = vpop.f32.mrf.mxu3 }
 0x786   : > { %v1763_v25 = vpop.f32.mrf.mxu2 }
 0x787   : > { %1922 = vrot.lane.b32.xlu1 %v1763_v25, %s4154_s10  ;;  %1938 = vrot.lane.b32.xlu2 %v1852_v23, %s4154_s10 }
 0x789   : > { %3798 = vmatmul.msk.f32.gmra.mxu3 %vm398_vm1, %v3750_v6 }
 0x78b   : > { %3774 = vmatmul.msk.f32.gmra.mxu2 %vm398_vm1, %v3750_v6 }
 0x78c   : > { %v1855_v51 = vpop.f32.mrf.mxu3 }
 0x78d   : > { %1940 = vrot.lane.b32.xlu0 %v1855_v51, %s4154_s10 }
 0x78e   : > { %v1766_v55 = vpop.f32.mrf.mxu2 }
 0x78f   : > { %1924 = vrot.lane.b32.xlu2 %v1766_v55, %s4154_s10 }
 0x791   : > { %3799 = vmatmul.msk.f32.gmra.mxu3 %vm398_vm1, %v3751_v28 }
 0x793   : > { %3775 = vmatmul.msk.f32.gmra.mxu2 %vm398_vm1, %v3751_v28 }
 0x794   : > { %v5323_v61 = vpop.f32.mrf.mxu3 }
 0x796   : > { %v1769_v1 = vpop.f32.mrf.mxu2 }
 0x799   : > { %3800 = vmatmul.msk.f32.gmra.mxu3 %vm398_vm1, %v3752_v2 }
 0x79b   : > { %3776 = vmatmul.msk.f32.gmra.mxu2 %vm398_vm1, %v3752_v2 }
 0x79c   : > { %v1861_v53 = vpop.f32.mrf.mxu3 }
 0x79e   : > { %v1772_v45 = vpop.f32.mrf.mxu2 }
 0x79f   : > { %1928 = vrot.lane.b32.xlu2 %v1772_v45, %s4154_s10 }
 0x7a1   : > { %3801 = vmatmul.msk.f32.gmra.mxu3 %vm398_vm1, %v3753_v33 }
 0x7a3   : > { %3777 = vmatmul.msk.f32.gmra.mxu2 %vm398_vm1, %v3753_v33 }
 0x7a4   : > { %v1864_v54 = vpop.f32.mrf.mxu3 }
 0x7a5   : > { %1946 = vrot.lane.b32.xlu0 %v1864_v54, %s4154_s10 }
 0x7a6   : > { %v1775_v22 = vpop.f32.mrf.mxu2 }
 0x7a7   : > { %1930 = vrot.lane.b32.xlu2 %v1775_v22, %s4154_s10 }
 0x7a9   : > { %3802 = vmatmul.msk.f32.gmra.mxu3 %vm398_vm1, %v3754_v7 }
 0x7ab   : > { %3778 = vmatmul.msk.f32.gmra.mxu2 %vm398_vm1, %v3754_v7 }
 0x7ac   : > { %v1867_v42 = vpop.f32.mrf.mxu3 }
 0x7ad   : > { %1948 = vrot.lane.b32.xlu1 %v1867_v42, %s4154_s10 }
 0x7ae   : > { %v1778_v10 = vpop.f32.mrf.mxu2 }
 0x7af   : > { %1932 = vrot.lane.b32.xlu0 %v1778_v10, %s4154_s10 }
 0x7b4   : > { %v5345_v18 = vpop.f32.mrf.mxu3 }
 0x7b6   : > { %v5347_v27 = vpop.f32.mrf.mxu2 }
 0x7bc   : > { %v5349_v56 = vpop.f32.mrf.mxu3 }
 0x7be   : > { %v5351_v63 = vpop.f32.mrf.mxu2 }
 0x7c4   : > { %v5353_v49 = vpop.f32.mrf.mxu3 }
 0x7c6   : > { %v5355_v48 = vpop.f32.mrf.mxu2 }
 0x7cc   : > { %v5357_v4 = vpop.f32.mrf.mxu3 }
 0x7ce   : > { %v5359_v46 = vpop.f32.mrf.mxu2 }
 0x7d4   : > { %v5361_v8 = vpop.f32.mrf.mxu3 }
 0x7d6   : > { %v5363_v62 = vpop.f32.mrf.mxu2 }
 0x7d9   : > { %v1921_v39 = vpop.permute.xlu2 %1920 }
 0x7dc   : > { %v5365_v14 = vpop.f32.mrf.mxu3 }
 0x7de   : > { %v5367_v15 = vpop.f32.mrf.mxu2 }
 0x7e1   : > { %v5379_v11 = vpop.permute.xlu2 %1938 }
 0x7e4   : > { %v5369_v9 = vpop.f32.mrf.mxu3 }
 0x7e6   : > { %v5371_v12 = vpop.f32.mrf.mxu2 }
 0x7e7   : > { %v1935_v6 = vpop.permute.xlu1 %1934 }
 0x7e9   : > { %v5381_v21 = vpop.permute.xlu0 %1918  ;;  %v5385_v50 = vpop.permute.xlu2 %1924 }
 0x7ec   : > { %v5373_v26 = vpop.f32.mrf.mxu3 }
 0x7ee   : > { %v5375_v47 = vpop.f32.mrf.mxu2 }
 0x7f1   : > { %v1937_v60 = vpop.permute.xlu0 %1936 }
 0x7f2   : > { %v1951_v54 = vsel %vm681_vm2, %v1921_v39, %v1937_v60  ;;  %v1959_v22 = vsel %vm681_vm2, %v1937_v60, %v1921_v39 }
 0x7f3   : > { %v2016_v7 = vadd.f32 %v1959_v22, %v5351_v63  ;;  %v2017_v42 = vadd.f32 %v1951_v54, %v5349_v56 }
 0x7f4   : > { %v1894_v13 = vpop.f32.mrf.mxu3 }
 0x7f5   : > { %1982 = vrot.lane.b32.xlu2 %v1894_v13, %s4155_s11 }
 0x7f6   : > { %v1805_v0 = vpop.f32.mrf.mxu2 }
 0x7f7   : > { %1966 = vrot.lane.b32.xlu1 %v1805_v0, %s4155_s11 }
 0x7f9   : > { %v5389_v52 = vpop.permute.xlu2 %1928  ;;  %v1923_v51 = vpop.permute.xlu1 %1922 }
 0x7fa   : > { %v1952_v63 = vsel %vm681_vm2, %v1923_v51, %v5379_v11  ;;  %v1960_v56 = vsel %vm681_vm2, %v5379_v11, %v1923_v51 }
 0x7fb   : > { %v2018_v39 = vadd.f32 %v1960_v56, %v5355_v48 }
 0x7fc   : > { %v1897_v20 = vpop.f32.mrf.mxu3 }
 0x7fd   : > { %1984 = vrot.lane.b32.xlu0 %v1897_v20, %s4155_s11 }
 0x7fe   : > { %v1808_v24 = vpop.f32.mrf.mxu2 }
 0x7ff   : > { %1968 = vrot.lane.b32.xlu2 %v1808_v24, %s4155_s11  ;;  %v1941_v17 = vpop.permute.xlu0 %1940 }
 0x800   : > { %v1953_v48 = vsel %vm681_vm2, %v5385_v50, %v1941_v17 }
 0x801   : > { %v1931_v35 = vpop.permute.xlu2 %1930 }
 0x804   : > { %v1900_v43 = vpop.f32.mrf.mxu3 }
 0x806   : > { %v1811_v44 = vpop.f32.mrf.mxu2 }
 0x807   : > { %1970 = vrot.lane.b32.xlu1 %v1811_v44, %s4155_s11  ;;  %1986 = vrot.lane.b32.xlu2 %v1900_v43, %s4155_s11  ;;  %v2019_v43 = vadd.f32 %v1952_v63, %v5353_v49  ;;  %v1961_v49 = vsel %vm681_vm2, %v1941_v17, %v5385_v50  ;;  %v1958_v50 = vsel %vm681_vm2, %v1935_v6, %v5381_v21 }
 0x80c   : > { %v1903_v31 = vpop.f32.mrf.mxu3 }
 0x80e   : > { %v1814_v34 = vpop.f32.mrf.mxu2 }
 0x80f   : > { %1972 = vrot.lane.b32.xlu0 %v1814_v34, %s4155_s11  ;;  %1926 = vrot.lane.b32.xlu2 %v1769_v1, %s4154_s10 }
 0x810   : > { %1988 = vrot.lane.b32.xlu1 %v1903_v31, %s4155_s11 }
 0x814   : > { %v5394_v5 = vpop.f32.mrf.mxu3 }
 0x816   : > { %v1817_v58 = vpop.f32.mrf.mxu2 }
 0x817   : > { %v1947_v3 = vpop.permute.xlu0 %1946  ;;  %1944 = vrot.lane.b32.xlu0 %v1861_v53, %s4154_s10  ;;  %1974 = vrot.lane.b32.xlu2 %v1817_v58, %s4155_s11 }
 0x818   : > { %v5400_v32 = vsel %vm681_vm2, %v1931_v35, %v1947_v3  ;;  %v5404_v41 = vsel %vm681_vm2, %v1947_v3, %v1931_v35  ;;  %v2020_v3 = vadd.f32 %v1961_v49, %v5359_v46  ;;  %v2014_v46 = vadd.f32 %v1958_v50, %v5347_v27 }
 0x81c   : > { %v1909_v36 = vpop.f32.mrf.mxu3 }
 0x81e   : > { %v1820_v59 = vpop.f32.mrf.mxu2 }
 0x81f   : > { %1942 = vrot.lane.b32.xlu0 %v5323_v61, %s4154_s10  ;;  %1976 = vrot.lane.b32.xlu1 %v1820_v59, %s4155_s11  ;;  %v5414_v55 = vpop.permute.xlu1 %1948  ;;  %v1950_v61 = vsel %vm681_vm2, %v5381_v21, %v1935_v6 }
 0x820   : > { %1992 = vrot.lane.b32.xlu2 %v1909_v36, %s4155_s11  ;;  %v2015_v2 = vadd.f32 %v1950_v61, %v5345_v18  ;;  %v2021_v36 = vadd.f32 %v1953_v48, %v5357_v4  ;;  %v3704_v48 = vld [vmem:[%s6540_s3 + $0x1f8] sm:$0xff] }
 0x821   : > { %v5419_v1 = vpop.permute.xlu0 %1932 }
 0x824   : > { %v1912_v37 = vpop.f32.mrf.mxu3 }
 0x826   : > { %v1823_v19 = vpop.f32.mrf.mxu2 }
 0x827   : > { %1978 = vrot.lane.b32.xlu1 %v1823_v19, %s4155_s11 }
 0x828   : > { %1994 = vrot.lane.b32.xlu2 %v1912_v37, %s4155_s11 }
 0x82c   : > { %v1915_v23 = vpop.f32.mrf.mxu3 }
 0x82e   : > { %v1826_v25 = vpop.f32.mrf.mxu2 }
 0x82f   : > { %1980 = vrot.lane.b32.xlu1 %v1826_v25, %s4155_s11 }
 0x830   : > { %1996 = vrot.lane.b32.xlu2 %v1915_v23, %s4155_s11 }
 0x84f   : > { %v1983_v28 = vpop.permute.xlu2 %1982 }
 0x859   : > { %v1969_v10 = vpop.permute.xlu2 %1968 }
 0x861   : > { %v1987_v44 = vpop.permute.xlu2 %1986 }
 0x869   : > { %v1967_v53 = vpop.permute.xlu1 %1966  ;;  %v1927_v61 = vpop.permute.xlu2 %1926 }
 0x86a   : > { %v2006_v45 = vsel %vm730_vm3, %v1983_v28, %v1967_v53  ;;  %v1998_v4 = vsel %vm730_vm3, %v1967_v53, %v1983_v28 }
 0x86b   : > { %v2023_v33 = vadd.f32 %v2015_v2, %v2006_v45  ;;  %v2022_v17 = vadd.f32 %v2014_v46, %v1998_v4 }
 0x86d   : > { %2054 = vrot.lane.b32.xlu2 %v2023_v33, %s4156_s12 }
 0x86f   : > { %v1985_v13 = vpop.permute.xlu0 %1984 }
 0x870   : > { %v1999_v18 = vsel %vm730_vm3, %v1969_v10, %v1985_v13  ;;  %v2007_v0 = vsel %vm730_vm3, %v1985_v13, %v1969_v10  ;;  %v2035_v13 = vadd.f32 %v5400_v32, %v5369_v9 }
 0x871   : > { %v2024_v20 = vadd.f32 %v2016_v7, %v1999_v18  ;;  %v2025_v24 = vadd.f32 %v2017_v42, %v2007_v0  ;;  %v5474_v2 = vpop.permute.xlu2 %1974 }
 0x873   : > { %2048 = vrot.lane.b32.xlu0 %v2024_v20, %s4156_s12  ;;  %2056 = vrot.lane.b32.xlu1 %v2025_v24, %s4156_s12 }
 0x879   : > { %v1971_v60 = vpop.permute.xlu1 %1970 }
 0x87a   : > { %v2000_v31 = vsel %vm730_vm3, %v1971_v60, %v1987_v44  ;;  %v2008_v34 = vsel %vm730_vm3, %v1987_v44, %v1971_v60  ;;  %v1993_v54 = vpop.permute.xlu2 %1992  ;;  %v1965_v60 = vsel %vm681_vm2, %v5414_v55, %v5419_v1 }
 0x87b   : > { %v2026_v58 = vadd.f32 %v2018_v39, %v2000_v31  ;;  %v2027_v35 = vadd.f32 %v2019_v43, %v2008_v34  ;;  %v2034_v43 = vadd.f32 %v5404_v41, %v5371_v12 }
 0x87d   : > { %2050 = vrot.lane.b32.xlu0 %v2026_v58, %s4156_s12  ;;  %2058 = vrot.lane.b32.xlu1 %v2027_v35, %s4156_s12 }
 0x881   : > { %v1973_v11 = vpop.permute.xlu0 %1972 }
 0x882   : > { %v1989_v59 = vpop.permute.xlu1 %1988  ;;  %v1995_v28 = vpop.permute.xlu2 %1994 }
 0x883   : > { %v2001_v37 = vsel %vm730_vm3, %v1973_v11, %v1989_v59  ;;  %v2009_v19 = vsel %vm730_vm3, %v1989_v59, %v1973_v11 }
 0x884   : > { %v2028_v23 = vadd.f32 %v2020_v3, %v2001_v37  ;;  %v2029_v25 = vadd.f32 %v2021_v36, %v2009_v19  ;;  %v2036_v36 = vadd.f32 %v1965_v60, %v5375_v47  ;;  %v3705_v19 = vld [vmem:[%s6540_s3 + $0x200] sm:$0xff] }
 0x886   : > { %2060 = vrot.lane.b32.xlu1 %v2029_v25, %s4156_s12  ;;  %2052 = vrot.lane.b32.xlu0 %v2028_v23, %s4156_s12 }
 0x889   : > { %v1945_v45 = vpop.permute.xlu0 %1944 }
 0x88a   : > { %v1955_v27 = vsel %vm681_vm2, %v5389_v52, %v1945_v45  ;;  %v1963_v20 = vsel %vm681_vm2, %v1945_v45, %v5389_v52  ;;  %v1997_v32 = vpop.permute.xlu2 %1996  ;;  %v1957_v52 = vsel %vm681_vm2, %v5419_v1, %v5414_v55  ;;  %v3706_v55 = vld [vmem:[%s6540_s3 + $0x208] sm:$0xff] }
 0x88b   : > { %v2033_v18 = vadd.f32 %v1955_v27, %v5365_v14  ;;  %v2032_v35 = vadd.f32 %v1963_v20, %v5367_v15  ;;  %v2037_v1 = vadd.f32 %v1957_v52, %v5373_v26  ;;  %v3708_v26 = vld [vmem:[%s6540_s3 + $0x218] sm:$0xff]  ;;  %v3713_v52 = vld [vmem:[%s6540_s3 + $0x240] sm:$0xff] }
 0x88e   : > { %2046 = vrot.lane.b32.xlu1 %v2022_v17, %s4156_s12  ;;  %1990 = vrot.lane.b32.xlu0 %v5394_v5, %s4155_s11 }
 0x891   : > { %v1977_v51 = vpop.permute.xlu1 %1976  ;;  %v1943_v22 = vpop.permute.xlu0 %1942 }
 0x892   : > { %v2011_v53 = vsel %vm730_vm3, %v1993_v54, %v1977_v51  ;;  %v2003_v31 = vsel %vm730_vm3, %v1977_v51, %v1993_v54  ;;  %v3703_v51 = vld [vmem:[%s6540_s3 + $0x1f0] sm:$0xff]  ;;  %v1954_v54 = vsel %vm681_vm2, %v1927_v61, %v1943_v22 }
 0x893   : > { %v2041_v56 = vadd.f32 %v2033_v18, %v2011_v53  ;;  %v2040_v11 = vadd.f32 %v2032_v35, %v2003_v31  ;;  %v2031_v20 = vadd.f32 %v1954_v54, %v5361_v8  ;;  %v3803_v54 = vld [vmem:[%s6539_s2 + $0x250] sm:$0xff] }
 0x899   : > { %v1979_v33 = vpop.permute.xlu1 %1978 }
 0x89a   : > { %v2012_v5 = vsel %vm730_vm3, %v1995_v28, %v1979_v33  ;;  %v2004_v39 = vsel %vm730_vm3, %v1979_v33, %v1995_v28 }
 0x89b   : > { %v2043_v9 = vadd.f32 %v2035_v13, %v2012_v5  ;;  %v2042_v12 = vadd.f32 %v2034_v43, %v2004_v39 }
 0x8a1   : > { %v1981_v21 = vpop.permute.xlu1 %1980 }
 0x8a2   : > { %v2013_v41 = vsel %vm730_vm3, %v1997_v32, %v1981_v21  ;;  %v2005_v15 = vsel %vm730_vm3, %v1981_v21, %v1997_v32  ;;  %v1962_v21 = vsel %vm681_vm2, %v1943_v22, %v1927_v61  ;;  %v3714_v61 = vld [vmem:[%s6540_s3 + $0x248] sm:$0xff]  ;;  %v3712_v22 = vld [vmem:[%s6540_s3 + $0x238] sm:$0xff] }
 0x8a3   : > { %v2045_v59 = vadd.f32 %v2037_v1, %v2013_v41  ;;  %v2044_v17 = vadd.f32 %v2036_v36, %v2005_v15  ;;  %v3711_v41 = vld [vmem:[%s6540_s3 + $0x230] sm:$0xff] }
 0x8e5   : > { %v2049_v6 = vpop.permute.xlu0 %2048  ;;  %v2057_v7 = vpop.permute.xlu1 %2056 }
 0x8e6   : > { %v2063_v24 = vsel %vm795_vm5, %v2049_v6, %v2057_v7  ;;  %v2067_v14 = vsel %vm795_vm5, %v2057_v7, %v2049_v6  ;;  %v3707_v7 = vld [vmem:[%s6540_s3 + $0x210] sm:$0xff] }
 0x8e7   : > { %v2081_v34 = vadd.f32 %v2063_v24, %v2041_v56  ;;  %v2072_v49 = vmul.f32 %v4568_v29, %v2067_v14  ;;  %v2055_v24 = vpop.permute.xlu2 %2054  ;;  %v3715_v14 = vld [vmem:[%s6540_s3 + $0x250] sm:$0xff] }
 0x8e9   : > { %v2089_v37 = vadd.f32 %v3704_v48, %v2081_v34  ;;  %v2080_v4 = vadd.f32 %v2072_v49, %v2040_v11  ;;  %v3701_v49 = vld [vmem:[%s6540_s3 + $0x1e0] sm:$0xff] }
 0x8eb   : > { %v2097_v5 = vmul.f32 %v4638_v16, %v2089_v37 }
 0x8ef   : > { %v2051_v42 = vpop.permute.xlu0 %2050  ;;  %v2059_v10 = vpop.permute.xlu1 %2058 }
 0x8f0   : > { %v2068_v0 = vsel %vm795_vm5, %v2059_v10, %v2051_v42  ;;  %v2064_v63 = vsel %vm795_vm5, %v2051_v42, %v2059_v10  ;;  %v2088_v42 = vadd.f32 %v3703_v51, %v2080_v4  ;;  %v3716_v10 = vld [vmem:[%s6540_s3 + $0x258] sm:$0xff]  ;;  %v3710_v4 = vld [vmem:[%s6540_s3 + $0x228] sm:$0xff] }
 0x8f1   : > { %v2074_v44 = vmul.f32 %v4568_v29, %v2068_v0  ;;  %v2083_v58 = vadd.f32 %v2064_v63, %v2043_v9  ;;  %v2030_v0 = vadd.f32 %v1962_v21, %v5363_v62  ;;  %v2105_v62 = vadd.f32 %v3712_v22, %v2097_v5  ;;  %v3717_v21 = vld [vmem:[%s6540_s3 + $0x260] sm:$0xff] }
 0x8f2   : > { %v2096_v31 = vmul.f32 %v4652_v30, %v2088_v42 }
 0x8f3   : > { %v2082_v3 = vadd.f32 %v2074_v44, %v2042_v12  ;;  %v2091_v23 = vadd.f32 %v3706_v55, %v2083_v58 }
 0x8f5   : > { %v2090_v6 = vadd.f32 %v3705_v19, %v2082_v3  ;;  %v2099_v53 = vmul.f32 %v4638_v16, %v2091_v23  ;;  %v2113_v23 = vmax.f32 %v2105_v62, 0.0 }
 0x8f7   : > { %v2098_v63 = vmul.f32 %v4652_v30, %v2090_v6  ;;  %v2107_v43 = vadd.f32 %v3714_v61, %v2099_v53  ;;  %v3835_v61 = vld [vmem:[%s6538_s1 + $0x78] sm:$0xff] }
 0x8f8   : > { %v2053_v25 = vpop.permute.xlu0 %2052  ;;  %v2061_v50 = vpop.permute.xlu1 %2060 }
 0x8f9   : > { %v2065_v46 = vsel %vm795_vm5, %v2053_v25, %v2061_v50  ;;  %v2069_v47 = vsel %vm795_vm5, %v2061_v50, %v2053_v25  ;;  %v2106_v1 = vadd.f32 %v3713_v52, %v2098_v63  ;;  %v2115_v3 = vmax.f32 %v2107_v43, 0.0  ;;  %v3709_v50 = vld [vmem:[%s6540_s3 + $0x220] sm:$0xff]  ;;  %v3810_v63 = vld [vmem:[%s6540_s3 + $0x290] sm:$0xff] }
 0x8fa   : > { %v2076_v45 = vmul.f32 %v4568_v29, %v2069_v47  ;;  %v2085_v33 = vadd.f32 %v2065_v46, %v2045_v59  ;;  %v2104_v59 = vadd.f32 %v3711_v41, %v2096_v31  ;;  %v3806_v31 = vld [vmem:[%s6540_s3 + $0x270] sm:$0xff] }
 0x8fb   : > { %v2114_v25 = vmax.f32 %v2106_v1, 0.0 }
 0x8fc   : > { %v2084_v28 = vadd.f32 %v2076_v45, %v2044_v17  ;;  %v2093_v27 = vadd.f32 %v3708_v26, %v2085_v33  ;;  %v2112_v47 = vmax.f32 %v2104_v59, 0.0  ;;  %v3845_v59 = vld [vmem:[%s6539_s2 + $0x260] sm:$0xff] }
 0x8fe   : > { %v2092_v13 = vadd.f32 %v3707_v7, %v2084_v28  ;;  %v2101_v18 = vmul.f32 %v4638_v16, %v2093_v27  ;;  %v3718_v7 = vld [vmem:[%s6540_s3 + $0x268] sm:$0xff] }
 0x900   : > { %v2100_v56 = vmul.f32 %v4652_v30, %v2092_v13  ;;  %v2047_v39 = vpop.permute.xlu1 %2046  ;;  %v1991_v9 = vpop.permute.xlu0 %1990  ;;  %v2109_v32 = vadd.f32 %v3716_v10, %v2101_v18  ;;  %v3832_v10 = vld [vmem:[%s6538_s1 + $0x60] sm:$0xff] }
 0x901   : > { %v2066_v8 = vsel %vm795_vm5, %v2055_v24, %v2047_v39  ;;  %v2002_v44 = vsel %vm730_vm3, %v5474_v2, %v1991_v9  ;;  %v2010_v60 = vsel %vm730_vm3, %v1991_v9, %v5474_v2  ;;  %v2062_v48 = vsel %vm795_vm5, %v2047_v39, %v2055_v24  ;;  %v3702_v2 = vld [vmem:[%s6540_s3 + $0x1e8] sm:$0xff]  ;;  %v3812_v39 = vld [vmem:[%s6540_s3 + $0x2a0] sm:$0xff] }
 0x902   : > { %v2070_v34 = vmul.f32 %v4568_v29, %v2066_v8  ;;  %v2038_v58 = vadd.f32 %v2030_v0, %v2002_v44  ;;  %v2039_v35 = vadd.f32 %v2031_v20, %v2010_v60  ;;  %v2117_v12 = vmax.f32 %v2109_v32, 0.0  ;;  %v3813_v9 = vld [vmem:[%s6540_s3 + $0x2a8] sm:$0xff]  ;;  %v3808_v32 = vld [vmem:[%s6540_s3 + $0x280] sm:$0xff] }
 0x903   : > { %v2108_v55 = vadd.f32 %v3715_v14, %v2100_v56  ;;  %v3811_v56 = vld [vmem:[%s6540_s3 + $0x298] sm:$0xff]  ;;  %v3809_v14 = vld [vmem:[%s6540_s3 + $0x288] sm:$0xff] }
 0x904   : > { %v2078_v11 = vadd.f32 %v2070_v34, %v2038_v58  ;;  %v2079_v15 = vadd.f32 %v2062_v48, %v2039_v35  ;;  %2154 = vmatpush.msra.mxu1 %v2117_v12  ;;  %v3807_v34 = vld [vmem:[%s6540_s3 + $0x278] sm:$0xff] }
 0x905   : > { %v2116_v36 = vmax.f32 %v2108_v55, 0.0 }
 0x906   : > { %v2086_v37 = vadd.f32 %v3701_v49, %v2078_v11  ;;  %v2087_v19 = vadd.f32 %v3702_v2, %v2079_v15  ;;  %2155 = vmatpush.msra.mxu1 %v2115_v3 }
 0x907   : > { %2134 = vmatpush.msra.mxu0 %v2116_v36  ;;  %v3844_v36 = vld [vmem:[%s6539_s2 + $0x258] sm:$0xff] }
 0x908   : > { %2156 = vmatpush.msra.mxu1 %v2113_v23  ;;  %v2094_v26 = vmul.f32 %v4652_v30, %v2086_v37  ;;  %v2095_v46 = vmul.f32 %v4638_v16, %v2087_v19  ;;  %v3846_v37 = vld [vmem:[%s6539_s2 + $0x268] sm:$0xff]  ;;  %v3847_v19 = vld [vmem:[%s6539_s2 + $0x270] sm:$0xff]  ;;  %v3848_v23 = vld [vmem:[%s6539_s2 + $0x278] sm:$0xff] }
 0x909   : > { %2135 = vmatpush.msra.mxu0 %v2114_v25  ;;  %v3849_v25 = vld [vmem:[%s6539_s2 + $0x280] sm:$0xff] }
 0x90a   : > { %v2102_v17 = vadd.f32 %v3709_v50, %v2094_v26  ;;  %v2103_v51 = vadd.f32 %v3710_v4, %v2095_v46  ;;  %v3850_v50 = vld [vmem:[%s6539_s2 + $0x288] sm:$0xff]  ;;  %v3851_v4 = vld [vmem:[%s6539_s2 + $0x290] sm:$0xff]  ;;  %v3852_v26 = vld [vmem:[%s6539_s2 + $0x298] sm:$0xff] }
 0x90b   : > { %2136 = vmatpush.msra.mxu0 %v2112_v47  ;;  %v3853_v46 = vld [vmem:[%s6539_s2 + $0x2a0] sm:$0xff]  ;;  %v3854_v47 = vld [vmem:[%s6539_s2 + $0x2a8] sm:$0xff] }
 0x90c   : > { %v2110_v45 = vmax.f32 %v2102_v17, 0.0  ;;  %v2111_v33 = vmax.f32 %v2103_v51, 0.0  ;;  %v3855_v17 = vld [vmem:[%s6539_s2 + $0x2b0] sm:$0xff]  ;;  %v3856_v51 = vld [vmem:[%s6539_s2 + $0x2b8] sm:$0xff] }
 0x90e   : > { %2137 = vmatpush.msra.mxu0 %v2110_v45  ;;  %2157 = vmatpush.msra.mxu1 %v2111_v33  ;;  %v3857_v45 = vld [vmem:[%s6539_s2 + $0x2c0] sm:$0xff]  ;;  %v3858_v33 = vld [vmem:[%s6539_s2 + $0x2c8] sm:$0xff] }
 0x90f   : > { %3804 = vmatmul.msk.f32.vlgmr.msra.gmra.mxu0 %vm398_vm1, %v3803_v54  ;;  %3805 = vmatmul.msk.f32.vlgmr.msra.gmra.mxu1 %vm398_vm1, %v3803_v54  ;;  %v3859_v54 = vld [vmem:[%s6539_s2 + $0x2d0] sm:$0xff] }
 0x98c   : > { %v2139_v6 = vpop.f32.mrf.mxu0  ;;  %v2159_v28 = vpop.f32.mrf.mxu1 }
 0x98d   : > { %v2162_v27 = vadd.f32 %v2139_v6, %v5166_v40  ;;  %v2163_v53 = vadd.f32 %v2159_v28, %v5160_v38  ;;  %v3833_v38 = vld [vmem:[%s6538_s1 + $0x68] sm:$0xff]  ;;  %v3834_v40 = vld [vmem:[%s6538_s1 + $0x70] sm:$0xff] }
 0x98f   : > { %v5611_v5 = vadd.f32 %v3717_v21, %v2162_v27  ;;  %v5613_v42 = vadd.f32 %v3718_v7, %v2163_v53  ;;  %v3860_v7 = vld [vmem:[%s6539_s2 + $0x2d8] sm:$0xff]  ;;  %v3861_v53 = vld [vmem:[%s6539_s2 + $0x2e0] sm:$0xff] }
 0x991   : > { %2225 = vmatpush.msrb.mxu0 %v5611_v5  ;;  %2254 = vmatpush.msrb.mxu1 %v5613_v42 }
 0x992   : > { %3836 = vmatmul.msk.f32.vlgmr.msrb.gmra.mxu0 %vm295_vm0, %v3832_v10  ;;  %3840 = vmatmul.msk.f32.vlgmr.msrb.gmra.mxu1 %vm295_vm0, %v3832_v10 }
 0x99a   : > { %3837 = vmatmul.msk.f32.gmra.mxu0 %vm295_vm0, %v3833_v38  ;;  %3841 = vmatmul.msk.f32.gmra.mxu1 %vm295_vm0, %v3833_v38 }
 0x9a2   : > { %3838 = vmatmul.msk.f32.gmra.mxu0 %vm295_vm0, %v3834_v40  ;;  %3842 = vmatmul.msk.f32.gmra.mxu1 %vm295_vm0, %v3834_v40  ;;  %v3862_v40 = vld [vmem:[%s6539_s2 + $0x2e8] sm:$0xff] }
 0x9aa   : > { %3839 = vmatmul.msk.f32.gmra.mxu0 %vm295_vm0, %v3835_v61  ;;  %3843 = vmatmul.msk.f32.gmra.mxu1 %vm295_vm0, %v3835_v61 }
 0xa0f   : > { %v2227_v22 = vpop.f32.mrf.mxu0  ;;  %v2256_v13 = vpop.f32.mrf.mxu1 }
 0xa10   : > { %v2228_v48 = vadd.f32 %v3806_v31, %v2227_v22  ;;  %v2257_v49 = vadd.f32 %v3807_v34, %v2256_v13  ;;  %v3863_v13 = vld [vmem:[%s6539_s2 + $0x2f0] sm:$0xff] }
 0xa12   : > { %v2268_v15 = vmax.f32 %v2228_v48, 0.0  ;;  %v2269_v3 = vmax.f32 %v2257_v49, 0.0 }
 0xa17   : > { %v2230_v18 = vpop.f32.mrf.mxu0  ;;  %v2259_v0 = vpop.f32.mrf.mxu1 }
 0xa18   : > { %v2231_v58 = vadd.f32 %v3808_v32, %v2230_v18  ;;  %v2260_v35 = vadd.f32 %v3809_v14, %v2259_v0  ;;  %v3866_v32 = vld [vmem:[%s6539_s2 + $0x308] sm:$0xff] }
 0xa1a   : > { %v2270_v1 = vmax.f32 %v2231_v58, 0.0  ;;  %v2271_v11 = vmax.f32 %v2260_v35, 0.0 }
 0xa1f   : > { %v2233_v20 = vpop.f32.mrf.mxu0  ;;  %v2262_v24 = vpop.f32.mrf.mxu1 }
 0xa20   : > { %v2234_v62 = vadd.f32 %v3810_v63, %v2233_v20  ;;  %v2263_v8 = vadd.f32 %v3811_v56, %v2262_v24  ;;  %v3864_v20 = vld [vmem:[%s6539_s2 + $0x2f8] sm:$0xff]  ;;  %v3865_v56 = vld [vmem:[%s6539_s2 + $0x300] sm:$0xff] }
 0xa22   : > { %v2272_v2 = vmax.f32 %v2234_v62, 0.0  ;;  %v2273_v55 = vmax.f32 %v2263_v8, 0.0 }
 0xa27   : > { %v2236_v43 = vpop.f32.mrf.mxu0  ;;  %v2265_v52 = vpop.f32.mrf.mxu1 }
 0xa28   : > { %v2237_v44 = vadd.f32 %v3812_v39, %v2236_v43  ;;  %v2266_v60 = vadd.f32 %v3813_v9, %v2265_v52  ;;  %v3867_v52 = vld [vmem:[%s6539_s2 + $0x310] sm:$0xff] }
 0xa2a   : > { %v2274_v12 = vmax.f32 %v2237_v44, 0.0  ;;  %v2275_v41 = vmax.f32 %v2266_v60, 0.0 }
 0xa2c   : > { %2385 = vmatpush.msra.mxu0 %v2274_v12  ;;  %2474 = vmatpush.msra.mxu1 %v2275_v41 }
 0xa2e   : > { %2386 = vmatpush.msra.mxu0 %v2272_v2  ;;  %2475 = vmatpush.msra.mxu1 %v2273_v55 }
 0xa30   : > { %2387 = vmatpush.msra.mxu0 %v2270_v1  ;;  %2476 = vmatpush.msra.mxu1 %v2271_v11 }
 0xa32   : > { %2388 = vmatpush.msra.mxu0 %v2268_v15  ;;  %2477 = vmatpush.msra.mxu1 %v2269_v3 }
 0xa33   : > { %3868 = vmatmul.msk.f32.vlgmr.msra.gmra.mxu0 %vm398_vm1, %v3844_v36  ;;  %3892 = vmatmul.msk.f32.vlgmr.msra.gmra.mxu1 %vm398_vm1, %v3844_v36 }
 0xa3b   : > { %3869 = vmatmul.msk.f32.gmra.mxu0 %vm398_vm1, %v3845_v59  ;;  %3893 = vmatmul.msk.f32.gmra.mxu1 %vm398_vm1, %v3845_v59 }
 0xa43   : > { %3870 = vmatmul.msk.f32.gmra.mxu0 %vm398_vm1, %v3846_v37  ;;  %3894 = vmatmul.msk.f32.gmra.mxu1 %vm398_vm1, %v3846_v37 }
 0xa4b   : > { %3871 = vmatmul.msk.f32.gmra.mxu0 %vm398_vm1, %v3847_v19  ;;  %3895 = vmatmul.msk.f32.gmra.mxu1 %vm398_vm1, %v3847_v19 }
 0xa53   : > { %3872 = vmatmul.msk.f32.gmra.mxu0 %vm398_vm1, %v3848_v23  ;;  %3896 = vmatmul.msk.f32.gmra.mxu1 %vm398_vm1, %v3848_v23 }
 0xa5b   : > { %3873 = vmatmul.msk.f32.gmra.mxu0 %vm398_vm1, %v3849_v25  ;;  %3897 = vmatmul.msk.f32.gmra.mxu1 %vm398_vm1, %v3849_v25 }
 0xa63   : > { %3874 = vmatmul.msk.f32.gmra.mxu0 %vm398_vm1, %v3850_v50  ;;  %3898 = vmatmul.msk.f32.gmra.mxu1 %vm398_vm1, %v3850_v50 }
 0xa6b   : > { %3875 = vmatmul.msk.f32.gmra.mxu0 %vm398_vm1, %v3851_v4  ;;  %3899 = vmatmul.msk.f32.gmra.mxu1 %vm398_vm1, %v3851_v4 }
 0xa73   : > { %3876 = vmatmul.msk.f32.gmra.mxu0 %vm398_vm1, %v3852_v26  ;;  %3900 = vmatmul.msk.f32.gmra.mxu1 %vm398_vm1, %v3852_v26 }
 0xa7b   : > { %3877 = vmatmul.msk.f32.gmra.mxu0 %vm398_vm1, %v3853_v46  ;;  %3901 = vmatmul.msk.f32.gmra.mxu1 %vm398_vm1, %v3853_v46 }
 0xa83   : > { %3878 = vmatmul.msk.f32.gmra.mxu0 %vm398_vm1, %v3854_v47  ;;  %3902 = vmatmul.msk.f32.gmra.mxu1 %vm398_vm1, %v3854_v47 }
 0xa8b   : > { %3879 = vmatmul.msk.f32.gmra.mxu0 %vm398_vm1, %v3855_v17  ;;  %3903 = vmatmul.msk.f32.gmra.mxu1 %vm398_vm1, %v3855_v17 }
 0xa93   : > { %3880 = vmatmul.msk.f32.gmra.mxu0 %vm398_vm1, %v3856_v51  ;;  %3904 = vmatmul.msk.f32.gmra.mxu1 %vm398_vm1, %v3856_v51 }
 0xa9b   : > { %3881 = vmatmul.msk.f32.gmra.mxu0 %vm398_vm1, %v3857_v45  ;;  %3905 = vmatmul.msk.f32.gmra.mxu1 %vm398_vm1, %v3857_v45 }
 0xaa3   : > { %3882 = vmatmul.msk.f32.gmra.mxu0 %vm398_vm1, %v3858_v33  ;;  %3906 = vmatmul.msk.f32.gmra.mxu1 %vm398_vm1, %v3858_v33 }
 0xaab   : > { %3883 = vmatmul.msk.f32.gmra.mxu0 %vm398_vm1, %v3859_v54  ;;  %3907 = vmatmul.msk.f32.gmra.mxu1 %vm398_vm1, %v3859_v54 }
 0xab0   : > { %v2390_v21 = vpop.f32.mrf.mxu0  ;;  %v2479_v6 = vpop.f32.mrf.mxu1 }
 0xab1   : > { %2551 = vrot.lane.b32.xlu1 %v2390_v21, %s4154_s10  ;;  %2567 = vrot.lane.b32.xlu2 %v2479_v6, %s4154_s10 }
 0xab3   : > { %3884 = vmatmul.msk.f32.gmra.mxu0 %vm398_vm1, %v3860_v7  ;;  %3908 = vmatmul.msk.f32.gmra.mxu1 %vm398_vm1, %v3860_v7 }
 0xab8   : > { %v2393_v28 = vpop.f32.mrf.mxu0  ;;  %v2482_v27 = vpop.f32.mrf.mxu1 }
 0xab9   : > { %2553 = vrot.lane.b32.xlu0 %v2393_v28, %s4154_s10  ;;  %2569 = vrot.lane.b32.xlu1 %v2482_v27, %s4154_s10 }
 0xabb   : > { %3885 = vmatmul.msk.f32.gmra.mxu0 %vm398_vm1, %v3861_v53  ;;  %3909 = vmatmul.msk.f32.gmra.mxu1 %vm398_vm1, %v3861_v53 }
 0xac0   : > { %v2396_v10 = vpop.f32.mrf.mxu0  ;;  %v2485_v38 = vpop.f32.mrf.mxu1 }
 0xac1   : > { %2555 = vrot.lane.b32.xlu2 %v2396_v10, %s4154_s10  ;;  %2571 = vrot.lane.b32.xlu0 %v2485_v38, %s4154_s10 }
 0xac3   : > { %3886 = vmatmul.msk.f32.gmra.mxu0 %vm398_vm1, %v3862_v40  ;;  %3910 = vmatmul.msk.f32.gmra.mxu1 %vm398_vm1, %v3862_v40 }
 0xac8   : > { %v2399_v61 = vpop.f32.mrf.mxu0  ;;  %v2488_v22 = vpop.f32.mrf.mxu1 }
 0xac9   : > { %2557 = vrot.lane.b32.xlu0 %v2399_v61, %s4154_s10  ;;  %2573 = vrot.lane.b32.xlu1 %v2488_v22, %s4154_s10 }
 0xacb   : > { %3887 = vmatmul.msk.f32.gmra.mxu0 %vm398_vm1, %v3863_v13  ;;  %3911 = vmatmul.msk.f32.gmra.mxu1 %vm398_vm1, %v3863_v13 }
 0xad0   : > { %v2402_v18 = vpop.f32.mrf.mxu0  ;;  %v5769_v0 = vpop.f32.mrf.mxu1 }
 0xad3   : > { %3888 = vmatmul.msk.f32.gmra.mxu0 %vm398_vm1, %v3864_v20  ;;  %3912 = vmatmul.msk.f32.gmra.mxu1 %vm398_vm1, %v3864_v20 }
 0xad8   : > { %v2405_v24 = vpop.f32.mrf.mxu0  ;;  %v2494_v63 = vpop.f32.mrf.mxu1 }
 0xad9   : > { %2561 = vrot.lane.b32.xlu0 %v2405_v24, %s4154_s10 }
 0xadb   : > { %3913 = vmatmul.msk.f32.gmra.mxu1 %vm398_vm1, %v3865_v56  ;;  %3889 = vmatmul.msk.f32.gmra.mxu0 %vm398_vm1, %v3865_v56 }
 0xae0   : > { %v2408_v39 = vpop.f32.mrf.mxu0  ;;  %v2497_v9 = vpop.f32.mrf.mxu1 }
 0xae1   : > { %2563 = vrot.lane.b32.xlu0 %v2408_v39, %s4154_s10  ;;  %2579 = vrot.lane.b32.xlu1 %v2497_v9, %s4154_s10 }
 0xae3   : > { %3914 = vmatmul.msk.f32.gmra.mxu1 %vm398_vm1, %v3866_v32  ;;  %3890 = vmatmul.msk.f32.gmra.mxu0 %vm398_vm1, %v3866_v32 }
 0xae8   : > { %v2411_v14 = vpop.f32.mrf.mxu0  ;;  %v2500_v43 = vpop.f32.mrf.mxu1 }
 0xae9   : > { %2565 = vrot.lane.b32.xlu1 %v2411_v14, %s4154_s10  ;;  %2581 = vrot.lane.b32.xlu2 %v2500_v43, %s4154_s10 }
 0xaeb   : > { %3915 = vmatmul.msk.f32.gmra.mxu1 %vm398_vm1, %v3867_v52  ;;  %3891 = vmatmul.msk.f32.gmra.mxu0 %vm398_vm1, %v3867_v52 }
 0xaf0   : > { %v5796_v62 = vpop.f32.mrf.mxu0  ;;  %v5798_v8 = vpop.f32.mrf.mxu1 }
 0xaf8   : > { %v5800_v44 = vpop.f32.mrf.mxu0  ;;  %v5802_v60 = vpop.f32.mrf.mxu1 }
 0xb00   : > { %v5804_v31 = vpop.f32.mrf.mxu0  ;;  %v5806_v34 = vpop.f32.mrf.mxu1 }
 0xb08   : > { %v5808_v58 = vpop.f32.mrf.mxu0  ;;  %v5810_v35 = vpop.f32.mrf.mxu1 }
 0xb0b   : > { %v5836_v17 = vpop.permute.xlu2 %2567 }
 0xb10   : > { %v5812_v12 = vpop.f32.mrf.mxu0  ;;  %v5814_v41 = vpop.f32.mrf.mxu1 }
 0xb18   : > { %v5816_v48 = vpop.f32.mrf.mxu0  ;;  %v5818_v49 = vpop.f32.mrf.mxu1 }
 0xb1b   : > { %v2556_v21 = vpop.permute.xlu2 %2555 }
 0xb20   : > { %v2432_v2 = vpop.f32.mrf.mxu0  ;;  %v2521_v55 = vpop.f32.mrf.mxu1 }
 0xb23   : > { %v5824_v19 = vpop.permute.xlu1 %2551 }
 0xb24   : > { %v2583_v9 = vsel %vm681_vm2, %v5824_v19, %v5836_v17 }
 0xb25   : > { %v2648_v32 = vadd.f32 %v2583_v9, %v5798_v8 }
 0xb28   : > { %v2435_v1 = vpop.f32.mrf.mxu0  ;;  %v2524_v11 = vpop.f32.mrf.mxu1 }
 0xb2b   : > { %v5820_v15 = vpop.permute.xlu0 %2553  ;;  %v2570_v4 = vpop.permute.xlu1 %2569 }
 0xb30   : > { %v2438_v3 = vpop.f32.mrf.mxu0  ;;  %v2527_v36 = vpop.f32.mrf.mxu1 }
 0xb31   : > { %2599 = vrot.lane.b32.xlu2 %v2438_v3, %s4155_s11  ;;  %2615 = vrot.lane.b32.xlu0 %v2527_v36, %s4155_s11 }
 0xb33   : > { %v5826_v23 = vpop.permute.xlu0 %2571 }
 0xb38   : > { %v2441_v59 = vpop.f32.mrf.mxu0  ;;  %v2530_v37 = vpop.f32.mrf.mxu1 }
 0xb39   : > { %2601 = vrot.lane.b32.xlu0 %v2441_v59, %s4155_s11  ;;  %2617 = vrot.lane.b32.xlu1 %v2530_v37, %s4155_s11 }
 0xb3b   : > { %v5832_v26 = vpop.permute.xlu0 %2557  ;;  %v5839_v51 = vpop.permute.xlu1 %2573 }
 0xb40   : > { %v2444_v25 = vpop.f32.mrf.mxu0  ;;  %v2533_v50 = vpop.f32.mrf.mxu1 }
 0xb41   : > { %2603 = vrot.lane.b32.xlu2 %v2444_v25, %s4155_s11  ;;  %2619 = vrot.lane.b32.xlu0 %v2533_v50, %s4155_s11 }
 0xb43   : > { %v2582_v61 = vpop.permute.xlu2 %2581 }
 0xb48   : > { %v2447_v46 = vpop.f32.mrf.mxu0  ;;  %v2536_v47 = vpop.f32.mrf.mxu1 }
 0xb49   : > { %2605 = vrot.lane.b32.xlu1 %v2447_v46, %s4155_s11  ;;  %2559 = vrot.lane.b32.xlu0 %v2402_v18, %s4154_s10 }
 0xb4a   : > { %2621 = vrot.lane.b32.xlu2 %v2536_v47, %s4155_s11 }
 0xb4b   : > { %v5841_v45 = vpop.permute.xlu0 %2561 }
 0xb50   : > { %v2450_v33 = vpop.f32.mrf.mxu0  ;;  %v5843_v54 = vpop.f32.mrf.mxu1 }
 0xb51   : > { %2577 = vrot.lane.b32.xlu1 %v2494_v63, %s4154_s10  ;;  %2607 = vrot.lane.b32.xlu0 %v2450_v33, %s4155_s11 }
 0xb53   : > { %v2564_v6 = vpop.permute.xlu0 %2563  ;;  %v2580_v7 = vpop.permute.xlu1 %2579 }
 0xb54   : > { %v2589_v28 = vsel %vm681_vm2, %v2564_v6, %v2580_v7  ;;  %v2597_v27 = vsel %vm681_vm2, %v2580_v7, %v2564_v6 }
 0xb55   : > { %v5851_v53 = vadd.f32 %v2597_v27, %v2432_v2  ;;  %v5853_v10 = vadd.f32 %v2589_v28, %v2521_v55  ;;  %v2584_v55 = vsel %vm681_vm2, %v5820_v15, %v2570_v4 }
 0xb56   : > { %v2650_v8 = vadd.f32 %v2584_v55, %v5802_v60  ;;  %v2593_v60 = vsel %vm681_vm2, %v5826_v23, %v2556_v21 }
 0xb58   : > { %v2542_v38 = vpop.f32.mrf.mxu1  ;;  %v2453_v40 = vpop.f32.mrf.mxu0 }
 0xb59   : > { %2575 = vrot.lane.b32.xlu1 %v5769_v0, %s4154_s10  ;;  %2625 = vrot.lane.b32.xlu0 %v2542_v38, %s4155_s11 }
 0xb5a   : > { %2609 = vrot.lane.b32.xlu2 %v2453_v40, %s4155_s11 }
 0xb5b   : > { %v2566_v22 = vpop.permute.xlu1 %2565 }
 0xb5c   : > { %v2590_v13 = vsel %vm681_vm2, %v2566_v22, %v2582_v61  ;;  %v2598_v18 = vsel %vm681_vm2, %v2582_v61, %v2566_v22 }
 0xb5d   : > { %v5863_v20 = vadd.f32 %v2598_v18, %v2435_v1  ;;  %v5865_v24 = vadd.f32 %v2590_v13, %v2524_v11  ;;  %v2592_v1 = vsel %vm681_vm2, %v2570_v4, %v5820_v15  ;;  %v2651_v4 = vadd.f32 %v2593_v60, %v5804_v31 }
 0xb5e   : > { %v2649_v11 = vadd.f32 %v2592_v1, %v5800_v44  ;;  %v2585_v44 = vsel %vm681_vm2, %v2556_v21, %v5826_v23  ;;  %v2586_v31 = vsel %vm681_vm2, %v5832_v26, %v5839_v51 }
 0xb5f   : > { %v2652_v46 = vadd.f32 %v2585_v44, %v5806_v34  ;;  %v2594_v34 = vsel %vm681_vm2, %v5839_v51, %v5832_v26  ;;  %v2654_v27 = vadd.f32 %v2586_v31, %v5810_v35 }
 0xb60   : > { %v2545_v63 = vpop.f32.mrf.mxu1  ;;  %v2456_v56 = vpop.f32.mrf.mxu0  ;;  %v2653_v21 = vadd.f32 %v2594_v34, %v5808_v58  ;;  %v2591_v58 = vsel %vm681_vm2, %v5836_v17, %v5824_v19 }
 0xb61   : > { %2627 = vrot.lane.b32.xlu0 %v2545_v63, %s4155_s11  ;;  %v2647_v26 = vadd.f32 %v2591_v58, %v5796_v62 }
 0xb62   : > { %2611 = vrot.lane.b32.xlu2 %v2456_v56, %s4155_s11 }
 0xb68   : > { %v2548_v0 = vpop.f32.mrf.mxu1  ;;  %v2459_v39 = vpop.f32.mrf.mxu0 }
 0xb69   : > { %2629 = vrot.lane.b32.xlu0 %v2548_v0, %s4155_s11 }
 0xb6a   : > { %2613 = vrot.lane.b32.xlu2 %v2459_v39, %s4155_s11 }
 0xb8b   : > { %v2600_v14 = vpop.permute.xlu2 %2599 }
 0xb9b   : > { %v2604_v15 = vpop.permute.xlu2 %2603 }
 0xba3   : > { %v2616_v43 = vpop.permute.xlu0 %2615 }
 0xba4   : > { %v2639_v52 = vsel %vm730_vm3, %v2616_v43, %v2600_v14  ;;  %v2622_v23 = vpop.permute.xlu2 %2621  ;;  %v2631_v35 = vsel %vm730_vm3, %v2600_v14, %v2616_v43 }
 0xba5   : > { %v2656_v2 = vadd.f32 %v2648_v32, %v2639_v52  ;;  %v2655_v51 = vadd.f32 %v2647_v26, %v2631_v35 }
 0xba7   : > { %2687 = vrot.lane.b32.xlu0 %v2656_v2, %s4156_s12 }
 0xbab   : > { %v2602_v3 = vpop.permute.xlu0 %2601  ;;  %v2618_v36 = vpop.permute.xlu1 %2617 }
 0xbac   : > { %v2632_v59 = vsel %vm730_vm3, %v2602_v3, %v2618_v36  ;;  %v2640_v37 = vsel %vm730_vm3, %v2618_v36, %v2602_v3 }
 0xbad   : > { %v2657_v25 = vadd.f32 %v2649_v11, %v2632_v59  ;;  %v2658_v50 = vadd.f32 %v2650_v8, %v2640_v37 }
 0xbaf   : > { %2681 = vrot.lane.b32.xlu1 %v2657_v25, %s4156_s12  ;;  %2689 = vrot.lane.b32.xlu2 %v2658_v50, %s4156_s12 }
 0xbb3   : > { %v2620_v47 = vpop.permute.xlu0 %2619 }
 0xbb4   : > { %v2633_v33 = vsel %vm730_vm3, %v2604_v15, %v2620_v47  ;;  %v2641_v6 = vsel %vm730_vm3, %v2620_v47, %v2604_v15  ;;  %v2610_v18 = vpop.permute.xlu2 %2609 }
 0xbb5   : > { %v2659_v7 = vadd.f32 %v2651_v4, %v2633_v33  ;;  %v2660_v28 = vadd.f32 %v2652_v46, %v2641_v6 }
 0xbb7   : > { %2683 = vrot.lane.b32.xlu1 %v2659_v7, %s4156_s12  ;;  %2691 = vrot.lane.b32.xlu2 %v2660_v28, %s4156_s12 }
 0xbbb   : > { %v2606_v38 = vpop.permute.xlu1 %2605  ;;  %v2560_v63 = vpop.permute.xlu0 %2559 }
 0xbbc   : > { %v2634_v40 = vsel %vm730_vm3, %v2606_v38, %v2622_v23  ;;  %v2642_v61 = vsel %vm730_vm3, %v2622_v23, %v2606_v38  ;;  %v2612_v56 = vpop.permute.xlu2 %2611 }
 0xbbd   : > { %v2661_v22 = vadd.f32 %v2653_v21, %v2634_v40  ;;  %v2662_v13 = vadd.f32 %v2654_v27, %v2642_v61  ;;  %v3816_v21 = vld [vmem:[%s6540_s3 + $0x2c0] sm:$0xff] }
 0xbbf   : > { %2693 = vrot.lane.b32.xlu2 %v2662_v13, %s4156_s12  ;;  %2685 = vrot.lane.b32.xlu1 %v2661_v22, %s4156_s12  ;;  %v3821_v22 = vld [vmem:[%s6540_s3 + $0x2e8] sm:$0xff] }
 0xbc3   : > { %v5933_v0 = vpop.permute.xlu0 %2607  ;;  %v2578_v9 = vpop.permute.xlu1 %2577 }
 0xbc4   : > { %v2614_v39 = vpop.permute.xlu2 %2613  ;;  %v2588_v62 = vsel %vm681_vm2, %v5841_v45, %v2578_v9  ;;  %v2596_v2 = vsel %vm681_vm2, %v2578_v9, %v5841_v45 }
 0xbc5   : > { %v2666_v36 = vadd.f32 %v2588_v62, %v5818_v49  ;;  %v2665_v15 = vadd.f32 %v2596_v2, %v5816_v48  ;;  %v3817_v48 = vld [vmem:[%s6540_s3 + $0x2c8] sm:$0xff]  ;;  %v3827_v62 = vld [vmem:[%s6540_s3 + $0x318] sm:$0xff] }
 0xbc7   : > { %2679 = vrot.lane.b32.xlu2 %v2655_v51, %s4156_s12  ;;  %2623 = vrot.lane.b32.xlu1 %v5843_v54, %s4155_s11 }
 0xbcb   : > { %v2626_v19 = vpop.permute.xlu0 %2625  ;;  %v2576_v17 = vpop.permute.xlu1 %2575 }
 0xbcc   : > { %v2644_v55 = vsel %vm730_vm3, %v2626_v19, %v2610_v18  ;;  %v2636_v45 = vsel %vm730_vm3, %v2610_v18, %v2626_v19  ;;  %v2587_v18 = vsel %vm681_vm2, %v2560_v63, %v2576_v17  ;;  %v2595_v9 = vsel %vm681_vm2, %v2576_v17, %v2560_v63 }
 0xbcd   : > { %v2674_v49 = vadd.f32 %v2666_v36, %v2644_v55  ;;  %v2673_v33 = vadd.f32 %v2665_v15, %v2636_v45  ;;  %v3826_v55 = vld [vmem:[%s6540_s3 + $0x310] sm:$0xff] }
 0xbd3   : > { %v2628_v14 = vpop.permute.xlu0 %2627 }
 0xbd4   : > { %v2645_v54 = vsel %vm730_vm3, %v2628_v14, %v2612_v56  ;;  %v2637_v1 = vsel %vm730_vm3, %v2612_v56, %v2628_v14 }
 0xbd5   : > { %v2676_v25 = vadd.f32 %v5853_v10, %v2645_v54  ;;  %v2675_v4 = vadd.f32 %v5851_v53, %v2637_v1  ;;  %v3819_v10 = vld [vmem:[%s6540_s3 + $0x2d8] sm:$0xff]  ;;  %v3818_v53 = vld [vmem:[%s6540_s3 + $0x2d0] sm:$0xff]  ;;  %v3825_v1 = vld [vmem:[%s6540_s3 + $0x308] sm:$0xff] }
 0xbdb   : > { %v2630_v50 = vpop.permute.xlu0 %2629 }
 0xbdc   : > { %v2646_v6 = vsel %vm730_vm3, %v2630_v50, %v2614_v39  ;;  %v2638_v31 = vsel %vm730_vm3, %v2614_v39, %v2630_v50  ;;  %v3820_v39 = vld [vmem:[%s6540_s3 + $0x2e0] sm:$0xff] }
 0xbdd   : > { %v2678_v23 = vadd.f32 %v5865_v24, %v2646_v6  ;;  %v2677_v24 = vadd.f32 %v5863_v20, %v2638_v31  ;;  %v3814_v6 = vld [vmem:[%s6540_s3 + $0x2b0] sm:$0xff] }
 0xc09   : > { %v2690_v32 = vpop.permute.xlu2 %2689 }
 0xc11   : > { %v2692_v52 = vpop.permute.xlu2 %2691 }
 0xc19   : > { %v2694_v11 = vpop.permute.xlu2 %2693 }
 0xc21   : > { %v2682_v43 = vpop.permute.xlu1 %2681  ;;  %v2680_v35 = vpop.permute.xlu2 %2679 }
 0xc22   : > { %v2700_v8 = vsel %vm795_vm5, %v2690_v32, %v2682_v43  ;;  %v2696_v44 = vsel %vm795_vm5, %v2682_v43, %v2690_v32  ;;  %v2688_v32 = vpop.permute.xlu0 %2687  ;;  %v3829_v43 = vld [vmem:[%s6540_s3 + $0x328] sm:$0xff] }
 0xc23   : > { %v2705_v46 = vmul.f32 %v4568_v29, %v2700_v8  ;;  %v2714_v7 = vadd.f32 %v2696_v44, %v2674_v49  ;;  %v2699_v14 = vsel %vm795_vm5, %v2688_v32, %v2680_v35  ;;  %v2664_v8 = vadd.f32 %v2587_v18, %v5814_v41  ;;  %v3824_v44 = vld [vmem:[%s6540_s3 + $0x300] sm:$0xff] }
 0xc25   : > { %v2713_v34 = vadd.f32 %v2705_v46, %v2673_v33  ;;  %v2722_v40 = vadd.f32 %v3817_v48, %v2714_v7  ;;  %v2695_v33 = vsel %vm795_vm5, %v2680_v35, %v2688_v32  ;;  %v3815_v7 = vld [vmem:[%s6540_s3 + $0x2b8] sm:$0xff] }
 0xc27   : > { %v2721_v56 = vadd.f32 %v3816_v21, %v2713_v34  ;;  %v2730_v63 = vmul.f32 %v4638_v16, %v2722_v40 }
 0xc29   : > { %v2684_v3 = vpop.permute.xlu1 %2683  ;;  %v2729_v36 = vmul.f32 %v4652_v30, %v2721_v56  ;;  %v2738_v15 = vadd.f32 %v3825_v1, %v2730_v63  ;;  %v3831_v56 = vld [vmem:[%s6540_s3 + $0x338] sm:$0xff]  ;;  %v3924_v1 = vld [vmem:[%s6540_s3 + $0x368] sm:$0xff] }
 0xc2a   : > { %v2697_v59 = vsel %vm795_vm5, %v2684_v3, %v2692_v52  ;;  %v2701_v37 = vsel %vm795_vm5, %v2692_v52, %v2684_v3  ;;  %v3828_v3 = vld [vmem:[%s6540_s3 + $0x320] sm:$0xff] }
 0xc2b   : > { %v2707_v60 = vmul.f32 %v4568_v29, %v2701_v37  ;;  %v2716_v47 = vadd.f32 %v2697_v59, %v2676_v25  ;;  %v2703_v59 = vmul.f32 %v4568_v29, %v2699_v14  ;;  %v2746_v21 = vmax.f32 %v2738_v15, 0.0  ;;  %v3948_v14 = vld [vmem:[%s6538_s1 + $0x98] sm:$0xff] }
 0xc2d   : > { %v2715_v28 = vadd.f32 %v2707_v60, %v2675_v4  ;;  %v2724_v27 = vadd.f32 %v3819_v10, %v2716_v47  ;;  %v2737_v10 = vadd.f32 %v3824_v44, %v2729_v36  ;;  %v3922_v36 = vld [vmem:[%s6540_s3 + $0x358] sm:$0xff] }
 0xc2f   : > { %v2723_v61 = vadd.f32 %v3818_v53, %v2715_v28  ;;  %v2732_v20 = vmul.f32 %v4638_v16, %v2724_v27  ;;  %v3822_v27 = vld [vmem:[%s6540_s3 + $0x2f0] sm:$0xff]  ;;  %v2745_v40 = vmax.f32 %v2737_v10, 0.0 }
 0xc31   : > { %v2686_v38 = vpop.permute.xlu1 %2685  ;;  %v2731_v54 = vmul.f32 %v4652_v30, %v2723_v61  ;;  %v2740_v50 = vadd.f32 %v3827_v62, %v2732_v20  ;;  %v3945_v20 = vld [vmem:[%s6538_s1 + $0x80] sm:$0xff] }
 0xc32   : > { %v2698_v13 = vsel %vm795_vm5, %v2686_v38, %v2694_v11  ;;  %v2702_v58 = vsel %vm795_vm5, %v2694_v11, %v2686_v38  ;;  %v2663_v11 = vadd.f32 %v2595_v9, %v5812_v12  ;;  %v3823_v38 = vld [vmem:[%s6540_s3 + $0x2f8] sm:$0xff] }
 0xc33   : > { %v2709_v26 = vmul.f32 %v4568_v29, %v2702_v58  ;;  %v2718_v51 = vadd.f32 %v2698_v13, %v2678_v23  ;;  %v2739_v60 = vadd.f32 %v3826_v55, %v2731_v54  ;;  %v2748_v53 = vmax.f32 %v2740_v50, 0.0  ;;  %v3923_v55 = vld [vmem:[%s6540_s3 + $0x360] sm:$0xff] }
 0xc35   : > { %v2717_v19 = vadd.f32 %v2709_v26, %v2677_v24  ;;  %v2726_v52 = vadd.f32 %v3821_v22, %v2718_v51  ;;  %v2747_v23 = vmax.f32 %v2739_v60, 0.0  ;;  %v3916_v26 = vld [vmem:[%s6539_s2 + $0x318] sm:$0xff]  ;;  %v3830_v51 = vld [vmem:[%s6540_s3 + $0x330] sm:$0xff] }
 0xc37   : > { %v2725_v17 = vadd.f32 %v3820_v39, %v2717_v19  ;;  %v2734_v2 = vmul.f32 %v4638_v16, %v2726_v52 }
 0xc39   : > { %v2733_v37 = vmul.f32 %v4652_v30, %v2725_v17  ;;  %v2624_v45 = vpop.permute.xlu1 %2623  ;;  %v2742_v25 = vadd.f32 %v3829_v43, %v2734_v2 }
 0xc3a   : > { %v2635_v12 = vsel %vm730_vm3, %v5933_v0, %v2624_v45  ;;  %v2643_v41 = vsel %vm730_vm3, %v2624_v45, %v5933_v0 }
 0xc3b   : > { %v2671_v49 = vadd.f32 %v2663_v11, %v2635_v12  ;;  %v2672_v4 = vadd.f32 %v2664_v8, %v2643_v41  ;;  %v2750_v46 = vmax.f32 %v2742_v25, 0.0  ;;  %v2741_v47 = vadd.f32 %v3828_v3, %v2733_v37  ;;  %v3925_v11 = vld [vmem:[%s6540_s3 + $0x370] sm:$0xff]  ;;  %v3926_v8 = vld [vmem:[%s6540_s3 + $0x378] sm:$0xff]  ;;  %v3919_v12 = vld [vmem:[%s6540_s3 + $0x340] sm:$0xff] }
 0xc3c   : > { %v3921_v3 = vld [vmem:[%s6540_s3 + $0x350] sm:$0xff]  ;;  %v3920_v41 = vld [vmem:[%s6540_s3 + $0x348] sm:$0xff] }
 0xc3d   : > { %v2711_v28 = vadd.f32 %v2703_v59, %v2671_v49  ;;  %v2712_v0 = vadd.f32 %v2695_v33, %v2672_v4  ;;  %2787 = vmatpush.msrb.mxu3 %v2750_v46  ;;  %v2749_v48 = vmax.f32 %v2741_v47, 0.0 }
 0xc3f   : > { %v2719_v31 = vadd.f32 %v3814_v6, %v2711_v28  ;;  %v2720_v34 = vadd.f32 %v3815_v7, %v2712_v0  ;;  %2767 = vmatpush.msrb.mxu2 %v2749_v48  ;;  %2788 = vmatpush.msrb.mxu3 %v2748_v53  ;;  %v3957_v48 = vld [vmem:[%s6539_s2 + $0x320] sm:$0xff]  ;;  %v3958_v53 = vld [vmem:[%s6539_s2 + $0x328] sm:$0xff] }
 0xc41   : > { %2768 = vmatpush.msrb.mxu2 %v2747_v23  ;;  %2789 = vmatpush.msrb.mxu3 %v2746_v21  ;;  %v2727_v61 = vmul.f32 %v4652_v30, %v2719_v31  ;;  %v2728_v22 = vmul.f32 %v4638_v16, %v2720_v34  ;;  %v3959_v31 = vld [vmem:[%s6539_s2 + $0x330] sm:$0xff]  ;;  %v3960_v34 = vld [vmem:[%s6539_s2 + $0x338] sm:$0xff]  ;;  %v3961_v23 = vld [vmem:[%s6539_s2 + $0x340] sm:$0xff] }
 0xc42   : > { %v3962_v21 = vld [vmem:[%s6539_s2 + $0x348] sm:$0xff] }
 0xc43   : > { %2769 = vmatpush.msrb.mxu2 %v2745_v40  ;;  %v2735_v13 = vadd.f32 %v3822_v27, %v2727_v61  ;;  %v2736_v58 = vadd.f32 %v3823_v38, %v2728_v22  ;;  %v3963_v27 = vld [vmem:[%s6539_s2 + $0x350] sm:$0xff]  ;;  %v3964_v38 = vld [vmem:[%s6539_s2 + $0x358] sm:$0xff]  ;;  %v3965_v40 = vld [vmem:[%s6539_s2 + $0x360] sm:$0xff] }
 0xc44   : > { %v3966_v61 = vld [vmem:[%s6539_s2 + $0x368] sm:$0xff]  ;;  %v3967_v22 = vld [vmem:[%s6539_s2 + $0x370] sm:$0xff] }
 0xc45   : > { %v2743_v24 = vmax.f32 %v2735_v13, 0.0  ;;  %v2744_v35 = vmax.f32 %v2736_v58, 0.0  ;;  %v3968_v13 = vld [vmem:[%s6539_s2 + $0x378] sm:$0xff]  ;;  %v3969_v58 = vld [vmem:[%s6539_s2 + $0x380] sm:$0xff] }
 0xc47   : > { %2770 = vmatpush.msrb.mxu2 %v2743_v24  ;;  %2790 = vmatpush.msrb.mxu3 %v2744_v35  ;;  %v3970_v24 = vld [vmem:[%s6539_s2 + $0x388] sm:$0xff]  ;;  %v3971_v35 = vld [vmem:[%s6539_s2 + $0x390] sm:$0xff] }
 0xc48   : > { %3917 = vmatmul.msk.f32.vlgmr.msrb.gmra.mxu2 %vm398_vm1, %v3916_v26  ;;  %3918 = vmatmul.msk.f32.vlgmr.msrb.gmra.mxu3 %vm398_vm1, %v3916_v26  ;;  %v3972_v26 = vld [vmem:[%s6539_s2 + $0x398] sm:$0xff] }
 0xccb   : > { %v2772_v18 = vpop.f32.mrf.mxu2  ;;  %v2792_v39 = vpop.f32.mrf.mxu3 }
 0xccc   : > { %v2795_v9 = vadd.f32 %v2772_v18, %v5611_v5  ;;  %v2796_v32 = vadd.f32 %v2792_v39, %v5613_v42  ;;  %v3946_v5 = vld [vmem:[%s6538_s1 + $0x88] sm:$0xff]  ;;  %v3947_v42 = vld [vmem:[%s6538_s1 + $0x90] sm:$0xff] }
 0xccd   : > { %v3974_v39 = vld [vmem:[%s6539_s2 + $0x3a8] sm:$0xff] }
 0xcce   : > { %v6060_v19 = vadd.f32 %v3830_v51, %v2795_v9  ;;  %v6062_v52 = vadd.f32 %v3831_v56, %v2796_v32  ;;  %v3973_v51 = vld [vmem:[%s6539_s2 + $0x3a0] sm:$0xff] }
 0xcd0   : > { %2858 = vmatpush.msra.mxu2 %v6060_v19  ;;  %2887 = vmatpush.msra.mxu3 %v6062_v52 }
 0xcd1   : > { %3949 = vmatmul.msk.f32.vlgmr.msra.gmra.mxu2 %vm295_vm0, %v3945_v20  ;;  %3953 = vmatmul.msk.f32.vlgmr.msra.gmra.mxu3 %vm295_vm0, %v3945_v20  ;;  %v3975_v20 = vld [vmem:[%s6539_s2 + $0x3b0] sm:$0xff] }
 0xcd9   : > { %3950 = vmatmul.msk.f32.gmra.mxu2 %vm295_vm0, %v3946_v5  ;;  %3954 = vmatmul.msk.f32.gmra.mxu3 %vm295_vm0, %v3946_v5 }
 0xce1   : > { %3951 = vmatmul.msk.f32.gmra.mxu2 %vm295_vm0, %v3947_v42  ;;  %3955 = vmatmul.msk.f32.gmra.mxu3 %vm295_vm0, %v3947_v42 }
 0xce9   : > { %3952 = vmatmul.msk.f32.gmra.mxu2 %vm295_vm0, %v3948_v14  ;;  %3956 = vmatmul.msk.f32.gmra.mxu3 %vm295_vm0, %v3948_v14  ;;  %v3976_v14 = vld [vmem:[%s6539_s2 + $0x3b8] sm:$0xff] }
 0xd54   : > { %v2860_v43 = vpop.f32.mrf.mxu2  ;;  %v2889_v62 = vpop.f32.mrf.mxu3 }
 0xd55   : > { %v2861_v46 = vadd.f32 %v3919_v12, %v2860_v43  ;;  %v2890_v47 = vadd.f32 %v3920_v41, %v2889_v62 }
 0xd57   : > { %v2901_v28 = vmax.f32 %v2861_v46, 0.0  ;;  %v2902_v0 = vmax.f32 %v2890_v47, 0.0 }
 0xd5c   : > { %v2863_v54 = vpop.f32.mrf.mxu2  ;;  %v2892_v63 = vpop.f32.mrf.mxu3 }
 0xd5d   : > { %v2864_v60 = vadd.f32 %v3921_v3, %v2863_v54  ;;  %v2893_v15 = vadd.f32 %v3922_v36, %v2892_v63  ;;  %v3977_v54 = vld [vmem:[%s6539_s2 + $0x3c0] sm:$0xff]  ;;  %v3980_v36 = vld [vmem:[%s6539_s2 + $0x3d8] sm:$0xff] }
 0xd5f   : > { %v2903_v7 = vmax.f32 %v2864_v60, 0.0  ;;  %v2904_v10 = vmax.f32 %v2893_v15, 0.0 }
 0xd64   : > { %v2866_v17 = vpop.f32.mrf.mxu2  ;;  %v2895_v2 = vpop.f32.mrf.mxu3 }
 0xd65   : > { %v2867_v45 = vadd.f32 %v3923_v55, %v2866_v17  ;;  %v2896_v25 = vadd.f32 %v3924_v1, %v2895_v2  ;;  %v3978_v2 = vld [vmem:[%s6539_s2 + $0x3c8] sm:$0xff] }
 0xd67   : > { %v2905_v33 = vmax.f32 %v2867_v45, 0.0  ;;  %v2906_v6 = vmax.f32 %v2896_v25, 0.0 }
 0xd6c   : > { %v2869_v59 = vpop.f32.mrf.mxu2  ;;  %v2898_v37 = vpop.f32.mrf.mxu3 }
 0xd6d   : > { %v2870_v50 = vadd.f32 %v3925_v11, %v2869_v59  ;;  %v2899_v44 = vadd.f32 %v3926_v8, %v2898_v37  ;;  %v3979_v11 = vld [vmem:[%s6539_s2 + $0x3d0] sm:$0xff] }
 0xd6f   : > { %v2907_v49 = vmax.f32 %v2870_v50, 0.0  ;;  %v2908_v4 = vmax.f32 %v2899_v44, 0.0 }
 0xd71   : > { %3018 = vmatpush.msrb.mxu2 %v2907_v49  ;;  %3107 = vmatpush.msrb.mxu3 %v2908_v4 }
 0xd73   : > { %3019 = vmatpush.msrb.mxu2 %v2905_v33  ;;  %3108 = vmatpush.msrb.mxu3 %v2906_v6 }
 0xd75   : > { %3020 = vmatpush.msrb.mxu2 %v2903_v7  ;;  %3109 = vmatpush.msrb.mxu3 %v2904_v10 }
 0xd77   : > { %3021 = vmatpush.msrb.mxu2 %v2901_v28  ;;  %3110 = vmatpush.msrb.mxu3 %v2902_v0 }
 0xd78   : > { %3981 = vmatmul.msk.f32.vlgmr.msrb.gmra.mxu2 %vm398_vm1, %v3957_v48  ;;  %4005 = vmatmul.msk.f32.vlgmr.msrb.gmra.mxu3 %vm398_vm1, %v3957_v48 }
 0xd80   : > { %3982 = vmatmul.msk.f32.gmra.mxu2 %vm398_vm1, %v3958_v53  ;;  %4006 = vmatmul.msk.f32.gmra.mxu3 %vm398_vm1, %v3958_v53 }
 0xd88   : > { %3983 = vmatmul.msk.f32.gmra.mxu2 %vm398_vm1, %v3959_v31  ;;  %4007 = vmatmul.msk.f32.gmra.mxu3 %vm398_vm1, %v3959_v31 }
 0xd90   : > { %3984 = vmatmul.msk.f32.gmra.mxu2 %vm398_vm1, %v3960_v34  ;;  %4008 = vmatmul.msk.f32.gmra.mxu3 %vm398_vm1, %v3960_v34 }
 0xd98   : > { %3985 = vmatmul.msk.f32.gmra.mxu2 %vm398_vm1, %v3961_v23  ;;  %4009 = vmatmul.msk.f32.gmra.mxu3 %vm398_vm1, %v3961_v23 }
 0xda0   : > { %3986 = vmatmul.msk.f32.gmra.mxu2 %vm398_vm1, %v3962_v21  ;;  %4010 = vmatmul.msk.f32.gmra.mxu3 %vm398_vm1, %v3962_v21 }
 0xda8   : > { %3987 = vmatmul.msk.f32.gmra.mxu2 %vm398_vm1, %v3963_v27  ;;  %4011 = vmatmul.msk.f32.gmra.mxu3 %vm398_vm1, %v3963_v27 }
 0xdb0   : > { %3988 = vmatmul.msk.f32.gmra.mxu2 %vm398_vm1, %v3964_v38  ;;  %4012 = vmatmul.msk.f32.gmra.mxu3 %vm398_vm1, %v3964_v38 }
 0xdb8   : > { %3989 = vmatmul.msk.f32.gmra.mxu2 %vm398_vm1, %v3965_v40  ;;  %4013 = vmatmul.msk.f32.gmra.mxu3 %vm398_vm1, %v3965_v40 }
 0xdc0   : > { %3990 = vmatmul.msk.f32.gmra.mxu2 %vm398_vm1, %v3966_v61  ;;  %4014 = vmatmul.msk.f32.gmra.mxu3 %vm398_vm1, %v3966_v61 }
 0xdc8   : > { %3991 = vmatmul.msk.f32.gmra.mxu2 %vm398_vm1, %v3967_v22  ;;  %4015 = vmatmul.msk.f32.gmra.mxu3 %vm398_vm1, %v3967_v22 }
 0xdd0   : > { %3992 = vmatmul.msk.f32.gmra.mxu2 %vm398_vm1, %v3968_v13  ;;  %4016 = vmatmul.msk.f32.gmra.mxu3 %vm398_vm1, %v3968_v13 }
 0xdd8   : > { %3993 = vmatmul.msk.f32.gmra.mxu2 %vm398_vm1, %v3969_v58  ;;  %4017 = vmatmul.msk.f32.gmra.mxu3 %vm398_vm1, %v3969_v58 }
 0xde0   : > { %3994 = vmatmul.msk.f32.gmra.mxu2 %vm398_vm1, %v3970_v24  ;;  %4018 = vmatmul.msk.f32.gmra.mxu3 %vm398_vm1, %v3970_v24 }
 0xde8   : > { %3995 = vmatmul.msk.f32.gmra.mxu2 %vm398_vm1, %v3971_v35  ;;  %4019 = vmatmul.msk.f32.gmra.mxu3 %vm398_vm1, %v3971_v35 }
 0xdf0   : > { %3996 = vmatmul.msk.f32.gmra.mxu2 %vm398_vm1, %v3972_v26  ;;  %4020 = vmatmul.msk.f32.gmra.mxu3 %vm398_vm1, %v3972_v26 }
 0xdf8   : > { %3997 = vmatmul.msk.f32.gmra.mxu2 %vm398_vm1, %v3973_v51  ;;  %4021 = vmatmul.msk.f32.gmra.mxu3 %vm398_vm1, %v3973_v51 }
 0xdfb   : > { %v3023_v18 = vpop.f32.mrf.mxu2  ;;  %v3112_v56 = vpop.f32.mrf.mxu3 }
 0xdfc   : > { %3184 = vrot.lane.b32.xlu2 %v3023_v18, %s4154_s10  ;;  %3200 = vrot.lane.b32.xlu0 %v3112_v56, %s4154_s10 }
 0xe00   : > { %3998 = vmatmul.msk.f32.gmra.mxu2 %vm398_vm1, %v3974_v39  ;;  %4022 = vmatmul.msk.f32.gmra.mxu3 %vm398_vm1, %v3974_v39 }
 0xe03   : > { %v3026_v9 = vpop.f32.mrf.mxu2  ;;  %v3115_v32 = vpop.f32.mrf.mxu3 }
 0xe04   : > { %3186 = vrot.lane.b32.xlu1 %v3026_v9, %s4154_s10  ;;  %3202 = vrot.lane.b32.xlu2 %v3115_v32, %s4154_s10 }
 0xe08   : > { %3999 = vmatmul.msk.f32.gmra.mxu2 %vm398_vm1, %v3975_v20  ;;  %4023 = vmatmul.msk.f32.gmra.mxu3 %vm398_vm1, %v3975_v20 }
 0xe0b   : > { %v3029_v5 = vpop.f32.mrf.mxu2  ;;  %v3118_v42 = vpop.f32.mrf.mxu3 }
 0xe0c   : > { %3188 = vrot.lane.b32.xlu0 %v3029_v5, %s4154_s10  ;;  %3204 = vrot.lane.b32.xlu1 %v3118_v42, %s4154_s10 }
 0xe10   : > { %4000 = vmatmul.msk.f32.gmra.mxu2 %vm398_vm1, %v3976_v14  ;;  %4024 = vmatmul.msk.f32.gmra.mxu3 %vm398_vm1, %v3976_v14 }
 0xe13   : > { %v3032_v43 = vpop.f32.mrf.mxu2  ;;  %v3121_v62 = vpop.f32.mrf.mxu3 }
 0xe14   : > { %3190 = vrot.lane.b32.xlu1 %v3032_v43, %s4154_s10  ;;  %3206 = vrot.lane.b32.xlu2 %v3121_v62, %s4154_s10 }
 0xe18   : > { %4001 = vmatmul.msk.f32.gmra.mxu2 %vm398_vm1, %v3977_v54  ;;  %4025 = vmatmul.msk.f32.gmra.mxu3 %vm398_vm1, %v3977_v54 }
 0xe1b   : > { %v3035_v63 = vpop.f32.mrf.mxu2  ;;  %v6223_v17 = vpop.f32.mrf.mxu3 }
 0xe20   : > { %4002 = vmatmul.msk.f32.gmra.mxu2 %vm398_vm1, %v3978_v2  ;;  %4026 = vmatmul.msk.f32.gmra.mxu3 %vm398_vm1, %v3978_v2 }
 0xe23   : > { %v3038_v55 = vpop.f32.mrf.mxu2  ;;  %v3127_v1 = vpop.f32.mrf.mxu3 }
 0xe24   : > { %3194 = vrot.lane.b32.xlu1 %v3038_v55, %s4154_s10 }
 0xe28   : > { %4003 = vmatmul.msk.f32.gmra.mxu2 %vm398_vm1, %v3979_v11  ;;  %4027 = vmatmul.msk.f32.gmra.mxu3 %vm398_vm1, %v3979_v11 }
 0xe2b   : > { %v3041_v8 = vpop.f32.mrf.mxu2  ;;  %v3130_v3 = vpop.f32.mrf.mxu3 }
 0xe2c   : > { %3196 = vrot.lane.b32.xlu1 %v3041_v8, %s4154_s10  ;;  %3212 = vrot.lane.b32.xlu2 %v3130_v3, %s4154_s10 }
 0xe30   : > { %4004 = vmatmul.msk.f32.gmra.mxu2 %vm398_vm1, %v3980_v36  ;;  %4028 = vmatmul.msk.f32.gmra.mxu3 %vm398_vm1, %v3980_v36 }
 0xe33   : > { %v3044_v59 = vpop.f32.mrf.mxu2  ;;  %v3133_v37 = vpop.f32.mrf.mxu3 }
 0xe34   : > { %3198 = vrot.lane.b32.xlu2 %v3044_v59, %s4154_s10  ;;  %3214 = vrot.lane.b32.xlu0 %v3133_v37, %s4154_s10 }
 0xe3b   : > { %v6245_v45 = vpop.f32.mrf.mxu2  ;;  %v6247_v25 = vpop.f32.mrf.mxu3 }
 0xe43   : > { %v6249_v50 = vpop.f32.mrf.mxu2  ;;  %v6251_v44 = vpop.f32.mrf.mxu3 }
 0xe4b   : > { %v6253_v12 = vpop.f32.mrf.mxu2  ;;  %v6255_v41 = vpop.f32.mrf.mxu3 }
 0xe53   : > { %v6257_v60 = vpop.f32.mrf.mxu2  ;;  %v6259_v15 = vpop.f32.mrf.mxu3 }
 0xe56   : > { %v6273_v53 = vpop.permute.xlu2 %3184 }
 0xe5b   : > { %v6261_v49 = vpop.f32.mrf.mxu2  ;;  %v6263_v4 = vpop.f32.mrf.mxu3 }
 0xe5e   : > { %v3203_v38 = vpop.permute.xlu2 %3202 }
 0xe63   : > { %v6265_v46 = vpop.f32.mrf.mxu2  ;;  %v6267_v47 = vpop.f32.mrf.mxu3 }
 0xe6b   : > { %v3065_v33 = vpop.f32.mrf.mxu2  ;;  %v3154_v6 = vpop.f32.mrf.mxu3 }
 0xe6e   : > { %v6283_v13 = vpop.permute.xlu2 %3206  ;;  %v6288_v58 = vpop.permute.xlu0 %3200 }
 0xe6f   : > { %v3216_v8 = vsel %vm681_vm2, %v6273_v53, %v6288_v58 }
 0xe70   : > { %v3281_v3 = vadd.f32 %v3216_v8, %v6247_v25 }
 0xe73   : > { %v3068_v7 = vpop.f32.mrf.mxu2  ;;  %v3157_v10 = vpop.f32.mrf.mxu3 }
 0xe76   : > { %v6269_v28 = vpop.permute.xlu1 %3186 }
 0xe7b   : > { %v3071_v0 = vpop.f32.mrf.mxu2  ;;  %v3160_v48 = vpop.f32.mrf.mxu3 }
 0xe7c   : > { %3232 = vrot.lane.b32.xlu0 %v3071_v0, %s4155_s11  ;;  %3248 = vrot.lane.b32.xlu1 %v3160_v48, %s4155_s11 }
 0xe7e   : > { %v6275_v23 = vpop.permute.xlu1 %3204  ;;  %v3189_v18 = vpop.permute.xlu0 %3188 }
 0xe83   : > { %v3074_v31 = vpop.f32.mrf.mxu2  ;;  %v3163_v34 = vpop.f32.mrf.mxu3 }
 0xe84   : > { %3234 = vrot.lane.b32.xlu1 %v3074_v31, %s4155_s11  ;;  %3250 = vrot.lane.b32.xlu2 %v3163_v34, %s4155_s11 }
 0xe86   : > { %v6281_v40 = vpop.permute.xlu1 %3190  ;;  %v3213_v51 = vpop.permute.xlu2 %3212 }
 0xe8b   : > { %v3077_v21 = vpop.f32.mrf.mxu2  ;;  %v3166_v27 = vpop.f32.mrf.mxu3 }
 0xe8c   : > { %3236 = vrot.lane.b32.xlu0 %v3077_v21, %s4155_s11  ;;  %3252 = vrot.lane.b32.xlu1 %v3166_v27, %s4155_s11 }
 0xe8e   : > { %v3199_v14 = vpop.permute.xlu2 %3198 }
 0xe93   : > { %v3080_v61 = vpop.f32.mrf.mxu2  ;;  %v3169_v22 = vpop.f32.mrf.mxu3 }
 0xe94   : > { %3238 = vrot.lane.b32.xlu2 %v3080_v61, %s4155_s11  ;;  %3192 = vrot.lane.b32.xlu1 %v3035_v63, %s4154_s10 }
 0xe95   : > { %3254 = vrot.lane.b32.xlu0 %v3169_v22, %s4155_s11 }
 0xe96   : > { %v6290_v24 = vpop.permute.xlu1 %3194 }
 0xe9b   : > { %v3083_v35 = vpop.f32.mrf.mxu2  ;;  %v6292_v26 = vpop.f32.mrf.mxu3 }
 0xe9c   : > { %3210 = vrot.lane.b32.xlu2 %v3127_v1, %s4154_s10  ;;  %3240 = vrot.lane.b32.xlu1 %v3083_v35, %s4155_s11 }
 0xe9e   : > { %v3197_v56 = vpop.permute.xlu1 %3196 }
 0xe9f   : > { %v3222_v39 = vsel %vm681_vm2, %v3197_v56, %v3213_v51  ;;  %v3230_v9 = vsel %vm681_vm2, %v3213_v51, %v3197_v56 }
 0xea0   : > { %v6300_v32 = vadd.f32 %v3230_v9, %v3065_v33  ;;  %v6302_v20 = vadd.f32 %v3222_v39, %v3154_v6  ;;  %v3217_v6 = vsel %vm681_vm2, %v6269_v28, %v3203_v38 }
 0xea1   : > { %v3283_v25 = vadd.f32 %v3217_v6, %v6251_v44  ;;  %v3226_v44 = vsel %vm681_vm2, %v6275_v23, %v3189_v18 }
 0xea3   : > { %v3086_v5 = vpop.f32.mrf.mxu2  ;;  %v3175_v42 = vpop.f32.mrf.mxu3 }
 0xea4   : > { %3208 = vrot.lane.b32.xlu2 %v6223_v17, %s4154_s10  ;;  %3242 = vrot.lane.b32.xlu0 %v3086_v5, %s4155_s11  ;;  %s188_s10 = sand.u32 1, %s4144_s16  }
 0xea5   : > { %3258 = vrot.lane.b32.xlu1 %v3175_v42, %s4155_s11  ;;  %s3437_s14 = scalar_lea.sflag [#allocation3], %s188_s10 }
 0xea6   : > { %v3215_v43 = vpop.permute.xlu0 %3214 }
 0xea7   : > { %v3223_v62 = vsel %vm681_vm2, %v3199_v14, %v3215_v43  ;;  %v3231_v54 = vsel %vm681_vm2, %v3215_v43, %v3199_v14 }
 0xea8   : > { %v6312_v63 = vadd.f32 %v3231_v54, %v3068_v7  ;;  %v6314_v2 = vadd.f32 %v3223_v62, %v3157_v10  ;;  %v3225_v7 = vsel %vm681_vm2, %v3203_v38, %v6269_v28  ;;  %v3284_v28 = vadd.f32 %v3226_v44, %v6253_v12 }
 0xea9   : > { %v3282_v10 = vadd.f32 %v3225_v7, %v6249_v50  ;;  %v3218_v50 = vsel %vm681_vm2, %v3189_v18, %v6275_v23  ;;  %v3219_v12 = vsel %vm681_vm2, %v6281_v40, %v6283_v13 }
 0xeaa   : > { %v3285_v38 = vadd.f32 %v3218_v50, %v6255_v41  ;;  %v3227_v41 = vsel %vm681_vm2, %v6283_v13, %v6281_v40  ;;  %v3287_v18 = vadd.f32 %v3219_v12, %v6259_v15 }
 0xeab   : > { %v3089_v55 = vpop.f32.mrf.mxu2  ;;  %v3178_v1 = vpop.f32.mrf.mxu3  ;;  %v3286_v23 = vadd.f32 %v3227_v41, %v6257_v60  ;;  %v3224_v60 = vsel %vm681_vm2, %v6288_v58, %v6273_v53 }
 0xeac   : > { %3244 = vrot.lane.b32.xlu0 %v3089_v55, %s4155_s11  ;;  %v3280_v40 = vadd.f32 %v3224_v60, %v6245_v45 }
 0xead   : > { %3260 = vrot.lane.b32.xlu1 %v3178_v1, %s4155_s11 }
 0xeb3   : > { %v3092_v17 = vpop.f32.mrf.mxu2  ;;  %v3181_v11 = vpop.f32.mrf.mxu3 }
 0xeb4   : > { %3246 = vrot.lane.b32.xlu0 %v3092_v17, %s4155_s11 }
 0xeb5   : > { %3262 = vrot.lane.b32.xlu1 %v3181_v11, %s4155_s11 }
 0xede   : > { %v3251_v0 = vpop.permute.xlu2 %3250 }
 0xeee   : > { %v3233_v36 = vpop.permute.xlu0 %3232  ;;  %v3249_v59 = vpop.permute.xlu1 %3248 }
 0xeef   : > { %v3272_v37 = vsel %vm730_vm3, %v3249_v59, %v3233_v36  ;;  %v3239_v9 = vpop.permute.xlu2 %3238  ;;  %v3264_v15 = vsel %vm730_vm3, %v3233_v36, %v3249_v59 }
 0xef0   : > { %v3289_v33 = vadd.f32 %v3281_v3, %v3272_v37  ;;  %v3288_v13 = vadd.f32 %v3280_v40, %v3264_v15 }
 0xef2   : > { %3320 = vrot.lane.b32.xlu1 %v3289_v33, %s4156_s12 }
 0xef6   : > { %v3235_v48 = vpop.permute.xlu1 %3234 }
 0xef7   : > { %v3265_v31 = vsel %vm730_vm3, %v3235_v48, %v3251_v0  ;;  %v3273_v34 = vsel %vm730_vm3, %v3251_v0, %v3235_v48  ;;  %v3211_v54 = vpop.permute.xlu2 %3210 }
 0xef8   : > { %v3290_v21 = vadd.f32 %v3282_v10, %v3265_v31  ;;  %v3291_v27 = vadd.f32 %v3283_v25, %v3273_v34  ;;  %v3221_v45 = vsel %vm681_vm2, %v6290_v24, %v3211_v54 }
 0xef9   : > { %v3299_v31 = vadd.f32 %v3221_v45, %v6267_v47 }
 0xefa   : > { %3314 = vrot.lane.b32.xlu2 %v3290_v21, %s4156_s12  ;;  %3322 = vrot.lane.b32.xlu0 %v3291_v27, %s4156_s12 }
 0xefe   : > { %v3237_v61 = vpop.permute.xlu0 %3236  ;;  %v3253_v22 = vpop.permute.xlu1 %3252 }
 0xeff   : > { %v3266_v35 = vsel %vm730_vm3, %v3237_v61, %v3253_v22  ;;  %v3274_v51 = vsel %vm730_vm3, %v3253_v22, %v3237_v61  ;;  %v3209_v17 = vpop.permute.xlu2 %3208 }
 0xf00   : > { %v3292_v56 = vadd.f32 %v3284_v28, %v3266_v35  ;;  %v3293_v39 = vadd.f32 %v3285_v38, %v3274_v51 }
 0xf02   : > { %3316 = vrot.lane.b32.xlu2 %v3292_v56, %s4156_s12  ;;  %3324 = vrot.lane.b32.xlu0 %v3293_v39, %s4156_s12 }
 0xf06   : > { %v3193_v55 = vpop.permute.xlu1 %3192 }
 0xf07   : > { %v3255_v5 = vpop.permute.xlu0 %3254 }
 0xf08   : > { %v3267_v42 = vsel %vm730_vm3, %v3239_v9, %v3255_v5  ;;  %v3275_v14 = vsel %vm730_vm3, %v3255_v5, %v3239_v9 }
 0xf09   : > { %v3294_v43 = vadd.f32 %v3286_v23, %v3267_v42  ;;  %v3295_v62 = vadd.f32 %v3287_v18, %v3275_v14  ;;  %v3929_v18 = vld [vmem:[%s6540_s3 + $0x390] sm:$0xff] }
 0xf0b   : > { %3326 = vrot.lane.b32.xlu0 %v3295_v62, %s4156_s12  ;;  %3318 = vrot.lane.b32.xlu2 %v3294_v43, %s4156_s12  ;;  %v3934_v62 = vld [vmem:[%s6540_s3 + $0x3b8] sm:$0xff] }
 0xf0e   : > { %v3241_v11 = vpop.permute.xlu1 %3240 }
 0xf13   : > { %3312 = vrot.lane.b32.xlu0 %v3288_v13, %s4156_s12  ;;  %3256 = vrot.lane.b32.xlu2 %v6292_v26, %s4155_s11  ;;  %v3229_v26 = vsel %vm681_vm2, %v3211_v54, %v6290_v24  ;;  %s3516_s11 = sshll.u32 %s188_s10, 4  ;;  %s4038_s12 = sshll.u32 %s4204_s19, 4 }
 0xf14   : > { %v3298_v28 = vadd.f32 %v3229_v26, %v6265_v46  ;;  %v3930_v46 = vld [vmem:[%s6540_s3 + $0x398] sm:$0xff]  ;;  %s3448_s6 = scalar_lea.hbm %s6541_s4, %s4038_s12  ;;  %s190_s19 = scalar_lea.vmem [#allocation2], %s3516_s11 }
 0xf15   : > { %s3450_s9 = sshll.u32 %s190_s19, 4  ;;  %s3452_s13 = sshll.u32 %s3448_s6, 4  ;;  %s3451_s9 = int_to_ptr.vmem [resolvable:$true] %s3450_s9  ;;  %s3453_s13 = int_to_ptr.hbm [resolvable:$true] %s3452_s13 }
 0xf16   : > { %v3243_v1 = vpop.permute.xlu0 %3242  ;;  %s4104_s20 = sshra.s32 %s3453_s13, 4  ;;  %s4110_s11 = scalar_lea.hbm %s6541_s4, 32  ;;  %s4105_s20 = int_to_ptr.hbm [resolvable:$true] %s4104_s20 }
 0xf17   : > { %v3259_v37 = vpop.permute.xlu1 %3258  ;;  %s4106_s22 = scalar_lea.hbm %s4105_s20, 16  ;;  %p4111_p0 = scmp.lt.s32.totalorder %s4105_s20, %s6541_s4 }
 0xf18   : > { %v3277_v10 = vsel %vm730_vm3, %v3259_v37, %v3243_v1  ;;  %v3269_v21 = vsel %vm730_vm3, %v3243_v1, %v3259_v37  ;;  %v3220_v1 = vsel %vm681_vm2, %v3193_v55, %v3209_v17  ;;  %p4107_p11 = scmp.ne.s32.totalorder %s4105_s20, %s4106_s22  ;;  %p4112_p1 = scmp.lt.s32.totalorder %s4110_s11, %s4106_s22 }
 0xf19   : > { %v3307_v38 = vadd.f32 %v3299_v31, %v3277_v10  ;;  %v3306_v35 = vadd.f32 %v3298_v28, %v3269_v21 }
 0xf1a   : > { %p4108_p12 = pnand %p4107_p11, %p4221_p5  ;;  %p4113_p2 = por %p4112_p1, %p4111_p0 }
 0xf1c   : > { %p4109_p13 = pneg %p4108_p12 }
 0xf1e   : > { %v3245_v8 = vpop.permute.xlu0 %3244  ;;  %p4114_p3 = pnand %p4113_p2, %p4109_p13 }
 0xf1f   : > { %v3261_v36 = vpop.permute.xlu1 %3260 }
 0xf20   : > { %v3278_v59 = vsel %vm730_vm3, %v3261_v36, %v3245_v8  ;;  %v3270_v25 = vsel %vm730_vm3, %v3245_v8, %v3261_v36 }
 0xf21   : > { %v3309_v27 = vadd.f32 %v6302_v20, %v3278_v59  ;;  %v3308_v61 = vadd.f32 %v6300_v32, %v3270_v25  ;;  %v3932_v20 = vld [vmem:[%s6540_s3 + $0x3a8] sm:$0xff]  ;;  %v3931_v32 = vld [vmem:[%s6540_s3 + $0x3a0] sm:$0xff]  ;;  %v3297_v59 = vadd.f32 %v3220_v1, %v6263_v4  ;;  %v3941_v25 = vld [vmem:[%s6540_s3 + $0x3f0] sm:$0xff] }
 0xf26   : > { %v3247_v53 = vpop.permute.xlu0 %3246 }
 0xf27   : > { %v3263_v50 = vpop.permute.xlu1 %3262 }
 0xf28   : > { %v3279_v51 = vsel %vm730_vm3, %v3263_v50, %v3247_v53  ;;  %v3271_v12 = vsel %vm730_vm3, %v3247_v53, %v3263_v50  ;;  %v3928_v50 = vld [vmem:[%s6540_s3 + $0x388] sm:$0xff] }
 0xf29   : > { %v3311_v23 = vadd.f32 %v6314_v2, %v3279_v51  ;;  %v3228_v2 = vsel %vm681_vm2, %v3209_v17, %v3193_v55  ;;  %v3310_v40 = vadd.f32 %v6312_v63, %v3271_v12  ;;  %v3942_v55 = vld [vmem:[%s6540_s3 + $0x3f8] sm:$0xff]  ;;  %v3940_v17 = vld [vmem:[%s6540_s3 + $0x3e8] sm:$0xff] }
 0xf2a   : > { %v3296_v63 = vadd.f32 %v3228_v2, %v6261_v49 }
 0xf54   : > { %v3315_v3 = vpop.permute.xlu2 %3314 }
 0xf5c   : > { %v3317_v58 = vpop.permute.xlu2 %3316 }
 0xf65   : > { %v3319_v6 = vpop.permute.xlu2 %3318 }
 0xf6c   : > { %v3323_v33 = vpop.permute.xlu0 %3322 }
 0xf6d   : > { %v3333_v0 = vsel %vm795_vm5, %v3323_v33, %v3315_v3  ;;  %v3329_v44 = vsel %vm795_vm5, %v3315_v3, %v3323_v33  ;;  %v3257_v14 = vpop.permute.xlu2 %3256  ;;  %v3933_v3 = vld [vmem:[%s6540_s3 + $0x3b0] sm:$0xff] }
 0xf6e   : > { %v3338_v47 = vmul.f32 %v4568_v29, %v3333_v0  ;;  %v3347_v56 = vadd.f32 %v3329_v44, %v3307_v38  ;;  %v3268_v37 = vsel %vm730_vm3, %v3241_v11, %v3257_v14  ;;  %v3276_v36 = vsel %vm730_vm3, %v3257_v14, %v3241_v11  ;;  %v3939_v11 = vld [vmem:[%s6540_s3 + $0x3e0] sm:$0xff] }
 0xf6f   : > { %v3304_v10 = vadd.f32 %v3296_v63, %v3268_v37  ;;  %v3305_v4 = vadd.f32 %v3297_v59, %v3276_v36 }
 0xf70   : > { %v3346_v41 = vadd.f32 %v3338_v47, %v3306_v35  ;;  %v3355_v42 = vadd.f32 %v3930_v46, %v3347_v56  ;;  %v3927_v56 = vld [vmem:[%s6540_s3 + $0x380] sm:$0xff] }
 0xf72   : > { %v3354_v8 = vadd.f32 %v3929_v18, %v3346_v41  ;;  %v3363_v26 = vmul.f32 %v4638_v16, %v3355_v42 }
 0xf74   : > { %v3325_v7 = vpop.permute.xlu0 %3324  ;;  %v3362_v0 = vmul.f32 %v4652_v30, %v3354_v8 }
 0xf75   : > { %v3334_v48 = vsel %vm795_vm5, %v3325_v7, %v3317_v58  ;;  %v3330_v24 = vsel %vm795_vm5, %v3317_v58, %v3325_v7  ;;  %v3938_v7 = vld [vmem:[%s6540_s3 + $0x3d8] sm:$0xff] }
 0xf76   : > { %v3340_v34 = vmul.f32 %v4568_v29, %v3334_v48  ;;  %v3349_v22 = vadd.f32 %v3330_v24, %v3309_v27  ;;  %v3321_v48 = vpop.permute.xlu1 %3320  ;;  %v3937_v27 = vld [vmem:[%s6540_s3 + $0x3d0] sm:$0xff] }
 0xf78   : > { %v3348_v39 = vadd.f32 %v3340_v34, %v3308_v61  ;;  %v3357_v9 = vadd.f32 %v3932_v20, %v3349_v22  ;;  %v3371_v61 = vadd.f32 %v3938_v7, %v3363_v26  ;;  %v3370_v20 = vadd.f32 %v3937_v27, %v3362_v0 }
 0xf7a   : > { %v3356_v43 = vadd.f32 %v3931_v32, %v3348_v39  ;;  %v3365_v33 = vmul.f32 %v4638_v16, %v3357_v9  ;;  %v3935_v9 = vld [vmem:[%s6540_s3 + $0x3c0] sm:$0xff] }
 0xf7c   : > { %v3364_v45 = vmul.f32 %v4652_v30, %v3356_v43  ;;  %v3373_v21 = vadd.f32 %v3940_v17, %v3365_v33 }
 0xf7d   : > { %v3327_v5 = vpop.permute.xlu0 %3326 }
 0xf7e   : > { %v3331_v60 = vsel %vm795_vm5, %v3319_v6, %v3327_v5  ;;  %v3335_v15 = vsel %vm795_vm5, %v3327_v5, %v3319_v6  ;;  %v3372_v38 = vadd.f32 %v3939_v11, %v3364_v45  ;;  %v3381_v12 = vmax.f32 %v3373_v21, 0.0 }
 0xf7f   : > { %v3342_v13 = vmul.f32 %v4568_v29, %v3335_v15  ;;  %v3351_v54 = vadd.f32 %v3331_v60, %v3311_v23  ;;  %v3379_v23 = vmax.f32 %v3371_v61, 0.0  ;;  %v3378_v5 = vmax.f32 %v3370_v20, 0.0 }
 0xf81   : > { %v3350_v53 = vadd.f32 %v3342_v13, %v3310_v40  ;;  %v3359_v58 = vadd.f32 %v3934_v62, %v3351_v54  ;;  %v4029_v62 = vld [vmem:[%s6539_s2 + $0x3e0] sm:$0xff] }
 0xf82   : > { %v3943_v40 = vld [vmem:[%s6540_s3 + $0x400] sm:$0xff] }
 0xf83   : > { %v3358_v6 = vadd.f32 %v3933_v3, %v3350_v53  ;;  %v3367_v49 = vmul.f32 %v4638_v16, %v3359_v58 }
 0xf85   : > { %v3366_v31 = vmul.f32 %v4652_v30, %v3358_v6  ;;  %v3313_v24 = vpop.permute.xlu0 %3312  ;;  %v3375_v34 = vadd.f32 %v3942_v55, %v3367_v49 }
 0xf86   : > { %v3328_v44 = vsel %vm795_vm5, %v3313_v24, %v3321_v48  ;;  %v3332_v28 = vsel %vm795_vm5, %v3321_v48, %v3313_v24 }
 0xf87   : > { %v3336_v47 = vmul.f32 %v4568_v29, %v3332_v28  ;;  %v3345_v22 = vadd.f32 %v3328_v44, %v3305_v4  ;;  %v3383_v35 = vmax.f32 %v3375_v34, 0.0  ;;  %v3374_v51 = vadd.f32 %v3941_v25, %v3366_v31 }
 0xf88   : > { %v3380_v29 = vmax.f32 %v3372_v38, 0.0 }
 0xf89   : > { %v3344_v39 = vadd.f32 %v3336_v47, %v3304_v10  ;;  %v3353_v46 = vadd.f32 %v3928_v50, %v3345_v22  ;;  %3420 = vmatpush.msrb.mxu1 %v3383_v35  ;;  %v3382_v32 = vmax.f32 %v3374_v51, 0.0 }
 0xf8b   : > { %v3352_v41 = vadd.f32 %v3927_v56, %v3344_v39  ;;  %3400 = vmatpush.msrb.mxu0 %v3382_v32  ;;  %3421 = vmatpush.msrb.mxu1 %v3381_v12  ;;  %v3361_v18 = vmul.f32 %v4638_v16, %v3353_v46 }
 0xf8d   : > { %3401 = vmatpush.msrb.mxu0 %v3380_v29  ;;  %3422 = vmatpush.msrb.mxu1 %v3379_v23  ;;  %v3369_v42 = vadd.f32 %v3936_v57, %v3361_v18  ;;  %v3360_v14 = vmul.f32 %v4652_v30, %v3352_v41  ;;  %v3944_v30 = vld [vmem:[%s6540_s3 + $0x408] sm:$0xff] }
 0xf8f   : > { %3402 = vmatpush.msrb.mxu0 %v3378_v5  ;;  %v3377_v43 = vmax.f32 %v3369_v42, 0.0  ;;  %v3368_v60 = vadd.f32 %v3935_v9, %v3360_v14 }
 0xf91   : > { %3423 = vmatpush.msrb.mxu1 %v3377_v43  ;;  %v3376_v16 = vmax.f32 %v3368_v60, 0.0 }
 0xf92   : > { %4031 = vmatmul.msk.f32.vlgmr.msrb.gmra.mxu1 %vm398_vm1, %v4029_v62 }
 0xf93   : > { %3403 = vmatpush.msrb.mxu0 %v3376_v16 }
 0xf94   : > { %4030 = vmatmul.msk.f32.vlgmr.msrb.gmra.mxu0 %vm398_vm1, %v4029_v62 }
0x100f   : > { %v3425_v15 = vpop.f32.mrf.mxu1 }
0x1010   : > { %v3429_v2 = vadd.f32 %v3425_v15, %v6062_v52 }
0x1011   : > { %v3405_v13 = vpop.f32.mrf.mxu0 }
0x1012   : > { %v3431_v54 = vadd.f32 %v3944_v30, %v3429_v2  ;;  %v3428_v1 = vadd.f32 %v3405_v13, %v6060_v19 }
0x1014   : > { %v3433_v8 = vmax.f32 %v3431_v54, 0.0  ;;  %v3430_v3 = vadd.f32 %v3943_v40, %v3428_v1 }
0x1016   : > { %3435 = vst [vmem:[%s190_s19 + $0x8] sm:$0xff] %v3433_v8  ;;  %v3432_v52 = vmax.f32 %v3430_v3, 0.0 }
0x1018   : > { %3434 = vst [vmem:[%s190_s19] sm:$0xff] %v3432_v52 }
0x1019   : > { %4117 = shalt.err (!%p4114_p3)
}
0x101a   : > { %4047 = dma.vmem_to_hbm [thread:$0]  (%p4221_p5), %s3451_s9, 256, %s3453_s13, %s3437_s14  }
0x101b PF: > { %p4053_p4 = scmp.ge.s32.totalorder %s4152_s18, 2  ;;  %s3464_s10 = sand.u32 1, %s4140_s15  }
0x101c   : > { %s3465_s29 = scalar_lea.sflag [#allocation3], %s3464_s10 }
0x101d   : > { %p4050_p7 = pnand %p4053_p4, %p4225_p6 }
0x101f   : > { %p4051_p8 = pneg %p4050_p7 }
0x1021   : > { %4135 = dma.done.wait (%p4051_p8), %s3465_s29, 256  }
0x1022   : > { %4137 = vsyncadd (%p4051_p8), %s3465_s29, 4294967040  ;;  %p14_p9 = scmp.ge.s32.totalorder %s4208_s21, 4   ;;  %s6552_s15 = smov %s4144_s16 }
0x1023   : > { %s6553_s16 = smov %s4148_s17  ;;  %s6554_s17 = smov %s4219_s24 }
0x1024   : > { %s6555_s18 = smov %s4208_s21  ;;  %16 = sbr.rel (!%p14_p9) target bundleno = 3 (0x3), region = 83 }
0x1029   :  { %3471 = vsyncpa [#allocation3], 1 }
0x102a   :  { %3473 = vsyncpa [#allocation3 + $0x1], 1 }

</bundles_post_ra>
